<compile_context>
chip_gen: v5e
topology: v5e:2x2
jax: 0.10.0
libtpu: 0.0.40
codegen_flags: <defaults>
</compile_context>

<pallas_src>
import functools

import jax
import jax.numpy as jnp
from jax.experimental import pallas as pl
from jax.experimental.pallas import tpu as pltpu

COMPUTE_DTYPE = jnp.bfloat16          # MXU-native operand / feature-map dtype
VMEM_LIMIT = 32 * 1024 * 1024         # explicit scoped-VMEM budget (all gens)


def _round_up(x, m):
    return (x + m - 1) // m * m


def _pick_tile(d, pref, align):
    """Return (padded_dim, tile) with tile | padded_dim and tile % align == 0."""
    dp = _round_up(d, align)
    if dp <= pref:
        return dp, dp
    best = align
    t = align
    while t <= pref:
        if dp % t == 0:
            best = t
        t += align
    return dp, best


# ----------------------------------------------------------------------------
# Kernel 1: fused dilated KxK conv ("same" padding) + bias + ReLU.
# One grid step = one image.  The zero-padded image lives only in VMEM; the
# K*K taps are accumulated as per-tap matmuls (bf16 operands, f32 accumulate).
# ----------------------------------------------------------------------------
def _conv_tap_kernel(x_ref, w_ref, b_ref, o_ref, pad_ref, *, H, W, ksize,
                     dilation, relu):
    cin = x_ref.shape[-1]
    pad = dilation * (ksize // 2)

    # Build the zero-padded image in VMEM (no HBM padding pass).
    pad_ref[...] = jnp.zeros_like(pad_ref)
    pad_ref[pad:pad + H, pad:pad + W, :] = x_ref[0]

    acc = None
    for ti in range(ksize):
        for tj in range(ksize):
            win = pad_ref[ti * dilation:ti * dilation + H,
                          tj * dilation:tj * dilation + W, :]
            lhs = win.reshape(H * W, cin)
            part = jnp.dot(lhs, w_ref[ti * ksize + tj],
                           preferred_element_type=jnp.float32)
            acc = part if acc is None else acc + part

    y = acc + b_ref[...]                  # f32 epilogue
    if relu:
        y = jnp.maximum(y, 0.0)
    o_ref[0] = y.astype(o_ref.dtype)


def conv2d_tap(x, w_taps, b_row, *, ksize, dilation=1, relu=True):
    """x:(B,H,W,Cin) bf16; w_taps:(k*k,Cin,Cout) bf16; b_row:(1,Cout) f32."""
    B, H, W, Cin = x.shape
    Cout = w_taps.shape[-1]
    pad = dilation * (ksize // 2)
    out = pl.pallas_call(
        functools.partial(_conv_tap_kernel, H=H, W=W, ksize=ksize,
                          dilation=dilation, relu=relu),
        out_shape=jax.ShapeDtypeStruct((B, H * W, Cout), COMPUTE_DTYPE),
        grid_spec=pltpu.PrefetchScalarGridSpec(
            num_scalar_prefetch=0,
            grid=(B,),
            in_specs=[
                pl.BlockSpec((1, H, W, Cin), lambda b: (b, 0, 0, 0)),
                pl.BlockSpec((ksize * ksize, Cin, Cout), lambda b: (0, 0, 0)),
                pl.BlockSpec((1, Cout), lambda b: (0, 0)),
            ],
            out_specs=pl.BlockSpec((1, H * W, Cout), lambda b: (b, 0, 0)),
            scratch_shapes=[
                pltpu.VMEM((H + 2 * pad, W + 2 * pad, Cin), COMPUTE_DTYPE)],
        ),
        compiler_params=pltpu.CompilerParams(
            dimension_semantics=("parallel",),
            vmem_limit_bytes=VMEM_LIMIT),
    )(x, w_taps, b_row)
    return out.reshape(B, H, W, Cout)


# ----------------------------------------------------------------------------
# Kernel 2: 1x1 conv + bias + ReLU, fused with the global average pool of the
# *input* feature map (used for the ASPP 1x1 branch; the pooled vector feeds
# the ASPP pooling branch).  Pool reduce rides the MXU via a ones-row matmul.
# ----------------------------------------------------------------------------
def _conv1x1_pool_kernel(x_ref, w_ref, b_ref, o_ref, pool_ref, *, H, W, relu):
    cin = x_ref.shape[-1]
    x2d = x_ref[0].reshape(H * W, cin)

    y = jnp.dot(x2d, w_ref[0], preferred_element_type=jnp.float32) + b_ref[...]
    if relu:
        y = jnp.maximum(y, 0.0)
    o_ref[0] = y.astype(o_ref.dtype)

    ones = jnp.full((1, H * W), 1.0, dtype=x2d.dtype)
    pool_ref[0] = (jnp.dot(ones, x2d, preferred_element_type=jnp.float32)
                   * (1.0 / (H * W)))


def conv1x1_with_pool(x, w_taps, b_row, *, relu=True):
    B, H, W, Cin = x.shape
    Cout = w_taps.shape[-1]
    y, pooled = pl.pallas_call(
        functools.partial(_conv1x1_pool_kernel, H=H, W=W, relu=relu),
        out_shape=(jax.ShapeDtypeStruct((B, H * W, Cout), COMPUTE_DTYPE),
                   jax.ShapeDtypeStruct((B, 1, Cin), jnp.float32)),
        grid_spec=pltpu.PrefetchScalarGridSpec(
            num_scalar_prefetch=0,
            grid=(B,),
            in_specs=[
                pl.BlockSpec((1, H, W, Cin), lambda b: (b, 0, 0, 0)),
                pl.BlockSpec((1, Cin, Cout), lambda b: (0, 0, 0)),
                pl.BlockSpec((1, Cout), lambda b: (0, 0)),
            ],
            out_specs=(pl.BlockSpec((1, H * W, Cout), lambda b: (b, 0, 0)),
                       pl.BlockSpec((1, 1, Cin), lambda b: (b, 0, 0))),
        ),
        compiler_params=pltpu.CompilerParams(
            dimension_semantics=("parallel",),
            vmem_limit_bytes=VMEM_LIMIT),
    )(x, w_taps, b_row)
    return y.reshape(B, H, W, Cout), pooled.reshape(B, Cin)


# ----------------------------------------------------------------------------
# Kernel 3: fused ASPP combine + ReLU + FINAL global average pool.
#   feat = mean_HW( ReLU( sum_i branch_i @ W_i + (pooled @ W_pool + bias) ) )
# The (B,HW,256) projected map is never written to HBM (Dropout = identity).
# HW-pad rows are masked via the ones-row reduction vector.
# ----------------------------------------------------------------------------
def _aspp_combine_pool_kernel(*refs, n_br, hw_total, thw, inv_hw):
    add_ref = refs[0]                          # (1, 1, C) per-image row (f32)
    br = refs[1:1 + n_br]                      # each (1, thw, C) bf16
    ws = refs[1 + n_br:1 + 2 * n_br]           # each (C, C) bf16
    o_ref = refs[1 + 2 * n_br]                 # (1, 1, C) f32
    acc_ref = refs[2 + 2 * n_br]               # (1, C) f32 scratch
    m = pl.program_id(1)

    @pl.when(m == 0)
    def _():
        acc_ref[...] = jnp.zeros_like(acc_ref)

    acc = jnp.dot(br[0][0], ws[0][...], preferred_element_type=jnp.float32)
    for i in range(1, n_br):
        acc = acc + jnp.dot(br[i][0], ws[i][...],
                            preferred_element_type=jnp.float32)
    acc = acc + add_ref[0]                     # broadcast (1,C) over rows
    acc = jnp.maximum(acc, 0.0)                # (thw, C) f32

    # masked per-image row sum via a ones-row matmul (MXU)
    rows = m * thw + jax.lax.broadcasted_iota(jnp.int32, (1, thw), 1)
    mask = (rows < hw_total).astype(jnp.float32)
    acc_ref[...] += jnp.dot(mask, acc, preferred_element_type=jnp.float32)

    @pl.when(m == pl.num_programs(1) - 1)
    def _():
        o_ref[0] = acc_ref[...] * inv_hw


def aspp_combine_pool(branches, ws, add_row):
    """branches: list of (B,HW,C) bf16; ws: list of (C,C) bf16;
    add_row: (B,1,C) f32  ->  (B,C) f32 pooled feature."""
    n_br = len(branches)
    B, HW, C = branches[0].shape
    HWp, thw = _pick_tile(HW, 2048, 16)        # 16-aligned for bf16 sublanes
    if HWp != HW:
        branches = [jnp.pad(b, ((0, 0), (0, HWp - HW), (0, 0)))
                    for b in branches]

    in_specs = ([pl.BlockSpec((1, 1, C), lambda b, m: (b, 0, 0))]
                + [pl.BlockSpec((1, thw, C), lambda b, m: (b, m, 0))] * n_br
                + [pl.BlockSpec((C, C), lambda b, m: (0, 0))] * n_br)

    out = pl.pallas_call(
        functools.partial(_aspp_combine_pool_kernel, n_br=n_br, hw_total=HW,
                          thw=thw, inv_hw=1.0 / HW),
        out_shape=jax.ShapeDtypeStruct((B, 1, C), jnp.float32),
        grid_spec=pltpu.PrefetchScalarGridSpec(
            num_scalar_prefetch=0,
            grid=(B, HWp // thw),
            in_specs=in_specs,
            out_specs=pl.BlockSpec((1, 1, C), lambda b, m: (b, 0, 0)),
            scratch_shapes=[pltpu.VMEM((1, C), jnp.float32)],
        ),
        compiler_params=pltpu.CompilerParams(
            dimension_semantics=("parallel", "arbitrary"),
            vmem_limit_bytes=VMEM_LIMIT),
    )(add_row, *branches, *ws)
    return out.reshape(B, C)


# ----------------------------------------------------------------------------
# Kernel 4: fused MLP head: Linear -> GroupNorm -> ReLU -> Linear.
# GroupNorm stats via a precomputed (channels x groups) 0/1 assignment matmul.
# ----------------------------------------------------------------------------
def _mlp_kernel(x_ref, w1_ref, b1_ref, g_ref, beta_ref, a_ref, w2_ref, b2_ref,
                o_ref, *, group_size, eps):
    x = x_ref[...]
    h = jnp.dot(x, w1_ref[...], preferred_element_type=jnp.float32) + b1_ref[...]

    a = a_ref[...]                                   # (C, Gp) 0/1 assignment
    gsum = jnp.dot(h, a, preferred_element_type=jnp.float32)
    gsq = jnp.dot(h * h, a, preferred_element_type=jnp.float32)
    gmean = gsum / group_size
    gvar = jnp.maximum(gsq / group_size - gmean * gmean, 0.0)
    mean_full = jnp.dot(gmean, a.T, preferred_element_type=jnp.float32)
    var_full = jnp.dot(gvar, a.T, preferred_element_type=jnp.float32)

    hn = (h - mean_full) * jax.lax.rsqrt(var_full + eps)
    hn = hn * g_ref[...] + beta_ref[...]
    hn = jnp.maximum(hn, 0.0)

    o_ref[...] = (jnp.dot(hn, w2_ref[...], preferred_element_type=jnp.float32)
                  + b2_ref[...]).astype(o_ref.dtype)


def mlp_head(x, p, num_classes, eps=1e-5):
    B = x.shape[0]
    Np2 = p["w2"].shape[1]
    out = pl.pallas_call(
        functools.partial(_mlp_kernel, group_size=p["group_size"], eps=eps),
        out_shape=jax.ShapeDtypeStruct((B, Np2), jnp.float32),
    )(x, p["w1"], p["b1"], p["gamma"], p["beta"], p["assign"], p["w2"], p["b2"])
    return out[:, :num_classes]


# ----------------------------------------------------------------------------
# Deterministic parameter construction (weights pre-packed per-tap, bf16)
# ----------------------------------------------------------------------------
def _pack_conv_taps(key, ksize, cin, cout, cin_store=None):
    if cin_store is None:
        cin_store = cin
    wk, bk = jax.random.split(key)
    fan_in = ksize * ksize * cin
    w = jax.random.normal(wk, (ksize, ksize, cin, cout), jnp.float32) \
        * (2.0 / fan_in) ** 0.5
    b = jax.random.normal(bk, (cout,), jnp.float32) * 0.01
    wt = jnp.zeros((ksize * ksize, cin_store, cout), jnp.float32)
    wt = wt.at[:, :cin, :].set(w.reshape(ksize * ksize, cin, cout))
    return {"w": wt.astype(COMPUTE_DTYPE),
            "b": b.reshape(1, cout),
            "cin": cin_store, "cout": cout, "ksize": ksize}


def build_params(key, in_ch, layers, atrous_rates, num_classes, num_groups):
    keys = iter(jax.random.split(key, 64))
    params = {}

    # ---- encoder -----------------------------------------------------------
    # TODO(synk): UNetEncoder source is not provided; this uses a ResNet-style
    # dilated conv stack (3x3 conv + ReLU, widths 64/128/256/512, dilations
    # 1/2/4/8 for replace_stride_with_dilation) ending with 512 channels.
    enc = [dict(_pack_conv_taps(next(keys), 3, in_ch, 64, cin_store=64), dil=1)]
    widths = (64, 128, 256, 512)
    dils = (1, 2, 4, 8)
    prev = 64
    for stage, (w_out, d) in enumerate(zip(widths, dils)):
        for _ in range(layers[stage]):
            enc.append(dict(_pack_conv_taps(next(keys), 3, prev, w_out), dil=d))
            prev = w_out
    params["encoder"] = enc

    # ---- ASPP (512 -> 256) -------------------------------------------------
    params["aspp_1x1"] = _pack_conv_taps(next(keys), 1, 512, 256)
    params["aspp_atrous"] = [
        dict(_pack_conv_taps(next(keys), 3, 512, 256), dil=r)
        for r in atrous_rates
    ]
    # pooling-branch 1x1 conv (+folded BN): tiny, kept f32 / plain XLA
    kpw, kpb = jax.random.split(next(keys))
    params["aspp_pool"] = {
        "w": jax.random.normal(kpw, (512, 256), jnp.float32) * (2.0 / 512) ** 0.5,
        "b": jax.random.normal(kpb, (256,), jnp.float32) * 0.01,
    }
    # projection 1x1 over concatenated channels, stored as per-branch blocks
    n_sp = 1 + len(atrous_rates)
    kw_, kb_ = jax.random.split(next(keys))
    k_tot = (n_sp + 1) * 256
    w_full = jax.random.normal(kw_, (k_tot, 256), jnp.float32) * (2.0 / k_tot) ** 0.5
    params["aspp_proj"] = {
        "w_br": [w_full[i * 256:(i + 1) * 256].astype(COMPUTE_DTYPE)
                 for i in range(n_sp)],
        "w_pool": w_full[n_sp * 256:],                       # (256,256) f32
        "b": jax.random.normal(kb_, (256,), jnp.float32) * 0.01,
    }

    # ---- MLP head (f32; tiny, accuracy-sensitive) ---------------------------
    k1, k2, k3, k4, k5, k6 = jax.random.split(next(keys), 6)
    Np2 = _round_up(num_classes, 128)
    group_size = 256 // num_groups
    assign = jnp.zeros((256, 128), jnp.float32)
    ch = jnp.arange(256)
    assign = assign.at[ch, ch // group_size].set(1.0)
    w2 = jax.random.normal(k5, (256, num_classes), jnp.float32) * (1.0 / 256) ** 0.5
    b2 = jax.random.normal(k6, (num_classes,), jnp.float32) * 0.01
    params["mlp"] = {
        "w1": jax.random.normal(k1, (256, 256), jnp.float32) * (1.0 / 256) ** 0.5,
        "b1": (jax.random.normal(k2, (256,), jnp.float32) * 0.01).reshape(1, 256),
        "gamma": (1.0 + 0.1 * jax.random.normal(k3, (256,), jnp.float32)).reshape(1, 256),
        "beta": (0.1 * jax.random.normal(k4, (256,), jnp.float32)).reshape(1, 256),
        "assign": assign,
        "group_size": float(group_size),
        "w2": jnp.zeros((256, Np2), jnp.float32).at[:, :num_classes].set(w2),
        "b2": jnp.zeros((1, Np2), jnp.float32).at[0, :num_classes].set(b2),
    }
    return params


# ----------------------------------------------------------------------------
# Forward pass
# ----------------------------------------------------------------------------
def pcl2d_forward(x_nchw, params, num_groups, num_classes):
    del num_groups  # encoded in params["mlp"]
    x = jnp.transpose(x_nchw, (0, 2, 3, 1)).astype(COMPUTE_DTYPE)  # NCHW->NHWC
    B, H, W, C0 = x.shape

    # first-layer weights are packed with Cin padded to 64; pad image channels
    cin0 = params["encoder"][0]["cin"]
    if C0 < cin0:
        x = jnp.pad(x, ((0, 0), (0, 0), (0, 0), (0, cin0 - C0)))

    # encoder (bf16 feature maps, fused dilated conv kernels)
    for layer in params["encoder"]:
        x = conv2d_tap(x, layer["w"], layer["b"], ksize=layer["ksize"],
                       dilation=layer["dil"], relu=True)

    # ASPP 1x1 branch, fused with the global average pool of the encoder output
    br0, pooled = conv1x1_with_pool(x, params["aspp_1x1"]["w"],
                                    params["aspp_1x1"]["b"], relu=True)
    branches = [br0]
    for brp in params["aspp_atrous"]:
        branches.append(conv2d_tap(x, brp["w"], brp["b"], ksize=brp["ksize"],
                                   dilation=brp["dil"], relu=True))

    # ASPP pooling branch (tiny, f32, plain XLA): 1x1 conv + ReLU, then its
    # slice of the projection weights + the projection bias folded into a
    # per-image additive row (exact equivalent of the bilinear upsample of a
    # 1x1 map followed by the concat projection).
    p = jnp.maximum(pooled @ params["aspp_pool"]["w"]
                    + params["aspp_pool"]["b"], 0.0)                 # (B,256)
    add_row = p @ params["aspp_proj"]["w_pool"] + params["aspp_proj"]["b"]

    # fused projection over branches + ReLU + final global average pool
    # (Dropout is identity in eval; the (B,HW,256) map never touches HBM).
    feat = aspp_combine_pool([b.reshape(B, H * W, 256) for b in branches],
                             params["aspp_proj"]["w_br"],
                             add_row.reshape(B, 1, 256))             # (B,256)

    return mlp_head(feat, params["mlp"], num_classes)                # (B,cls)


# ----------------------------------------------------------------------------
if __name__ == "__main__":
    layers = [1, 1, 1, 1]
    atrous_rates = (2, 4, 6)
    num_classes = 10
    num_groups = 8

    B, C_in, H, W = 2, 3, 16, 16
    key = jax.random.PRNGKey(0)
    pkey, xkey = jax.random.split(key)
    params = build_params(pkey, C_in, layers, atrous_rates, num_classes,
                          num_groups)
    x = jax.random.normal(xkey, (B, C_in, H, W), jnp.float32)

    out = pcl2d_forward(x, params, num_groups, num_classes)
    out = jax.block_until_ready(out)
    assert out.shape == (B, num_classes)
    print("KERNEL_OK")
</pallas_src>

<mosaic_0001>
module attributes {stable_mosaic.version = 11 : i64} {
  func.func @_conv_tap_kernel(%arg0: i32, %arg1: memref<1x16x16x64xbf16, #tpu.memory_space<vmem>>, %arg2: memref<9x64x64xbf16, #tpu.memory_space<vmem>>, %arg3: memref<1x64xf32, #tpu.memory_space<vmem>>, %arg4: memref<1x256x64xbf16, #tpu.memory_space<vmem>>, %arg5: memref<18x18x64xbf16, #tpu.memory_space<vmem>>) attributes {dimension_semantics = [#tpu.dimension_semantics<parallel>], iteration_bounds = array<i64: 2>, scalar_prefetch = 0 : i64, scratch_operands = 1 : i64, tpu.core_type = #tpu.core_type<tc>, window_params = [{transform_indices = @transform_0, window_bounds = array<i64: 1, 16, 16, 64>}, {pipeline_mode = #tpu.pipeline_mode<synchronous>, transform_indices = @transform_1, window_bounds = array<i64: 9, 64, 64>}, {pipeline_mode = #tpu.pipeline_mode<synchronous>, transform_indices = @transform_2, window_bounds = array<i64: 1, 64>}, {transform_indices = @transform_3, window_bounds = array<i64: 1, 256, 64>}]} {
    %cst = arith.constant 0.000000e+00 : bf16
    %0 = vector.broadcast %cst : bf16 to vector<18x18x64xbf16>
    %c0 = arith.constant 0 : index
    %c0_0 = arith.constant 0 : index
    %c0_1 = arith.constant 0 : index
    %1 = vector.load %arg5[%c0, %c0_0, %c0_1] : memref<18x18x64xbf16, #tpu.memory_space<vmem>>, vector<18x18x64xbf16>
    tpu.vector_store %arg5[%c0, %c0_0, %c0_1], %0 {strides = array<i32>} : memref<18x18x64xbf16, #tpu.memory_space<vmem>>, vector<18x18x64xbf16>,
    %c0_2 = arith.constant 0 : index
    %c0_3 = arith.constant 0 : index
    %c0_4 = arith.constant 0 : index
    %c0_5 = arith.constant 0 : index
    %2 = vector.load %arg1[%c0_2, %c0_3, %c0_4, %c0_5] : memref<1x16x16x64xbf16, #tpu.memory_space<vmem>>, vector<1x16x16x64xbf16>
    %3 = vector.shape_cast %2 : vector<1x16x16x64xbf16> to vector<16x16x64xbf16>
    %c1 = arith.constant 1 : index
    %c1_6 = arith.constant 1 : index
    %c0_7 = arith.constant 0 : index
    %4 = vector.load %arg5[%c1, %c1_6, %c0_7] : memref<18x18x64xbf16, #tpu.memory_space<vmem>>, vector<16x16x64xbf16>
    tpu.vector_store %arg5[%c1, %c1_6, %c0_7], %3 {strides = array<i32>} : memref<18x18x64xbf16, #tpu.memory_space<vmem>>, vector<16x16x64xbf16>,
    %c0_8 = arith.constant 0 : index
    %c0_9 = arith.constant 0 : index
    %c0_10 = arith.constant 0 : index
    %5 = vector.load %arg5[%c0_8, %c0_9, %c0_10] : memref<18x18x64xbf16, #tpu.memory_space<vmem>>, vector<16x16x64xbf16>
    %6 = vector.shape_cast %5 : vector<16x16x64xbf16> to vector<256x64xbf16>
    %c0_11 = arith.constant 0 : index
    %c0_12 = arith.constant 0 : index
    %c0_13 = arith.constant 0 : index
    %7 = vector.load %arg2[%c0_11, %c0_12, %c0_13] : memref<9x64x64xbf16, #tpu.memory_space<vmem>>, vector<1x64x64xbf16>
    %8 = vector.shape_cast %7 : vector<1x64x64xbf16> to vector<64x64xbf16>
    %cst_14 = arith.constant dense<0.000000e+00> : vector<256x64xf32>
    %9 = tpu.matmul %6, %8, %cst_14 {dimension_numbers = #tpu.dot_dimension_numbers<[1], [0], [0], [1], [0, 0, 1, 1], [], []>} : vector<256x64xbf16>, vector<64x64xbf16>, vector<256x64xf32> -> vector<256x64xf32>
    %c0_15 = arith.constant 0 : index
    %c1_16 = arith.constant 1 : index
    %c0_17 = arith.constant 0 : index
    %10 = vector.load %arg5[%c0_15, %c1_16, %c0_17] : memref<18x18x64xbf16, #tpu.memory_space<vmem>>, vector<16x16x64xbf16>
    %11 = vector.shape_cast %10 : vector<16x16x64xbf16> to vector<256x64xbf16>
    %c1_18 = arith.constant 1 : index
    %c0_19 = arith.constant 0 : index
    %c0_20 = arith.constant 0 : index
    %12 = vector.load %arg2[%c1_18, %c0_19, %c0_20] : memref<9x64x64xbf16, #tpu.memory_space<vmem>>, vector<1x64x64xbf16>
    %13 = vector.shape_cast %12 : vector<1x64x64xbf16> to vector<64x64xbf16>
    %cst_21 = arith.constant dense<0.000000e+00> : vector<256x64xf32>
    %14 = tpu.matmul %11, %13, %cst_21 {dimension_numbers = #tpu.dot_dimension_numbers<[1], [0], [0], [1], [0, 0, 1, 1], [], []>} : vector<256x64xbf16>, vector<64x64xbf16>, vector<256x64xf32> -> vector<256x64xf32>
    %15 = arith.addf %9, %14 : vector<256x64xf32>
    %c0_22 = arith.constant 0 : index
    %c2 = arith.constant 2 : index
    %c0_23 = arith.constant 0 : index
    %16 = vector.load %arg5[%c0_22, %c2, %c0_23] : memref<18x18x64xbf16, #tpu.memory_space<vmem>>, vector<16x16x64xbf16>
    %17 = vector.shape_cast %16 : vector<16x16x64xbf16> to vector<256x64xbf16>
    %c2_24 = arith.constant 2 : index
    %c0_25 = arith.constant 0 : index
    %c0_26 = arith.constant 0 : index
    %18 = vector.load %arg2[%c2_24, %c0_25, %c0_26] : memref<9x64x64xbf16, #tpu.memory_space<vmem>>, vector<1x64x64xbf16>
    %19 = vector.shape_cast %18 : vector<1x64x64xbf16> to vector<64x64xbf16>
    %cst_27 = arith.constant dense<0.000000e+00> : vector<256x64xf32>
    %20 = tpu.matmul %17, %19, %cst_27 {dimension_numbers = #tpu.dot_dimension_numbers<[1], [0], [0], [1], [0, 0, 1, 1], [], []>} : vector<256x64xbf16>, vector<64x64xbf16>, vector<256x64xf32> -> vector<256x64xf32>
    %21 = arith.addf %15, %20 : vector<256x64xf32>
    %c1_28 = arith.constant 1 : index
    %c0_29 = arith.constant 0 : index
    %c0_30 = arith.constant 0 : index
    %22 = vector.load %arg5[%c1_28, %c0_29, %c0_30] : memref<18x18x64xbf16, #tpu.memory_space<vmem>>, vector<16x16x64xbf16>
    %23 = vector.shape_cast %22 : vector<16x16x64xbf16> to vector<256x64xbf16>
    %c3 = arith.constant 3 : index
    %c0_31 = arith.constant 0 : index
    %c0_32 = arith.constant 0 : index
    %24 = vector.load %arg2[%c3, %c0_31, %c0_32] : memref<9x64x64xbf16, #tpu.memory_space<vmem>>, vector<1x64x64xbf16>
    %25 = vector.shape_cast %24 : vector<1x64x64xbf16> to vector<64x64xbf16>
    %cst_33 = arith.constant dense<0.000000e+00> : vector<256x64xf32>
    %26 = tpu.matmul %23, %25, %cst_33 {dimension_numbers = #tpu.dot_dimension_numbers<[1], [0], [0], [1], [0, 0, 1, 1], [], []>} : vector<256x64xbf16>, vector<64x64xbf16>, vector<256x64xf32> -> vector<256x64xf32>
    %27 = arith.addf %21, %26 : vector<256x64xf32>
    %c1_34 = arith.constant 1 : index
    %c1_35 = arith.constant 1 : index
    %c0_36 = arith.constant 0 : index
    %28 = vector.load %arg5[%c1_34, %c1_35, %c0_36] : memref<18x18x64xbf16, #tpu.memory_space<vmem>>, vector<16x16x64xbf16>
    %29 = vector.shape_cast %28 : vector<16x16x64xbf16> to vector<256x64xbf16>
    %c4 = arith.constant 4 : index
    %c0_37 = arith.constant 0 : index
    %c0_38 = arith.constant 0 : index
    %30 = vector.load %arg2[%c4, %c0_37, %c0_38] : memref<9x64x64xbf16, #tpu.memory_space<vmem>>, vector<1x64x64xbf16>
    %31 = vector.shape_cast %30 : vector<1x64x64xbf16> to vector<64x64xbf16>
    %cst_39 = arith.constant dense<0.000000e+00> : vector<256x64xf32>
    %32 = tpu.matmul %29, %31, %cst_39 {dimension_numbers = #tpu.dot_dimension_numbers<[1], [0], [0], [1], [0, 0, 1, 1], [], []>} : vector<256x64xbf16>, vector<64x64xbf16>, vector<256x64xf32> -> vector<256x64xf32>
    %33 = arith.addf %27, %32 : vector<256x64xf32>
    %c1_40 = arith.constant 1 : index
    %c2_41 = arith.constant 2 : index
    %c0_42 = arith.constant 0 : index
    %34 = vector.load %arg5[%c1_40, %c2_41, %c0_42] : memref<18x18x64xbf16, #tpu.memory_space<vmem>>, vector<16x16x64xbf16>
    %35 = vector.shape_cast %34 : vector<16x16x64xbf16> to vector<256x64xbf16>
    %c5 = arith.constant 5 : index
    %c0_43 = arith.constant 0 : index
    %c0_44 = arith.constant 0 : index
    %36 = vector.load %arg2[%c5, %c0_43, %c0_44] : memref<9x64x64xbf16, #tpu.memory_space<vmem>>, vector<1x64x64xbf16>
    %37 = vector.shape_cast %36 : vector<1x64x64xbf16> to vector<64x64xbf16>
    %cst_45 = arith.constant dense<0.000000e+00> : vector<256x64xf32>
    %38 = tpu.matmul %35, %37, %cst_45 {dimension_numbers = #tpu.dot_dimension_numbers<[1], [0], [0], [1], [0, 0, 1, 1], [], []>} : vector<256x64xbf16>, vector<64x64xbf16>, vector<256x64xf32> -> vector<256x64xf32>
    %39 = arith.addf %33, %38 : vector<256x64xf32>
    %c2_46 = arith.constant 2 : index
    %c0_47 = arith.constant 0 : index
    %c0_48 = arith.constant 0 : index
    %40 = vector.load %arg5[%c2_46, %c0_47, %c0_48] : memref<18x18x64xbf16, #tpu.memory_space<vmem>>, vector<16x16x64xbf16>
    %41 = vector.shape_cast %40 : vector<16x16x64xbf16> to vector<256x64xbf16>
    %c6 = arith.constant 6 : index
    %c0_49 = arith.constant 0 : index
    %c0_50 = arith.constant 0 : index
    %42 = vector.load %arg2[%c6, %c0_49, %c0_50] : memref<9x64x64xbf16, #tpu.memory_space<vmem>>, vector<1x64x64xbf16>
    %43 = vector.shape_cast %42 : vector<1x64x64xbf16> to vector<64x64xbf16>
    %cst_51 = arith.constant dense<0.000000e+00> : vector<256x64xf32>
    %44 = tpu.matmul %41, %43, %cst_51 {dimension_numbers = #tpu.dot_dimension_numbers<[1], [0], [0], [1], [0, 0, 1, 1], [], []>} : vector<256x64xbf16>, vector<64x64xbf16>, vector<256x64xf32> -> vector<256x64xf32>
    %45 = arith.addf %39, %44 : vector<256x64xf32>
    %c2_52 = arith.constant 2 : index
    %c1_53 = arith.constant 1 : index
    %c0_54 = arith.constant 0 : index
    %46 = vector.load %arg5[%c2_52, %c1_53, %c0_54] : memref<18x18x64xbf16, #tpu.memory_space<vmem>>, vector<16x16x64xbf16>
    %47 = vector.shape_cast %46 : vector<16x16x64xbf16> to vector<256x64xbf16>
    %c7 = arith.constant 7 : index
    %c0_55 = arith.constant 0 : index
    %c0_56 = arith.constant 0 : index
    %48 = vector.load %arg2[%c7, %c0_55, %c0_56] : memref<9x64x64xbf16, #tpu.memory_space<vmem>>, vector<1x64x64xbf16>
    %49 = vector.shape_cast %48 : vector<1x64x64xbf16> to vector<64x64xbf16>
    %cst_57 = arith.constant dense<0.000000e+00> : vector<256x64xf32>
    %50 = tpu.matmul %47, %49, %cst_57 {dimension_numbers = #tpu.dot_dimension_numbers<[1], [0], [0], [1], [0, 0, 1, 1], [], []>} : vector<256x64xbf16>, vector<64x64xbf16>, vector<256x64xf32> -> vector<256x64xf32>
    %51 = arith.addf %45, %50 : vector<256x64xf32>
    %c2_58 = arith.constant 2 : index
    %c2_59 = arith.constant 2 : index
    %c0_60 = arith.constant 0 : index
    %52 = vector.load %arg5[%c2_58, %c2_59, %c0_60] : memref<18x18x64xbf16, #tpu.memory_space<vmem>>, vector<16x16x64xbf16>
    %53 = vector.shape_cast %52 : vector<16x16x64xbf16> to vector<256x64xbf16>
    %c8 = arith.constant 8 : index
    %c0_61 = arith.constant 0 : index
    %c0_62 = arith.constant 0 : index
    %54 = vector.load %arg2[%c8, %c0_61, %c0_62] : memref<9x64x64xbf16, #tpu.memory_space<vmem>>, vector<1x64x64xbf16>
    %55 = vector.shape_cast %54 : vector<1x64x64xbf16> to vector<64x64xbf16>
    %cst_63 = arith.constant dense<0.000000e+00> : vector<256x64xf32>
    %56 = tpu.matmul %53, %55, %cst_63 {dimension_numbers = #tpu.dot_dimension_numbers<[1], [0], [0], [1], [0, 0, 1, 1], [], []>} : vector<256x64xbf16>, vector<64x64xbf16>, vector<256x64xf32> -> vector<256x64xf32>
    %57 = arith.addf %51, %56 : vector<256x64xf32>
    %c0_64 = arith.constant 0 : index
    %c0_65 = arith.constant 0 : index
    %58 = vector.load %arg3[%c0_64, %c0_65] : memref<1x64xf32, #tpu.memory_space<vmem>>, vector<1x64xf32>
    %59 = vector.broadcast %58 : vector<1x64xf32> to vector<256x64xf32>
    %60 = arith.addf %57, %59 : vector<256x64xf32>
    %cst_66 = arith.constant 0.000000e+00 : f32
    %61 = vector.broadcast %cst_66 : f32 to vector<256x64xf32>
    %62 = arith.maximumf %60, %61 : vector<256x64xf32>
    %63 = arith.truncf %62 : vector<256x64xf32> to vector<256x64xbf16>
    %c0_67 = arith.constant 0 : index
    %c0_68 = arith.constant 0 : index
    %c0_69 = arith.constant 0 : index
    %64 = vector.load %arg4[%c0_67, %c0_68, %c0_69] : memref<1x256x64xbf16, #tpu.memory_space<vmem>>, vector<1x256x64xbf16>
    %65 = vector.shape_cast %64 : vector<1x256x64xbf16> to vector<256x64xbf16>
    %66 = vector.shape_cast %63 : vector<256x64xbf16> to vector<1x256x64xbf16>
    tpu.vector_store %arg4[%c0_67, %c0_68, %c0_69], %66 {strides = array<i32>} : memref<1x256x64xbf16, #tpu.memory_space<vmem>>, vector<1x256x64xbf16>,
    return
  }
  func.func @transform_0(%arg0: i32) -> (i32, i32, i32, i32) {
    %c0_i32 = arith.constant 0 : i32
    %c0_i32_0 = arith.constant 0 : i32
    %c0_i32_1 = arith.constant 0 : i32
    %c0_i32_2 = arith.constant 0 : i32
    return %arg0, %c0_i32, %c0_i32_0, %c0_i32_1 : i32, i32, i32, i32
  }
  func.func @transform_1(%arg0: i32) -> (i32, i32, i32) {
    %c0_i32 = arith.constant 0 : i32
    %c0_i32_0 = arith.constant 0 : i32
    %c0_i32_1 = arith.constant 0 : i32
    %c0_i32_2 = arith.constant 0 : i32
    return %c0_i32, %c0_i32_0, %c0_i32_1 : i32, i32, i32
  }
  func.func @transform_2(%arg0: i32) -> (i32, i32) {
    %c0_i32 = arith.constant 0 : i32
    %c0_i32_0 = arith.constant 0 : i32
    %c0_i32_1 = arith.constant 0 : i32
    return %c0_i32, %c0_i32_0 : i32, i32
  }
  func.func @transform_3(%arg0: i32) -> (i32, i32, i32) {
    %c0_i32 = arith.constant 0 : i32
    %c0_i32_0 = arith.constant 0 : i32
    %c0_i32_1 = arith.constant 0 : i32
    return %arg0, %c0_i32, %c0_i32_0 : i32, i32, i32
  }
}

</mosaic_0001>

<bundles_post_ra>
// kernel: tpu_custom_call.1
= control target key start
LH: loop header
LB: loop body
LE: loop exit
PB: predicated region body
PF: predicated region fallthrough
CT: control target
= control target key end

     0   :  { %8 = vsyncpa [#allocation4], 0  ;;  %s7532_s0 = inlined_call_operand.hbm [shape: bf16[2,16,16,64], index: 0, kind: input, shape index: {}]   ;;  %s7533_s1 = inlined_call_operand.hbm [shape: bf16[9,64,64], index: 1, kind: input, shape index: {}]   ;;  %s7534_s2 = inlined_call_operand.vmem [shape: f32[1,64], index: 2, kind: input, shape index: {}]   ;;  %s7535_s3 = inlined_call_operand.vmem [shape: bf16[2,256,64], index: 3, kind: output, shape index: {}]  }
   0x1   :  { %10 = vsyncpa [#allocation4 + $0x1], 0 }
   0x2   :  { %11 = vsyncpa [#allocation6], 0  ;;  %s5985_s12 = smov 0   ;;  %s5987_s13 = smov 0  }
   0x3   :  { %s5989_s14 = smov 0   ;;  %s5991_s15 = smov 0  }
   0x4 LB: > { %s6004_s16 = sadd.s32 4294967295, %s5959_s15   ;;  %p37_p0 = scmp.ne.s32.totalorder %s5951_s13, %s5947_s12  ;;  %s5959_s15 = sphi %s5991_s15, %s7564_s15   ;;  %s5955_s14 = sphi %s5989_s14, %s7563_s14   ;;  %s5951_s13 = sphi %s5987_s13, %s7562_s13   ;;  %s5947_s12 = sphi %s5985_s12, %s7561_s12  }
   0x5   : > { %p38_p1 = scmp.eq.s32.totalorder %s6004_s16, 0  ;;  %p5111_p2 = scmp.ge.s32.totalorder %s5959_s15, 1 }
   0x6   : > { %p116_p3 = scmp.lt.s32.totalorder %s5959_s15, 3  ;;  %s127_s20 = sshll.u32 %s7533_s1, 4  ;;  %s128_s20 = int_to_ptr.hbm [resolvable:$true] %s127_s20 }
   0x7   : > { %p6012_p4 = por %p38_p1, %p37_p0  ;;  %s5961_s22 = smov [#allocation5]  }
   0x8   : > { %p6019_p5 = pnand %p5111_p2, %p116_p3  ;;  %s129_s23 = sshll.u32 %s5961_s22, 4  ;;  %s130_s23 = int_to_ptr.vmem [resolvable:$true] %s129_s23 }
   0x9   : > { %s6028_s24 = sadd.s32 1, %s5959_s15   ;;  %s5962_s25 = smov 64  }
   0xa   : > { %p5756_p6 = pneg %p6019_p5  ;;  %s5963_s26 = smov 4  }
   0xb   : > { %s21_s27 = ssub.s32 %s5959_s15, %s6028_s24  ;;  %s24_s28 = sadd.s32 1, %s5955_s14 }
   0xc   : > { %p5757_p7 = pnand %p5756_p6, %p38_p1  ;;  %p22_p8 = scmp.eq.s32.totalorder %s21_s27, 0 }
   0xd   : > { %p31_p9 = scmp.ne.s32.totalorder %s5955_s14, %s5951_s13  ;;  %p32_p10 = scmp.eq.s32.totalorder %s5959_s15, 0 }
   0xe   : > { %5759 = dma.hbm_to_vmem [thread:$0]  (!%p5757_p7), %s128_s20, 4608, %s130_s23, [#allocation6], %s5962_s25, %s5962_s25, %s5963_s26  }
   0xf   : > { %p5765_p11 = scmp.lt.s32.totalorder %s5959_s15, 2  ;;  %p33_p12 = por %p32_p10, %p31_p9 }
  0x10   : > { %s6041_s29 = scalar_select %p22_p8, %s5955_s14, %s24_s28  }
  0x11   : > { %s146_s30 = sand.u32 1, %s5955_s14   ;;  %s5652_s5 = sshll.u32 %s5959_s15, 7 }
  0x12   : > { %s5114_s4 = sshll.u32 %s146_s30, 7  ;;  %s155_s8 = scalar_lea.hbm %s7532_s0, %s5652_s5 }
  0x13   : > { %s150_s9 = scalar_lea.vmem [#allocation3], %s5114_s4  ;;  %s156_s11 = sshll.u32 %s155_s8, 4  ;;  %s157_s11 = int_to_ptr.hbm [resolvable:$true] %s156_s11 }
  0x14   : > { %s158_s10 = sshll.u32 %s150_s9, 4  ;;  %p6048_p13 = pnand %p5765_p11, %p33_p12  ;;  %s159_s10 = int_to_ptr.vmem [resolvable:$true] %s158_s10 }
  0x15   : > { %s147_s18 = scalar_lea.sflag [#allocation4], %s146_s30  ;;  %s5891_s19 = sshra.s32 %s157_s11, 4  ;;  %s5892_s19 = int_to_ptr.hbm [resolvable:$true] %s5891_s19 }
  0x16   : > { %s5893_s20 = scalar_lea.hbm %s5892_s19, 128  ;;  %p5895_p2 = pneg %p6048_p13 }
  0x17   : > { %p5894_p0 = scmp.ne.s32.totalorder %s5892_s19, %s5893_s20  ;;  %s5898_s23 = scalar_lea.hbm %s7532_s0, 256 }
  0x18   : > { %p5899_p7 = scmp.lt.s32.totalorder %s5892_s19, %s7532_s0  ;;  %p5900_p8 = scmp.lt.s32.totalorder %s5898_s23, %s5893_s20 }
  0x19   : > { %p5896_p3 = pnand %p5895_p2, %p5894_p0 }
  0x1a   : > { %p5901_p9 = por %p5900_p8, %p5899_p7 }
  0x1b   : > { %p5897_p6 = pneg %p5896_p3 }
  0x1d   : > { %p5902_p10 = pnand %p5901_p9, %p5897_p6 }
  0x1f   : > { %5905 = shalt.err (!%p5902_p10)
}
  0x20   : > { %5763 = dma.hbm_to_vmem [thread:$0]  (!%p6048_p13), %s157_s11, 2048, %s159_s10, %s147_s18, %s5962_s25, %s5962_s25, %s5963_s26  }
  0x21   : > { %170 = sbr.rel (%p6019_p5) target bundleno = 870 (0x366), region = 32 }
  0x26   : > { %s172_s30 = sand.u32 1, %s5951_s13  }
  0x27   : > { %s5118_s4 = sshll.u32 %s172_s30, 7  ;;  %s173_s5 = scalar_lea.sflag [#allocation4], %s172_s30 }
  0x28   : > { %s6068_s6 = scalar_lea.vmem [#allocation3], %s5118_s4 }
  0x29   : > { %5938 = dma.done.wait (%p6012_p4), %s173_s5, 2048  }
  0x2a   : > { %5940 = vsyncadd (%p6012_p4), %s173_s5, 4294965248 }
  0x2b   : > { %5942 = dma.done.wait (%p38_p1), [#allocation6], 4608  }
  0x2c   : > { %5944 = vsyncadd (%p38_p1), [#allocation6], 4294962688  ;;  %vm211_vm0 = vcmask 519168   ;;  %vm214_vm1 = vcmask 516096   ;;  %v5964_v0 = vmov 0   ;;  %v5677_v1 = vld [vmem:[#allocation5 + $0x38] sm:$0xff] }
  0x2d   : > { %225 = vst.msk [vmem:[#allocation2 + $0x30] sm:$0xf] %vm211_vm0, %v5964_v0  ;;  %vm299_vm2 = vsmask.f32 256  ;;  %vm300_vm3 = vsmask.f32 4368  ;;  %5738 = vmatpush.bf16.msra.mxu1 %v5677_v1  ;;  %5739 = vmatpush.bf16.msra.mxu2 %v5677_v1 }
  0x2e   : > { %226 = vst.msk [vmem:[#allocation2 + $0x34] sm:$0xf] %vm211_vm0, %v5964_v0  ;;  %v273_v2 = vld [vmem:[%s6068_s6 + $0x18] sm:$0xf]  ;;  %v274_v3 = vld [vmem:[%s6068_s6 + $0x1c] sm:$0xf]  ;;  %5740 = vmatpush.bf16.msra.mxu3 %v5677_v1  ;;  %1317 = vmatpush.bf16.msra.mxu0 %v5677_v1  ;;  %vm6095_vm5 = vmor %vm299_vm2, %vm300_vm3 }
  0x2f   : > { %227 = vst.msk [vmem:[#allocation2 + $0x38] sm:$0x1] %vm214_vm1, %v5964_v0  ;;  %vm624_vm4 = vsmask.f32 7938  ;;  %v5676_v4 = vld [vmem:[#allocation5 + $0x30] sm:$0xff]  ;;  %v354_v5 = vshrl.u32 %v273_v2, 16  ;;  %vm6110_vm7 = vmand %vm214_vm1, %vm299_vm2 }
  0x30   : > { %212 = vst.msk [vmem:[#allocation2] sm:$0xf] %vm211_vm0, %v5964_v0  ;;  %v357_v6 = vshll.u32 %v273_v2, 16  ;;  %v362_v7 = vshrl.u32 %v274_v3, 16  ;;  %v365_v8 = vshll.u32 %v274_v3, 16  ;;  %vm6102_vm6 = vmand %vm211_vm0, %vm624_vm4  ;;  %v5675_v16 = vld [vmem:[#allocation5 + $0x28] sm:$0xff] }
  0x31   : > { %213 = vst.msk [vmem:[#allocation2 + $0x4] sm:$0xf] %vm211_vm0, %v5964_v0  ;;  %v356_v10 = vrot.slane %v354_v5, 7  ;;  %5741 = vmatpush.bf16.msra.mxu1 %v5676_v4  ;;  %5742 = vmatpush.bf16.msra.mxu2 %v5676_v4  ;;  %v5674_v24 = vld [vmem:[#allocation5 + $0x20] sm:$0xff]  ;;  %vm796_vm8 = vsmask.f32 3328 }
  0x32   : > { %215 = vst.msk [vmem:[#allocation2 + $0x8] sm:$0x1] %vm214_vm1, %v5964_v0  ;;  %v364_v11 = vrot.slane %v362_v7, 7  ;;  %5743 = vmatpush.bf16.msra.mxu3 %v5676_v4  ;;  %1318 = vmatpush.bf16.msra.mxu0 %v5676_v4  ;;  %vm797_vm9 = vsmask.f32 7440  ;;  %vm1264_vm11 = vcmask 523264  }
  0x33   : > { %216 = vst.msk [vmem:[#allocation2 + $0xc] sm:$0xf] %vm211_vm0, %v5964_v0  ;;  %v359_v17 = vor.u32 %v357_v6, %v356_v10  ;;  %v360_v18 = vrot.slane %v356_v10, 4  ;;  %vm6151_vm10 = vmor %vm796_vm8, %vm797_vm9  ;;  %v6170_v46 = vld [vmem:[%s6068_s6 + $0x38] sm:$0xf]  ;;  %vm1691_vm12 = vcmask 1042432  }
  0x34   : > { %217 = vst.msk [vmem:[#allocation2 + $0x10] sm:$0xf] %vm211_vm0, %v5964_v0  ;;  %v649_v14 = vld [vmem:[#allocation2 + $0x30] sm:$0xf]  ;;  %v367_v19 = vor.u32 %v365_v8, %v364_v11  ;;  %v369_v20 = vrot.slane %v364_v11, 4  ;;  %v422_v49 = vshrl.u32 %v6170_v46, 16 }
  0x35   : > { %218 = vst.msk [vmem:[#allocation2 + $0x14] sm:$0x1] %vm214_vm1, %v5964_v0  ;;  %v650_v22 = vsel %vm6102_vm6, %v359_v17, %v649_v14  ;;  %5744 = vmatpush.bf16.msra.mxu1 %v5675_v16  ;;  %5745 = vmatpush.bf16.msra.mxu2 %v5675_v16  ;;  %v6187_v50 = vld [vmem:[%s6068_s6 + $0x3c] sm:$0xf]  ;;  %v6194_v52 = vld [vmem:[%s6068_s6 + $0x58] sm:$0xf] }
  0x36   : > { %v653_v15 = vld [vmem:[#allocation2 + $0x38] sm:$0x1]  ;;  %219 = vst.msk [vmem:[#allocation2 + $0x18] sm:$0xf] %vm211_vm0, %v5964_v0  ;;  %v368_v21 = vsel %vm6095_vm5, %v360_v18, %v367_v19  ;;  %5746 = vmatpush.bf16.msra.mxu3 %v5675_v16  ;;  %1319 = vmatpush.bf16.msra.mxu0 %v5675_v16  ;;  %v6191_v51 = vrot.slane %v422_v49, 7  ;;  %v430_v60 = vshrl.u32 %v6187_v50, 16 }
  0x37   : > { %220 = vst.msk [vmem:[#allocation2 + $0x1c] sm:$0xf] %vm211_vm0, %v5964_v0  ;;  %v654_v23 = vsel %vm6110_vm7, %v369_v20, %v653_v15  ;;  %v6199_v53 = vld [vmem:[%s6068_s6 + $0x5c] sm:$0xf]  ;;  %v740_v54 = vld [vmem:[#allocation2] sm:$0xf] }
  0x38   : > { %221 = vst.msk [vmem:[#allocation2 + $0x20] sm:$0x1] %vm214_vm1, %v5964_v0  ;;  %v741_v55 = vld [vmem:[#allocation2 + $0x4] sm:$0xf]  ;;  %v800_v56 = vshrl.u32 %v740_v54, 16  ;;  %v803_v57 = vshll.u32 %v740_v54, 16 }
  0x39   : > { %222 = vst.msk [vmem:[#allocation2 + $0x24] sm:$0xf] %vm211_vm0, %v5964_v0  ;;  %5747 = vmatpush.bf16.msra.mxu1 %v5674_v24  ;;  %5748 = vmatpush.bf16.msra.mxu2 %v5674_v24  ;;  %v809_v58 = vshll.u32 %v741_v55, 16  ;;  %v813_v59 = vshrl.u32 %v741_v55, 16  ;;  %v490_v61 = vshrl.u32 %v6194_v52, 16  ;;  %v498_v6 = vshrl.u32 %v6199_v53, 16 }
  0x3a   : > { %651 = vst [vmem:[#allocation2 + $0x30] sm:$0xf] %v650_v22  ;;  %5749 = vmatpush.bf16.msra.mxu3 %v5674_v24  ;;  %1320 = vmatpush.bf16.msra.mxu0 %v5674_v24  ;;  %v6208_v62 = vld [vmem:[%s6068_s6 + $0x20] sm:$0xf]  ;;  %v802_v63 = vrot.slane %v800_v56, 4  ;;  %v805_v1 = vrot.slane %v803_v57, 5 }
  0x3b   : > { %652 = vst.msk [vmem:[#allocation2 + $0x34] sm:$0xf] %vm211_vm0, %v368_v21  ;;  %v811_v2 = vrot.slane %v809_v58, 5  ;;  %v815_v3 = vrot.slane %v813_v59, 4  ;;  %v780_v4 = vld [vmem:[#allocation2 + $0x8] sm:$0x1] }
  0x3c   : > { %655 = vst [vmem:[#allocation2 + $0x38] sm:$0x1] %v654_v23  ;;  %v6215_v5 = vld [vmem:[%s6068_s6 + $0x24] sm:$0xf]  ;;  %v806_v7 = vor.u32 %v805_v1, %v802_v63  ;;  %v819_v10 = vshll.u32 %v780_v4, 16  ;;  %v425_v11 = vshll.u32 %v6170_v46, 16 }
  0x3d   : > { %223 = vst.msk [vmem:[#allocation2 + $0x28] sm:$0xf] %vm211_vm0, %v5964_v0  ;;  %v816_v8 = vor.u32 %v815_v3, %v811_v2  ;;  %v6223_v14 = vrot.slane %v430_v60, 7  ;;  %v6225_v15 = vrot.slane %v490_v61, 7  ;;  %v371_v16 = vshrl.u32 %v6208_v62, 16  ;;  %p205_p1 = scmp.lt.s32.totalorder %s6004_s16, 1 }
  0x3e   : > { %224 = vst.msk [vmem:[#allocation2 + $0x2c] sm:$0x1] %vm214_vm1, %v5964_v0  ;;  %v807_v17 = vrot.slane %v806_v7, 4  ;;  %v821_v19 = vrot.slane %v819_v10, 5  ;;  %v379_v20 = vshrl.u32 %v6215_v5, 16  ;;  %v428_v21 = vrot.slane %v6191_v51, 4 }
  0x3f   : > { %228 = vst.msk [vmem:[#allocation2 + $0x3c] sm:$0xf] %vm211_vm0, %v5964_v0  ;;  %v817_v18 = vrot.slane %v816_v8, 4  ;;  %v433_v22 = vshll.u32 %v6187_v50, 16  ;;  %v437_v23 = vrot.slane %v6223_v14, 4  ;;  %v493_v24 = vshll.u32 %v6194_v52, 16 }
  0x40   : > { %229 = vst.msk [vmem:[#allocation2 + $0x40] sm:$0xf] %vm211_vm0, %v5964_v0  ;;  %v374_v49 = vshll.u32 %v6208_v62, 16  ;;  %v292_v57 = vld [vmem:[%s6068_s6 + $0x64] sm:$0xf]  ;;  %vm1692_vm13 = vcmask 1046532  }
  0x41   : > { %v748_v25 = vld [vmem:[#allocation2 + $0x30] sm:$0xf]  ;;  %230 = vst.msk [vmem:[#allocation2 + $0x44] sm:$0x1] %vm214_vm1, %v5964_v0  ;;  %v495_v54 = vor.u32 %v493_v24, %v6225_v15  ;;  %v515_v62 = vshrl.u32 %v292_v57, 16  ;;  %v518_v10 = vshll.u32 %v292_v57, 16  ;;  %vm6556_vm14 = vmor %vm1691_vm12, %vm1692_vm13 }
  0x42   : > { %v749_v26 = vld [vmem:[#allocation2 + $0x34] sm:$0xf]  ;;  %v896_v27 = vshrl.u32 %v748_v25, 16  ;;  %v899_v28 = vshll.u32 %v748_v25, 16  ;;  %231 = vst.msk [vmem:[#allocation2 + $0x48] sm:$0xf] %vm211_vm0, %v5964_v0 }
  0x43   : > { %v784_v29 = vld [vmem:[#allocation2 + $0x38] sm:$0x1]  ;;  %v905_v30 = vshll.u32 %v749_v26, 16  ;;  %v909_v31 = vshrl.u32 %v749_v26, 16  ;;  %232 = vst.msk [vmem:[#allocation2 + $0x4c] sm:$0xf] %vm211_vm0, %v5964_v0 }
  0x44   : > { %v898_v32 = vrot.slane %v896_v27, 4  ;;  %v901_v33 = vrot.slane %v899_v28, 5  ;;  %v915_v34 = vshll.u32 %v784_v29, 16  ;;  %233 = vst.msk [vmem:[#allocation2 + $0x50] sm:$0x1] %vm214_vm1, %v5964_v0  ;;  %v6239_v25 = vrot.slane %v498_v6, 7 }
  0x45   : > { %v907_v35 = vrot.slane %v905_v30, 5  ;;  %v911_v36 = vrot.slane %v909_v31, 4  ;;  %234 = vst.msk [vmem:[#allocation2 + $0x54] sm:$0xf] %vm211_vm0, %v5964_v0  ;;  %v501_v26 = vshll.u32 %v6199_v53, 16  ;;  %v812_v27 = vsel %vm6151_vm10, %v807_v17, %v811_v2  ;;  %s7566_s16 = smov (!%p205_p1, %s6004_s16), 1 }
  0x46   : > { %v902_v37 = vor.u32 %v901_v33, %v898_v32  ;;  %235 = vst.msk [vmem:[#allocation2 + $0x58] sm:$0xf] %vm211_vm0, %v5964_v0  ;;  %v917_v40 = vrot.slane %v915_v34, 5  ;;  %v822_v28 = vsel %vm6151_vm10, %v817_v18, %v821_v19  ;;  %v6247_v29 = vld [vmem:[%s6068_s6 + $0x40] sm:$0xf]  ;;  %v496_v30 = vrot.slane %v6225_v15, 4 }
  0x47   : > { %v912_v39 = vor.u32 %v911_v36, %v907_v35  ;;  %236 = vst.msk [vmem:[#allocation2 + $0x5c] sm:$0x1] %vm214_vm1, %v5964_v0  ;;  %v1192_v31 = vunpack.c.l.b16 %v812_v27  ;;  %v1193_v32 = vunpack.c.l.b16 %v822_v28  ;;  %v382_v33 = vshll.u32 %v6215_v5, 16  ;;  %v291_v53 = vld [vmem:[%s6068_s6 + $0x60] sm:$0xf]  ;;  %s5653_s25 = sshll.u32 %s7566_s16, 7 }
  0x48   : > { %v903_v41 = vrot.slane %v902_v37, 4  ;;  %237 = vst.msk [vmem:[#allocation2 + $0x60] sm:$0xf] %vm211_vm0, %v5964_v0  ;;  %v6255_v36 = vrot.slane %v379_v20, 7  ;;  %v6258_v37 = vld [vmem:[%s6068_s6 + $0x44] sm:$0xf]  ;;  %s7228_s8 = scalar_lea.vmem %s7535_s3, %s5653_s25 }
  0x49   : > { %v913_v42 = vrot.slane %v912_v39, 4  ;;  %238 = vst.msk [vmem:[#allocation2 + $0x64] sm:$0xf] %vm211_vm0, %v5964_v0  ;;  %v427_v39 = vor.u32 %v425_v11, %v6191_v51  ;;  %v505_v50 = vrot.slane %v6239_v25, 4  ;;  %v447_v52 = vshrl.u32 %v6258_v37, 16 }
  0x4a   : > { %v908_v43 = vsel %vm6151_vm10, %v903_v41, %v907_v35  ;;  %239 = vst.msk [vmem:[#allocation2 + $0x68] sm:$0x1] %vm214_vm1, %v5964_v0  ;;  %v373_v35 = vrot.slane %v371_v16, 7  ;;  %v1224_v41 = vpack.c.b16 %v1193_v32, %v1192_v31  ;;  %v384_v56 = vor.u32 %v382_v33, %v6255_v36  ;;  %v656_v5 = vld [vmem:[#allocation2 + $0x3c] sm:$0xf] }
  0x4b   : > { %v918_v44 = vsel %vm6151_vm10, %v913_v42, %v917_v40  ;;  %v1200_v45 = vunpack.c.l.b16 %v908_v43  ;;  %240 = vst.msk [vmem:[#allocation2 + $0x6c] sm:$0xf] %vm211_vm0, %v5964_v0  ;;  %v5681_v40 = vld [vmem:[#allocation5 + $0x58] sm:$0xff]  ;;  %v507_v58 = vshrl.u32 %v291_v53, 16  ;;  %v442_v61 = vshll.u32 %v6247_v29, 16 }
  0x4c   : > { %v1201_v47 = vunpack.c.l.b16 %v918_v44  ;;  %241 = vst.msk [vmem:[#allocation2 + $0x70] sm:$0xf] %vm211_vm0, %v5964_v0  ;;  %v5701_v42 = vld [vmem:[#allocation5 + $0x78] sm:$0xff]  ;;  %v439_v44 = vshrl.u32 %v6247_v29, 16  ;;  %1939 = vmatpush.bf16.msrb.mxu2 %v5681_v40  ;;  %5138 = vmatmul.msk.bf16.vlgmr.msra.gmra.mxu0 %vm1264_vm11, %v1224_v41  ;;  %v377_v55 = vrot.slane %v373_v35, 4  ;;  %v376_v4 = vor.u32 %v374_v49, %v373_v35 }
  0x4d   : > { %242 = vst.msk [vmem:[#allocation2 + $0x74] sm:$0x1] %vm214_vm1, %v5964_v0  ;;  %v5673_v43 = vld [vmem:[#allocation5 + $0x18] sm:$0xff]  ;;  %2253 = vmatpush.bf16.msrb.mxu3 %v5701_v42  ;;  %v449_v6 = vrot.slane %v447_v52, 7  ;;  %v450_v7 = vshll.u32 %v6258_v37, 16  ;;  %v510_v8 = vshll.u32 %v291_v53, 16 }
  0x4e   : > { %v1228_v48 = vpack.c.b16 %v1201_v47, %v1200_v45  ;;  %243 = vst.msk [vmem:[#allocation2 + $0x78] sm:$0xf] %vm211_vm0, %v5964_v0  ;;  %v435_v45 = vor.u32 %v433_v22, %v6223_v14  ;;  %v503_v47 = vor.u32 %v501_v26, %v6239_v25  ;;  %1558 = vmatpush.bf16.msrb.mxu1 %v5673_v43  ;;  %v441_v60 = vrot.slane %v439_v44, 7  ;;  %v660_v15 = vld [vmem:[#allocation2 + $0x44] sm:$0x1] }
  0x4f   : > { %244 = vst.msk [vmem:[#allocation2 + $0x7c] sm:$0xf] %vm211_vm0, %v5964_v0  ;;  %v677_v34 = vld [vmem:[#allocation2 + $0x60] sm:$0xf]  ;;  %v385_v14 = vsel %vm6095_vm5, %v377_v55, %v384_v56  ;;  %v509_v16 = vrot.slane %v507_v58, 7  ;;  %v517_v17 = vrot.slane %v515_v62, 7  ;;  %v657_v29 = vsel %vm6102_vm6, %v376_v4, %v656_v5 }
  0x50   : > { %5142 = vmatmul.msk.bf16.vlgmr.msra.gmra.mxu1 %vm1264_vm11, %v1228_v48  ;;  %245 = vst.msk [vmem:[#allocation2 + $0x80] sm:$0x1] %vm214_vm1, %v5964_v0  ;;  %v5705_v48 = vld [vmem:[#allocation5 + $0x98] sm:$0xff]  ;;  %v678_v59 = vsel %vm6102_vm6, %v427_v39, %v677_v34  ;;  %v436_v63 = vsel %vm6095_vm5, %v428_v21, %v435_v45  ;;  %v504_v2 = vsel %vm6095_vm5, %v496_v30, %v503_v47  ;;  %v267_v18 = vld [vmem:[%s6068_s6] sm:$0xf]  ;;  %v386_v19 = vrot.slane %v6255_v36, 4 }
  0x51   : > { %246 = vst.msk [vmem:[#allocation2 + $0x84] sm:$0xf] %vm211_vm0, %v5964_v0  ;;  %v681_v46 = vld [vmem:[#allocation2 + $0x68] sm:$0x1]  ;;  %2935 = vmatpush.bf16.msrb.mxu0 %v5705_v48  ;;  %v444_v20 = vor.u32 %v442_v61, %v441_v60  ;;  %v268_v22 = vld [vmem:[%s6068_s6 + $0x4] sm:$0xf]  ;;  %v452_v30 = vor.u32 %v450_v7, %v449_v6  ;;  %v6311_v34 = vor.u32 %v510_v8, %v509_v16 }
  0x52   : > { %247 = vst.msk [vmem:[#allocation2 + $0x88] sm:$0xf] %vm211_vm0, %v5964_v0  ;;  %v682_v1 = vsel %vm6110_vm7, %v437_v23, %v681_v46  ;;  %v684_v21 = vld [vmem:[#allocation2 + $0x6c] sm:$0xf]  ;;  %v303_v23 = vshrl.u32 %v267_v18, 16  ;;  %v445_v24 = vrot.slane %v441_v60, 4  ;;  %v520_v36 = vor.u32 %v518_v10, %v517_v17 }
  0x53   : > { %248 = vst.msk [vmem:[#allocation2 + $0x8c] sm:$0x1] %vm214_vm1, %v5964_v0  ;;  %v306_v26 = vshll.u32 %v267_v18, 16  ;;  %v311_v27 = vshrl.u32 %v268_v22, 16  ;;  %v314_v28 = vshll.u32 %v268_v22, 16  ;;  %v454_v31 = vrot.slane %v449_v6, 4 }
  0x54   : > { %249 = vst.msk [vmem:[#allocation2 + $0x90] sm:$0xf] %vm211_vm0, %v5964_v0  ;;  %v688_v25 = vld [vmem:[#allocation2 + $0x74] sm:$0x1]  ;;  %v305_v33 = vrot.slane %v303_v23, 7  ;;  %v513_v35 = vrot.slane %v509_v16, 4  ;;  %v661_v40 = vsel %vm6110_vm7, %v386_v19, %v660_v15  ;;  %v685_v44 = vsel %vm6102_vm6, %v444_v20, %v684_v21 }
  0x55   : > { %250 = vst.msk [vmem:[#allocation2 + $0x94] sm:$0xf] %vm211_vm0, %v5964_v0  ;;  %v313_v39 = vrot.slane %v311_v27, 7  ;;  %v522_v41 = vrot.slane %v517_v17, 4  ;;  %v6318_v43 = vld [vmem:[%s6068_s6 + $0x28] sm:$0xf]  ;;  %v453_v49 = vsel %vm6095_vm5, %v445_v24, %v452_v30 }
  0x56   : > { %251 = vst.msk [vmem:[#allocation2 + $0x98] sm:$0x1] %vm214_vm1, %v5964_v0  ;;  %v6315_v42 = vor.u32 %v306_v26, %v305_v33  ;;  %v309_v45 = vrot.slane %v305_v33, 4  ;;  %v6322_v47 = vld [vmem:[#allocation2 + $0xc] sm:$0xf]  ;;  %v388_v52 = vshrl.u32 %v6318_v43, 16  ;;  %v6332_v56 = vsel %vm6095_vm5, %v513_v35, %v520_v36 }
  0x57   : > { %252 = vst.msk [vmem:[#allocation2 + $0x9c] sm:$0xf] %vm211_vm0, %v5964_v0  ;;  %v316_v46 = vor.u32 %v314_v28, %v313_v39 }
  0x58   : > { %253 = vst.msk [vmem:[#allocation2 + $0xa0] sm:$0xf] %vm211_vm0, %v5964_v0  ;;  %v627_v62 = vsel %vm6102_vm6, %v6315_v42, %v6322_v47  ;;  %v6379_v42 = vrot.slane %v388_v52, 7 }
  0x59   : > { %254 = vst.msk [vmem:[#allocation2 + $0xa4] sm:$0x1] %vm214_vm1, %v5964_v0  ;;  %v6348_v5 = vsel %vm6095_vm5, %v309_v45, %v316_v46 }
  0x5a   : > { %255 = vst.msk [vmem:[#allocation2 + $0xa8] sm:$0xf] %vm211_vm0, %v5964_v0 }
  0x5b   : > { %256 = vst.msk [vmem:[#allocation2 + $0xac] sm:$0xf] %vm211_vm0, %v5964_v0  ;;  %v705_v51 = vld [vmem:[#allocation2 + $0x90] sm:$0xf] }
  0x5c   : > { %257 = vst.msk [vmem:[#allocation2 + $0xb0] sm:$0x1] %vm214_vm1, %v5964_v0  ;;  %v706_v11 = vsel %vm6102_vm6, %v495_v54, %v705_v51  ;;  %v318_v51 = vrot.slane %v313_v39, 4 }
  0x5d   : > { %258 = vst.msk [vmem:[#allocation2 + $0xb4] sm:$0xf] %vm211_vm0, %v5964_v0  ;;  %v709_v3 = vld [vmem:[#allocation2 + $0x98] sm:$0x1] }
  0x5e   : > { %259 = vst.msk [vmem:[#allocation2 + $0xb8] sm:$0xf] %vm211_vm0, %v5964_v0  ;;  %v6308_v32 = vld [vmem:[#allocation2 + $0x9c] sm:$0xf] }
  0x5f   : > { %260 = vst.msk [vmem:[#allocation2 + $0xbc] sm:$0x1] %vm214_vm1, %v5964_v0  ;;  %v713_v57 = vsel %vm6102_vm6, %v6311_v34, %v6308_v32  ;;  %v5700_v34 = vld [vmem:[#allocation5 + $0x70] sm:$0xff] }
  0x60   : > { %261 = vst.msk [vmem:[#allocation2 + $0xc0] sm:$0xf] %vm211_vm0, %v5964_v0  ;;  %v716_v37 = vld [vmem:[#allocation2 + $0xa4] sm:$0x1]  ;;  %2254 = vmatpush.bf16.msrb.mxu3 %v5700_v34 }
  0x61   : > { %262 = vst.msk [vmem:[#allocation2 + $0xc4] sm:$0xf] %vm211_vm0, %v5964_v0  ;;  %v6340_v61 = vsel %vm6110_vm7, %v522_v41, %v716_v37  ;;  %v6356_v41 = vld [vmem:[%s6068_s6 + $0x2c] sm:$0xf] }
  0x62   : > { %263 = vst.msk [vmem:[#allocation2 + $0xc8] sm:$0x1] %vm214_vm1, %v5964_v0 }
  0x63   : > { %264 = vst.msk [vmem:[#allocation2 + $0xcc] sm:$0xf] %vm211_vm0, %v5964_v0 }
  0x64   : > { %265 = vst.msk [vmem:[#allocation2 + $0xd0] sm:$0xf] %vm211_vm0, %v5964_v0 }
  0x65   : > { %266 = vst.msk [vmem:[#allocation2 + $0xd4] sm:$0x1] %vm214_vm1, %v5964_v0  ;;  %v710_v0 = vsel %vm6110_vm7, %v505_v50, %v709_v3  ;;  %v689_v50 = vsel %vm6110_vm7, %v454_v31, %v688_v25 }
  0x66   : > { %679 = vst [vmem:[#allocation2 + $0x60] sm:$0xf] %v678_v59 }
  0x67   : > { %680 = vst.msk [vmem:[#allocation2 + $0x64] sm:$0xf] %vm211_vm0, %v436_v63  ;;  %v632_v63 = vld [vmem:[#allocation2 + $0x14] sm:$0x1] }
  0x68   : > { %683 = vst [vmem:[#allocation2 + $0x68] sm:$0x1] %v682_v1  ;;  %v633_v28 = vsel %vm6110_vm7, %v318_v51, %v632_v63  ;;  %v5672_v51 = vld [vmem:[#allocation5 + $0x10] sm:$0xff] }
  0x69   : > { %707 = vst [vmem:[#allocation2 + $0x90] sm:$0xf] %v706_v11  ;;  %1559 = vmatpush.bf16.msrb.mxu1 %v5672_v51 }
  0x6a   : > { %708 = vst.msk [vmem:[#allocation2 + $0x94] sm:$0xf] %vm211_vm0, %v504_v2 }
  0x6b   : > { %711 = vst [vmem:[#allocation2 + $0x98] sm:$0x1] %v710_v0  ;;  %v5680_v0 = vld [vmem:[#allocation5 + $0x50] sm:$0xff] }
  0x6c   : > { %658 = vst [vmem:[#allocation2 + $0x3c] sm:$0xf] %v657_v29  ;;  %1940 = vmatpush.bf16.msrb.mxu2 %v5680_v0 }
  0x6d   : > { %v756_v48 = vld [vmem:[#allocation2 + $0x60] sm:$0xf]  ;;  %659 = vst.msk [vmem:[#allocation2 + $0x40] sm:$0xf] %vm211_vm0, %v385_v14 }
  0x6e   : > { %v757_v53 = vld [vmem:[#allocation2 + $0x64] sm:$0xf]  ;;  %v992_v54 = vshrl.u32 %v756_v48, 16  ;;  %v995_v55 = vshll.u32 %v756_v48, 16  ;;  %662 = vst [vmem:[#allocation2 + $0x44] sm:$0x1] %v661_v40 }
  0x6f   : > { %v788_v58 = vld [vmem:[#allocation2 + $0x68] sm:$0x1]  ;;  %v1001_v59 = vshll.u32 %v757_v53, 16  ;;  %v1005_v60 = vshrl.u32 %v757_v53, 16  ;;  %686 = vst [vmem:[#allocation2 + $0x6c] sm:$0xf] %v685_v44 }
  0x70   : > { %v994_v1 = vrot.slane %v992_v54, 4  ;;  %v997_v2 = vrot.slane %v995_v55, 5  ;;  %v1011_v3 = vshll.u32 %v788_v58, 16  ;;  %v764_v4 = vld [vmem:[#allocation2 + $0x90] sm:$0xf]  ;;  %v5704_v53 = vld [vmem:[#allocation5 + $0x90] sm:$0xff] }
  0x71   : > { %v1003_v6 = vrot.slane %v1001_v59, 5  ;;  %v1007_v7 = vrot.slane %v1005_v60, 4  ;;  %v765_v8 = vld [vmem:[#allocation2 + $0x94] sm:$0xf]  ;;  %v1088_v10 = vshrl.u32 %v764_v4, 16  ;;  %v1091_v11 = vshll.u32 %v764_v4, 16  ;;  %2936 = vmatpush.bf16.msrb.mxu0 %v5704_v53 }
  0x72   : > { %v998_v14 = vor.u32 %v997_v2, %v994_v1  ;;  %v1013_v15 = vrot.slane %v1011_v3, 5  ;;  %v792_v16 = vld [vmem:[#allocation2 + $0x98] sm:$0x1]  ;;  %v1097_v17 = vshll.u32 %v765_v8, 16  ;;  %v1101_v18 = vshrl.u32 %v765_v8, 16 }
  0x73   : > { %v1008_v19 = vor.u32 %v1007_v7, %v1003_v6  ;;  %v1090_v20 = vrot.slane %v1088_v10, 4  ;;  %v1093_v21 = vrot.slane %v1091_v11, 5  ;;  %v1107_v22 = vshll.u32 %v792_v16, 16  ;;  %v750_v23 = vld [vmem:[#allocation2 + $0x3c] sm:$0xf] }
  0x74   : > { %v999_v24 = vrot.slane %v998_v14, 4  ;;  %v1099_v25 = vrot.slane %v1097_v17, 5  ;;  %v1103_v26 = vrot.slane %v1101_v18, 4  ;;  %v751_v27 = vld [vmem:[#allocation2 + $0x40] sm:$0xf]  ;;  %v920_v33 = vshrl.u32 %v750_v23, 16 }
  0x75   : > { %v1009_v29 = vrot.slane %v1008_v19, 4  ;;  %v1094_v30 = vor.u32 %v1093_v21, %v1090_v20  ;;  %v1109_v31 = vrot.slane %v1107_v22, 5  ;;  %v785_v32 = vld [vmem:[#allocation2 + $0x44] sm:$0x1]  ;;  %v923_v37 = vshll.u32 %v750_v23, 16 }
  0x76   : > { %v1004_v35 = vsel %vm6151_vm10, %v999_v24, %v1003_v6  ;;  %v1104_v36 = vor.u32 %v1103_v26, %v1099_v25  ;;  %v929_v39 = vshll.u32 %v751_v27, 16  ;;  %687 = vst.msk [vmem:[#allocation2 + $0x70] sm:$0xf] %vm211_vm0, %v453_v49  ;;  %v758_v40 = vld [vmem:[#allocation2 + $0x6c] sm:$0xf]  ;;  %v922_v48 = vrot.slane %v920_v33, 4 }
  0x77   : > { %v1014_v44 = vsel %vm6151_vm10, %v1009_v29, %v1013_v15  ;;  %v1208_v45 = vunpack.c.l.b16 %v1004_v35  ;;  %v1095_v46 = vrot.slane %v1094_v30, 4  ;;  %690 = vst [vmem:[#allocation2 + $0x74] sm:$0x1] %v689_v50  ;;  %v925_v58 = vrot.slane %v923_v37, 5 }
  0x78   : > { %v1209_v54 = vunpack.c.l.b16 %v1014_v44  ;;  %v1105_v55 = vrot.slane %v1104_v36, 4  ;;  %v931_v59 = vrot.slane %v929_v39, 5  ;;  %714 = vst [vmem:[#allocation2 + $0x9c] sm:$0xf] %v713_v57  ;;  %v933_v60 = vshrl.u32 %v751_v27, 16 }
  0x79   : > { %v1100_v49 = vsel %vm6151_vm10, %v1095_v46, %v1099_v25  ;;  %v939_v63 = vshll.u32 %v785_v32, 16  ;;  %v1016_v1 = vshrl.u32 %v758_v40, 16  ;;  %715 = vst.msk [vmem:[#allocation2 + $0xa0] sm:$0xf] %vm211_vm0, %v6332_v56  ;;  %v926_v4 = vor.u32 %v925_v58, %v922_v48 }
  0x7a   : > { %v1232_v50 = vpack.c.b16 %v1209_v54, %v1208_v45  ;;  %v1110_v2 = vsel %vm6151_vm10, %v1105_v55, %v1109_v31  ;;  %v1216_v3 = vunpack.c.l.b16 %v1100_v49  ;;  %718 = vst [vmem:[#allocation2 + $0xa4] sm:$0x1] %v6340_v61  ;;  %v935_v6 = vrot.slane %v933_v60, 4 }
  0x7b   : > { %v1217_v57 = vunpack.c.l.b16 %v1110_v2  ;;  %628 = vst [vmem:[#allocation2 + $0xc] sm:$0xf] %v627_v62  ;;  %v396_v56 = vshrl.u32 %v6356_v41, 16  ;;  %v927_v7 = vrot.slane %v926_v4, 4  ;;  %v1018_v8 = vrot.slane %v1016_v1, 4 }
  0x7c   : > { %5146 = vmatmul.msk.bf16.vlgmr.msra.gmra.mxu2 %vm1264_vm11, %v1232_v50  ;;  %v1019_v10 = vshll.u32 %v758_v40, 16  ;;  %629 = vst.msk [vmem:[#allocation2 + $0x10] sm:$0xf] %vm211_vm0, %v6348_v5  ;;  %v391_v61 = vshll.u32 %v6318_v43, 16  ;;  %v936_v14 = vor.u32 %v935_v6, %v931_v59  ;;  %v941_v15 = vrot.slane %v939_v63, 5 }
  0x7d   : > { %v1236_v11 = vpack.c.b16 %v1217_v57, %v1216_v3  ;;  %v759_v16 = vld [vmem:[#allocation2 + $0x70] sm:$0xf]  ;;  %634 = vst [vmem:[#allocation2 + $0x14] sm:$0x1] %v633_v28  ;;  %v932_v47 = vsel %vm6151_vm10, %v927_v7, %v931_v59  ;;  %v6384_v22 = vrot.slane %v396_v56, 7  ;;  %v399_v53 = vshll.u32 %v6356_v41, 16 }
  0x7e   : > { %v789_v62 = vld [vmem:[#allocation2 + $0x74] sm:$0x1]  ;;  %v1021_v17 = vrot.slane %v1019_v10, 5  ;;  %v1025_v18 = vshll.u32 %v759_v16, 16  ;;  %v1029_v0 = vshrl.u32 %v759_v16, 16  ;;  %v937_v5 = vrot.slane %v936_v14, 4 }
  0x7f   : > { %5150 = vmatmul.msk.bf16.vlgmr.msra.gmra.mxu3 %vm1264_vm11, %v1236_v11  ;;  %v1202_v19 = vunpack.c.l.b16 %v932_v47  ;;  %v1035_v20 = vshll.u32 %v789_v62, 16  ;;  %v766_v21 = vld [vmem:[#allocation2 + $0x9c] sm:$0xf] }
  0x80   : > { %v1022_v23 = vor.u32 %v1021_v17, %v1018_v8  ;;  %v1027_v24 = vrot.slane %v1025_v18, 5  ;;  %v1031_v25 = vrot.slane %v1029_v0, 4  ;;  %v767_v52 = vld [vmem:[#allocation2 + $0xa0] sm:$0xf]  ;;  %v1112_v26 = vshrl.u32 %v766_v21, 16 }
  0x81   : > { %v942_v27 = vsel %vm6151_vm10, %v937_v5, %v941_v15  ;;  %v1037_v28 = vrot.slane %v1035_v20, 5  ;;  %v793_v29 = vld [vmem:[#allocation2 + $0xa4] sm:$0x1]  ;;  %v1115_v30 = vshll.u32 %v766_v21, 16  ;;  %v1121_v31 = vshll.u32 %v767_v52, 16 }
  0x82   : > { %v1203_v32 = vunpack.c.l.b16 %v942_v27  ;;  %v1023_v33 = vrot.slane %v1022_v23, 4  ;;  %v1032_v34 = vor.u32 %v1031_v25, %v1027_v24  ;;  %v1114_v35 = vrot.slane %v1112_v26, 4  ;;  %v742_v36 = vld [vmem:[#allocation2 + $0xc] sm:$0xf]  ;;  %v663_v15 = vld [vmem:[#allocation2 + $0x48] sm:$0xf] }
  0x83   : > { %v1117_v37 = vrot.slane %v1115_v30, 5  ;;  %v1123_v39 = vrot.slane %v1121_v31, 5  ;;  %v1125_v40 = vshrl.u32 %v767_v52, 16  ;;  %v1131_v44 = vshll.u32 %v793_v29, 16  ;;  %v6388_v45 = vld [vmem:[#allocation2 + $0x10] sm:$0xf] }
  0x84   : > { %v1229_v46 = vpack.c.b16 %v1203_v32, %v1202_v19  ;;  %v1028_v48 = vsel %vm6151_vm10, %v1023_v33, %v1027_v24  ;;  %v1033_v51 = vrot.slane %v1032_v34, 4  ;;  %v6393_v49 = vld [vmem:[#allocation2 + $0x14] sm:$0x1]  ;;  %v824_v63 = vshrl.u32 %v742_v36, 16  ;;  %v285_v18 = vld [vmem:[%s6068_s6 + $0x48] sm:$0xf] }
  0x85   : > { %v1210_v54 = vunpack.c.l.b16 %v1028_v48  ;;  %v1118_v55 = vor.u32 %v1117_v37, %v1114_v35  ;;  %v1127_v58 = vrot.slane %v1125_v40, 4  ;;  %v1133_v59 = vrot.slane %v1131_v44, 5  ;;  %v667_v21 = vld [vmem:[#allocation2 + $0x50] sm:$0x1]  ;;  %v286_v23 = vld [vmem:[%s6068_s6 + $0x4c] sm:$0xf] }
  0x86   : > { %5143 = vmatmul.msk.bf16.gmra.mxu1 %vm1264_vm11, %v1229_v46  ;;  %v1038_v60 = vsel %vm6151_vm10, %v1033_v51, %v1037_v28  ;;  %v827_v1 = vshll.u32 %v742_v36, 16  ;;  %v833_v50 = vshll.u32 %v6388_v45, 16  ;;  %v837_v41 = vshrl.u32 %v6388_v45, 16  ;;  %v691_v32 = vld [vmem:[#allocation2 + $0x78] sm:$0xf] }
  0x87   : > { %v1211_v2 = vunpack.c.l.b16 %v1038_v60  ;;  %v1119_v3 = vrot.slane %v1118_v55, 4  ;;  %v1128_v4 = vor.u32 %v1127_v58, %v1123_v39  ;;  %v826_v57 = vrot.slane %v824_v63, 4  ;;  %v294_v33 = vld [vmem:[%s6068_s6 + $0x6c] sm:$0xf]  ;;  %v269_v51 = vld [vmem:[%s6068_s6 + $0x8] sm:$0xf] }
  0x88   : > { %v829_v6 = vrot.slane %v827_v1, 5  ;;  %v835_v56 = vrot.slane %v833_v50, 5  ;;  %v843_v7 = vshll.u32 %v6393_v49, 16  ;;  %v839_v14 = vrot.slane %v837_v41, 4  ;;  %v695_v55 = vld [vmem:[#allocation2 + $0x80] sm:$0x1] }
  0x89   : > { %v1233_v8 = vpack.c.b16 %v1211_v2, %v1210_v54  ;;  %v1124_v10 = vsel %vm6151_vm10, %v1119_v3, %v1123_v39  ;;  %v1129_v11 = vrot.slane %v1128_v4, 4  ;;  %v393_v17 = vor.u32 %v391_v61, %v6379_v42  ;;  %v293_v61 = vld [vmem:[%s6068_s6 + $0x68] sm:$0xf]  ;;  %v719_v4 = vld [vmem:[#allocation2 + $0xa8] sm:$0xf] }
  0x8a   : > { %v1218_v16 = vunpack.c.l.b16 %v1124_v10  ;;  %v830_v47 = vor.u32 %v829_v6, %v826_v57  ;;  %v845_v62 = vrot.slane %v843_v7, 5  ;;  %v840_v5 = vor.u32 %v839_v14, %v835_v56  ;;  %v5679_v39 = vld [vmem:[#allocation5 + $0x48] sm:$0xff] }
  0x8b   : > { %v1134_v0 = vsel %vm6151_vm10, %v1129_v11, %v1133_v59  ;;  %v394_v19 = vrot.slane %v6379_v42, 4  ;;  %v401_v20 = vor.u32 %v399_v53, %v6384_v22  ;;  %v403_v52 = vrot.slane %v6384_v22, 4  ;;  %1941 = vmatpush.bf16.msrb.mxu2 %v5679_v39  ;;  %v6437_v11 = vld [vmem:[%s6068_s6 + $0xc] sm:$0xf] }
  0x8c   : > { %5147 = vmatmul.msk.bf16.gmra.mxu2 %vm1264_vm11, %v1233_v8  ;;  %v1219_v24 = vunpack.c.l.b16 %v1134_v0  ;;  %v831_v25 = vrot.slane %v830_v47, 4  ;;  %v664_v43 = vsel %vm6102_vm6, %v393_v17, %v663_v15  ;;  %v841_v26 = vrot.slane %v840_v5, 4 }
  0x8d   : > { %v402_v27 = vsel %vm6095_vm5, %v394_v19, %v401_v20  ;;  %665 = vst [vmem:[#allocation2 + $0x48] sm:$0xf] %v664_v43  ;;  %v456_v42 = vshrl.u32 %v285_v18, 16  ;;  %v459_v28 = vshll.u32 %v285_v18, 16  ;;  %v668_v22 = vsel %vm6110_vm7, %v403_v52, %v667_v21 }
  0x8e   : > { %v1237_v29 = vpack.c.b16 %v1219_v24, %v1218_v16  ;;  %v836_v30 = vsel %vm6151_vm10, %v831_v25, %v835_v56  ;;  %666 = vst.msk [vmem:[#allocation2 + $0x4c] sm:$0xf] %vm211_vm0, %v402_v27  ;;  %v464_v31 = vshrl.u32 %v286_v23, 16  ;;  %v846_v34 = vsel %vm6151_vm10, %v841_v26, %v845_v62  ;;  %v723_v62 = vld [vmem:[#allocation2 + $0xb0] sm:$0x1] }
  0x8f   : > { %v1194_v35 = vunpack.c.l.b16 %v836_v30  ;;  %669 = vst [vmem:[#allocation2 + $0x50] sm:$0x1] %v668_v22  ;;  %v458_v36 = vrot.slane %v456_v42, 7  ;;  %v467_v37 = vshll.u32 %v286_v23, 16  ;;  %v1195_v40 = vunpack.c.l.b16 %v846_v34  ;;  %v5703_v34 = vld [vmem:[#allocation5 + $0x88] sm:$0xff] }
  0x90   : > { %5151 = vmatmul.msk.bf16.gmra.mxu3 %vm1264_vm11, %v1237_v29  ;;  %v466_v44 = vrot.slane %v464_v31, 7  ;;  %v524_v46 = vshrl.u32 %v293_v61, 16  ;;  %v527_v48 = vshll.u32 %v293_v61, 16  ;;  %v532_v58 = vshrl.u32 %v294_v33, 16  ;;  %2937 = vmatpush.bf16.msrb.mxu0 %v5703_v34 }
  0x91   : > { %v461_v53 = vor.u32 %v459_v28, %v458_v36  ;;  %v462_v54 = vrot.slane %v458_v36, 4  ;;  %v535_v59 = vshll.u32 %v294_v33, 16  ;;  %v1225_v60 = vpack.c.b16 %v1195_v40, %v1194_v35  ;;  %v635_v28 = vld [vmem:[#allocation2 + $0x18] sm:$0xf]  ;;  %v5671_v33 = vld [vmem:[#allocation5 + $0x8] sm:$0xff] }
  0x92   : > { %v469_v63 = vor.u32 %v467_v37, %v466_v44  ;;  %v471_v1 = vrot.slane %v466_v44, 4  ;;  %v526_v50 = vrot.slane %v524_v46, 7  ;;  %v534_v3 = vrot.slane %v532_v58, 7  ;;  %1560 = vmatpush.bf16.msrb.mxu1 %v5671_v33 }
  0x93   : > { %v692_v2 = vsel %vm6102_vm6, %v461_v53, %v691_v32  ;;  %v320_v41 = vshrl.u32 %v269_v51, 16  ;;  %v323_v57 = vshll.u32 %v269_v51, 16  ;;  %5139 = vmatmul.msk.bf16.gmra.mxu0 %vm1264_vm11, %v1225_v60  ;;  %v328_v27 = vshrl.u32 %v6437_v11, 16  ;;  %v5699_v32 = vld [vmem:[#allocation5 + $0x68] sm:$0xff] }
  0x94   : > { %v752_v6 = vld [vmem:[#allocation2 + $0x48] sm:$0xf]  ;;  %v470_v56 = vsel %vm6095_vm5, %v462_v54, %v469_v63  ;;  %693 = vst [vmem:[#allocation2 + $0x78] sm:$0xf] %v692_v2  ;;  %v696_v7 = vsel %vm6110_vm7, %v471_v1, %v695_v55  ;;  %v529_v8 = vor.u32 %v527_v48, %v526_v50  ;;  %v530_v10 = vrot.slane %v526_v50, 4  ;;  %2255 = vmatpush.bf16.msrb.mxu3 %v5699_v32 }
  0x95   : > { %v753_v14 = vld [vmem:[#allocation2 + $0x4c] sm:$0xf]  ;;  %v944_v15 = vshrl.u32 %v752_v6, 16  ;;  %v947_v16 = vshll.u32 %v752_v6, 16  ;;  %694 = vst.msk [vmem:[#allocation2 + $0x7c] sm:$0xf] %vm211_vm0, %v470_v56  ;;  %v537_v47 = vor.u32 %v535_v59, %v534_v3 }
  0x96   : > { %v786_v17 = vld [vmem:[#allocation2 + $0x50] sm:$0x1]  ;;  %v953_v18 = vshll.u32 %v753_v14, 16  ;;  %v957_v0 = vshrl.u32 %v753_v14, 16  ;;  %697 = vst [vmem:[#allocation2 + $0x80] sm:$0x1] %v696_v7  ;;  %v720_v5 = vsel %vm6102_vm6, %v529_v8, %v719_v4 }
  0x97   : > { %v946_v19 = vrot.slane %v944_v15, 4  ;;  %v949_v20 = vrot.slane %v947_v16, 5  ;;  %v963_v21 = vshll.u32 %v786_v17, 16  ;;  %v538_v23 = vsel %vm6095_vm5, %v530_v10, %v537_v47  ;;  %721 = vst [vmem:[#allocation2 + $0xa8] sm:$0xf] %v720_v5 }
  0x98   : > { %v955_v24 = vrot.slane %v953_v18, 5  ;;  %v959_v25 = vrot.slane %v957_v0, 4  ;;  %v539_v52 = vrot.slane %v534_v3, 4  ;;  %722 = vst.msk [vmem:[#allocation2 + $0xac] sm:$0xf] %vm211_vm0, %v538_v23  ;;  %v6445_v43 = vrot.slane %v320_v41, 7 }
  0x99   : > { %v950_v61 = vor.u32 %v949_v20, %v946_v19  ;;  %v965_v26 = vrot.slane %v963_v21, 5  ;;  %v331_v42 = vshll.u32 %v6437_v11, 16  ;;  %v330_v37 = vrot.slane %v328_v27, 7  ;;  %v639_v19 = vld [vmem:[#allocation2 + $0x20] sm:$0x1] }
  0x9a   : > { %v960_v29 = vor.u32 %v959_v25, %v955_v24  ;;  %v724_v30 = vsel %vm6110_vm7, %v539_v52, %v723_v62  ;;  %v325_v22 = vor.u32 %v323_v57, %v6445_v43  ;;  %v326_v31 = vrot.slane %v6445_v43, 4  ;;  %v279_v52 = vld [vmem:[%s6068_s6 + $0x30] sm:$0xf] }
  0x9b   : > { %v951_v35 = vrot.slane %v950_v61, 4  ;;  %v760_v36 = vld [vmem:[#allocation2 + $0x78] sm:$0xf]  ;;  %725 = vst [vmem:[#allocation2 + $0xb0] sm:$0x1] %v724_v30  ;;  %v333_v7 = vor.u32 %v331_v42, %v330_v37  ;;  %v335_v27 = vrot.slane %v330_v37, 4 }
  0x9c   : > { %v961_v39 = vrot.slane %v960_v29, 4  ;;  %v761_v40 = vld [vmem:[#allocation2 + $0x7c] sm:$0xf]  ;;  %v1040_v44 = vshrl.u32 %v760_v36, 16  ;;  %v1043_v46 = vshll.u32 %v760_v36, 16  ;;  %v636_v48 = vsel %vm6102_vm6, %v325_v22, %v635_v28 }
  0x9d   : > { %v956_v51 = vsel %vm6151_vm10, %v951_v35, %v955_v24  ;;  %v790_v53 = vld [vmem:[#allocation2 + $0x80] sm:$0x1]  ;;  %v1049_v54 = vshll.u32 %v761_v40, 16  ;;  %v1053_v55 = vshrl.u32 %v761_v40, 16  ;;  %637 = vst [vmem:[#allocation2 + $0x18] sm:$0xf] %v636_v48  ;;  %v334_v24 = vsel %vm6095_vm5, %v326_v31, %v333_v7 }
  0x9e   : > { %v966_v58 = vsel %vm6151_vm10, %v961_v39, %v965_v26  ;;  %v1204_v59 = vunpack.c.l.b16 %v956_v51  ;;  %v1042_v60 = vrot.slane %v1040_v44, 4  ;;  %v1045_v63 = vrot.slane %v1043_v46, 5  ;;  %v768_v1 = vld [vmem:[#allocation2 + $0xa8] sm:$0xf]  ;;  %638 = vst.msk [vmem:[#allocation2 + $0x1c] sm:$0xf] %vm211_vm0, %v334_v24 }
  0x9f   : > { %v1205_v50 = vunpack.c.l.b16 %v966_v58  ;;  %v1051_v2 = vrot.slane %v1049_v54, 5  ;;  %v1055_v3 = vrot.slane %v1053_v55, 4  ;;  %v1059_v4 = vshll.u32 %v790_v53, 16  ;;  %v769_v41 = vld [vmem:[#allocation2 + $0xac] sm:$0xf] }
  0xa0   : > { %v1046_v57 = vor.u32 %v1045_v63, %v1042_v60  ;;  %v1136_v6 = vshrl.u32 %v768_v1, 16  ;;  %v1139_v56 = vshll.u32 %v768_v1, 16  ;;  %v1145_v14 = vshll.u32 %v769_v41, 16  ;;  %v280_v22 = vld [vmem:[%s6068_s6 + $0x34] sm:$0xf] }
  0xa1   : > { %v1230_v8 = vpack.c.b16 %v1205_v50, %v1204_v59  ;;  %v1056_v10 = vor.u32 %v1055_v3, %v1051_v2  ;;  %v1061_v11 = vrot.slane %v1059_v4, 5  ;;  %v1149_v17 = vshrl.u32 %v769_v41, 16  ;;  %v287_v35 = vld [vmem:[%s6068_s6 + $0x50] sm:$0xf]  ;;  %v288_v53 = vld [vmem:[%s6068_s6 + $0x54] sm:$0xf] }
  0xa2   : > { %v1047_v15 = vrot.slane %v1046_v57, 4  ;;  %v794_v16 = vld [vmem:[#allocation2 + $0xb0] sm:$0x1]  ;;  %v1138_v47 = vrot.slane %v1136_v6, 4  ;;  %v1141_v62 = vrot.slane %v1139_v56, 5  ;;  %v1147_v0 = vrot.slane %v1145_v14, 5 }
  0xa3   : > { %5144 = vmatmul.msk.bf16.gmra.mxu1 %vm1264_vm11, %v1230_v8  ;;  %v1057_v18 = vrot.slane %v1056_v10, 4  ;;  %v1155_v5 = vshll.u32 %v794_v16, 16  ;;  %v1151_v23 = vrot.slane %v1149_v17, 4  ;;  %v640_v31 = vsel %vm6110_vm7, %v335_v27, %v639_v19  ;;  %v295_v14 = vld [vmem:[%s6068_s6 + $0x70] sm:$0xf] }
  0xa4   : > { %v1052_v20 = vsel %vm6151_vm10, %v1047_v15, %v1051_v2  ;;  %v1142_v21 = vor.u32 %v1141_v62, %v1138_v47  ;;  %v744_v25 = vld [vmem:[#allocation2 + $0x18] sm:$0xf]  ;;  %v405_v33 = vshrl.u32 %v279_v52, 16  ;;  %v408_v34 = vshll.u32 %v279_v52, 16  ;;  %641 = vst [vmem:[#allocation2 + $0x20] sm:$0x1] %v640_v31 }
  0xa5   : > { %v1062_v43 = vsel %vm6151_vm10, %v1057_v18, %v1061_v11  ;;  %v1212_v61 = vunpack.c.l.b16 %v1052_v20  ;;  %v1157_v26 = vrot.slane %v1155_v5, 5  ;;  %v1152_v29 = vor.u32 %v1151_v23, %v1147_v0  ;;  %v670_v2 = vld [vmem:[#allocation2 + $0x54] sm:$0xf]  ;;  %v6478_v3 = vld [vmem:[#allocation2 + $0x1c] sm:$0xf] }
  0xa6   : > { %v1213_v42 = vunpack.c.l.b16 %v1062_v43  ;;  %v1143_v28 = vrot.slane %v1142_v21, 4  ;;  %v848_v30 = vshrl.u32 %v744_v25, 16  ;;  %v851_v32 = vshll.u32 %v744_v25, 16  ;;  %v674_v11 = vld [vmem:[#allocation2 + $0x5c] sm:$0x1] }
  0xa7   : > { %v1153_v37 = vrot.slane %v1152_v29, 4  ;;  %v407_v48 = vrot.slane %v405_v33, 7  ;;  %v413_v51 = vshrl.u32 %v280_v22, 16  ;;  %v416_v55 = vshll.u32 %v280_v22, 16  ;;  %v698_v17 = vld [vmem:[#allocation2 + $0x84] sm:$0xf] }
  0xa8   : > { %v1234_v36 = vpack.c.b16 %v1213_v42, %v1212_v61  ;;  %v1148_v39 = vsel %vm6151_vm10, %v1143_v28, %v1147_v0  ;;  %v850_v40 = vrot.slane %v848_v30, 4  ;;  %v853_v46 = vrot.slane %v851_v32, 5  ;;  %v296_v18 = vld [vmem:[%s6068_s6 + $0x74] sm:$0xf]  ;;  %v5678_v52 = vld [vmem:[#allocation5 + $0x40] sm:$0xff] }
  0xa9   : > { %v1220_v44 = vunpack.c.l.b16 %v1148_v39  ;;  %v1158_v54 = vsel %vm6151_vm10, %v1153_v37, %v1157_v26  ;;  %v473_v58 = vshrl.u32 %v287_v35, 16  ;;  %v476_v59 = vshll.u32 %v287_v35, 16  ;;  %v702_v25 = vld [vmem:[#allocation2 + $0x8c] sm:$0x1]  ;;  %v271_v42 = vld [vmem:[%s6068_s6 + $0x10] sm:$0xf]  ;;  %1942 = vmatpush.bf16.msrb.mxu2 %v5678_v52 }
  0xaa   : > { %5148 = vmatmul.msk.bf16.gmra.mxu2 %vm1264_vm11, %v1234_v36  ;;  %v1221_v60 = vunpack.c.l.b16 %v1158_v54  ;;  %v854_v63 = vor.u32 %v853_v46, %v850_v40  ;;  %v410_v1 = vor.u32 %v408_v34, %v407_v48  ;;  %v411_v50 = vrot.slane %v407_v48, 4  ;;  %v726_v39 = vld [vmem:[#allocation2 + $0xb4] sm:$0xf]  ;;  %v272_v54 = vld [vmem:[%s6068_s6 + $0x14] sm:$0xf]  ;;  %v5702_v52 = vld [vmem:[#allocation5 + $0x80] sm:$0xff] }
  0xab   : > { %v415_v4 = vrot.slane %v413_v51, 7  ;;  %v475_v41 = vrot.slane %v473_v58, 7  ;;  %v481_v57 = vshrl.u32 %v288_v53, 16  ;;  %v484_v6 = vshll.u32 %v288_v53, 16  ;;  %v6487_v0 = vld [vmem:[#allocation2 + $0x20] sm:$0x1]  ;;  %2938 = vmatpush.bf16.msrb.mxu0 %v5702_v52 }
  0xac   : > { %v1238_v56 = vpack.c.b16 %v1221_v60, %v1220_v44  ;;  %v855_v7 = vrot.slane %v854_v63, 4  ;;  %v857_v8 = vshll.u32 %v6478_v3, 16  ;;  %v861_v10 = vshrl.u32 %v6478_v3, 16  ;;  %v730_v53 = vld [vmem:[#allocation2 + $0xbc] sm:$0x1] }
  0xad   : > { %v418_v15 = vor.u32 %v416_v55, %v415_v4  ;;  %v420_v16 = vrot.slane %v415_v4, 4  ;;  %v671_v47 = vsel %vm6102_vm6, %v410_v1, %v670_v2  ;;  %v478_v62 = vor.u32 %v476_v59, %v475_v41 }
  0xae   : > { %5152 = vmatmul.msk.bf16.gmra.mxu3 %vm1264_vm11, %v1238_v56  ;;  %v859_v5 = vrot.slane %v857_v8, 5  ;;  %v863_v19 = vrot.slane %v861_v10, 4  ;;  %672 = vst [vmem:[#allocation2 + $0x54] sm:$0xf] %v671_v47  ;;  %v867_v20 = vshll.u32 %v6487_v0, 16  ;;  %v479_v24 = vrot.slane %v475_v41, 4 }
  0xaf   : > { %v419_v21 = vsel %vm6095_vm5, %v411_v50, %v418_v15  ;;  %v675_v23 = vsel %vm6110_vm7, %v420_v16, %v674_v11  ;;  %v483_v26 = vrot.slane %v481_v57, 7  ;;  %v699_v27 = vsel %vm6102_vm6, %v478_v62, %v698_v17  ;;  %v642_v8 = vld [vmem:[#allocation2 + $0x24] sm:$0xf]  ;;  %v5698_v10 = vld [vmem:[#allocation5 + $0x60] sm:$0xff] }
  0xb0   : > { %v860_v43 = vsel %vm6151_vm10, %v855_v7, %v859_v5  ;;  %v864_v61 = vor.u32 %v863_v19, %v859_v5  ;;  %673 = vst.msk [vmem:[#allocation2 + $0x58] sm:$0xf] %vm211_vm0, %v419_v21  ;;  %v869_v28 = vrot.slane %v867_v20, 5  ;;  %v541_v30 = vshrl.u32 %v295_v14, 16  ;;  %v5670_v11 = vld [vmem:[#allocation5] sm:$0xff]  ;;  %2256 = vmatpush.bf16.msrb.mxu3 %v5698_v10 }
  0xb1   : > { %v1196_v29 = vunpack.c.l.b16 %v860_v43  ;;  %676 = vst [vmem:[#allocation2 + $0x5c] sm:$0x1] %v675_v23  ;;  %v544_v22 = vshll.u32 %v295_v14, 16  ;;  %v486_v32 = vor.u32 %v484_v6, %v483_v26  ;;  %v488_v33 = vrot.slane %v483_v26, 4  ;;  %1561 = vmatpush.bf16.msrb.mxu1 %v5670_v11 }
  0xb2   : > { %v865_v31 = vrot.slane %v864_v61, 4  ;;  %700 = vst [vmem:[#allocation2 + $0x84] sm:$0xf] %v699_v27  ;;  %v549_v34 = vshrl.u32 %v296_v18, 16  ;;  %v543_v35 = vrot.slane %v541_v30, 7  ;;  %v552_v36 = vshll.u32 %v296_v18, 16 }
  0xb3   : > { %v337_v37 = vshrl.u32 %v271_v42, 16  ;;  %v340_v40 = vshll.u32 %v271_v42, 16  ;;  %v487_v46 = vsel %vm6095_vm5, %v479_v24, %v486_v32  ;;  %v703_v48 = vsel %vm6110_vm7, %v488_v33, %v702_v25 }
  0xb4   : > { %v870_v44 = vsel %vm6151_vm10, %v865_v31, %v869_v28  ;;  %v551_v51 = vrot.slane %v549_v34, 7  ;;  %701 = vst.msk [vmem:[#allocation2 + $0x88] sm:$0xf] %vm211_vm0, %v487_v46  ;;  %v546_v59 = vor.u32 %v544_v22, %v543_v35  ;;  %v547_v60 = vrot.slane %v543_v35, 4 }
  0xb5   : > { %v1197_v55 = vunpack.c.l.b16 %v870_v44  ;;  %v754_v58 = vld [vmem:[#allocation2 + $0x54] sm:$0xf]  ;;  %v6508_v63 = vrot.slane %v337_v37, 7  ;;  %704 = vst [vmem:[#allocation2 + $0x8c] sm:$0x1] %v703_v48  ;;  %v345_v20 = vshrl.u32 %v272_v54, 16 }
  0xb6   : > { %v968_v1 = vshrl.u32 %v754_v58, 16  ;;  %v971_v50 = vshll.u32 %v754_v58, 16  ;;  %v554_v2 = vor.u32 %v552_v36, %v551_v51  ;;  %v556_v4 = vrot.slane %v551_v51, 4  ;;  %v646_v51 = vld [vmem:[#allocation2 + $0x2c] sm:$0x1] }
  0xb7   : > { %v1226_v41 = vpack.c.b16 %v1197_v55, %v1196_v29  ;;  %v6510_v57 = vld [vmem:[#allocation2 + $0x58] sm:$0xf]  ;;  %v727_v6 = vsel %vm6102_vm6, %v546_v59, %v726_v39  ;;  %v342_v56 = vor.u32 %v340_v40, %v6508_v63  ;;  %v343_v7 = vrot.slane %v6508_v63, 4 }
  0xb8   : > { %v6516_v14 = vld [vmem:[#allocation2 + $0x5c] sm:$0x1]  ;;  %v970_v15 = vrot.slane %v968_v1, 4  ;;  %v973_v16 = vrot.slane %v971_v50, 5  ;;  %v977_v47 = vshll.u32 %v6510_v57, 16  ;;  %v981_v62 = vshrl.u32 %v6510_v57, 16 }
  0xb9   : > { %5140 = vmatmul.msk.bf16.gmra.mxu0 %vm1264_vm11, %v1226_v41  ;;  %v987_v17 = vshll.u32 %v6516_v14, 16  ;;  %v762_v18 = vld [vmem:[#allocation2 + $0x84] sm:$0xf]  ;;  %v555_v5 = vsel %vm6095_vm5, %v547_v60, %v554_v2  ;;  %728 = vst [vmem:[#allocation2 + $0xb4] sm:$0xf] %v727_v6  ;;  %v731_v19 = vsel %vm6110_vm7, %v556_v4, %v730_v53  ;;  %v347_v26 = vrot.slane %v345_v20, 7 }
  0xba   : > { %v974_v21 = vor.u32 %v973_v16, %v970_v15  ;;  %v979_v23 = vrot.slane %v977_v47, 5  ;;  %v983_v24 = vrot.slane %v981_v62, 4  ;;  %v1064_v25 = vshrl.u32 %v762_v18, 16  ;;  %729 = vst.msk [vmem:[#allocation2 + $0xb8] sm:$0xf] %vm211_vm0, %v555_v5  ;;  %v5729_v53 = vld [vmem:[#allocation5 + $0xd8] sm:$0xff] }
  0xbb   : > { %v989_v43 = vrot.slane %v987_v17, 5  ;;  %v1067_v61 = vshll.u32 %v762_v18, 16  ;;  %732 = vst [vmem:[#allocation2 + $0xbc] sm:$0x1] %v731_v19  ;;  %v348_v27 = vshll.u32 %v272_v54, 16  ;;  %v643_v22 = vsel %vm6102_vm6, %v342_v56, %v642_v8  ;;  %3676 = vmatpush.bf16.msra.mxu2 %v5729_v53 }
  0xbc   : > { %v975_v42 = vrot.slane %v974_v21, 4  ;;  %v984_v28 = vor.u32 %v983_v24, %v979_v23  ;;  %v763_v29 = vld [vmem:[#allocation2 + $0x88] sm:$0xf]  ;;  %v1066_v30 = vrot.slane %v1064_v25, 4  ;;  %v791_v31 = vld [vmem:[#allocation2 + $0x8c] sm:$0x1] }
  0xbd   : > { %v1069_v32 = vrot.slane %v1067_v61, 5  ;;  %v1073_v33 = vshll.u32 %v763_v29, 16  ;;  %v1077_v34 = vshrl.u32 %v763_v29, 16  ;;  %v350_v35 = vor.u32 %v348_v27, %v347_v26  ;;  %644 = vst [vmem:[#allocation2 + $0x24] sm:$0xf] %v643_v22  ;;  %v5733_v29 = vld [vmem:[#allocation5 + $0xf8] sm:$0xff] }
  0xbe   : > { %v980_v36 = vsel %vm6151_vm10, %v975_v42, %v979_v23  ;;  %v985_v39 = vrot.slane %v984_v28, 4  ;;  %v1083_v37 = vshll.u32 %v791_v31, 16  ;;  %v352_v60 = vrot.slane %v347_v26, 4  ;;  %v1643_v5 = vld [vmem:[#allocation2] sm:$0xe]  ;;  %4358 = vmatpush.bf16.msra.mxu3 %v5733_v29 }
  0xbf   : > { %v1206_v40 = vunpack.c.l.b16 %v980_v36  ;;  %v1070_v44 = vor.u32 %v1069_v32, %v1066_v30  ;;  %v1075_v46 = vrot.slane %v1073_v33, 5  ;;  %v1079_v48 = vrot.slane %v1077_v34, 4  ;;  %v5804_v19 = vld [vmem:[#allocation2 + $0x8] sm:$0x1]  ;;  %v2370_v26 = vld [vmem:[#allocation2 + $0xc] sm:$0xf] }
  0xc0   : > { %v990_v54 = vsel %vm6151_vm10, %v985_v39, %v989_v43  ;;  %v1085_v55 = vrot.slane %v1083_v37, 5  ;;  %v770_v58 = vld [vmem:[#allocation2 + $0xb4] sm:$0xf]  ;;  %v351_v59 = vsel %vm6095_vm5, %v343_v7, %v350_v35  ;;  %v647_v10 = vsel %vm6110_vm7, %v352_v60, %v646_v51  ;;  %v1644_v29 = vld [vmem:[#allocation2 + $0xc] sm:$0xe] }
  0xc1   : > { %v1207_v63 = vunpack.c.l.b16 %v990_v54  ;;  %v1071_v1 = vrot.slane %v1070_v44, 4  ;;  %v1080_v50 = vor.u32 %v1079_v48, %v1075_v46  ;;  %v771_v2 = vld [vmem:[#allocation2 + $0xb8] sm:$0xf]  ;;  %v1160_v4 = vshrl.u32 %v770_v58, 16  ;;  %645 = vst.msk [vmem:[#allocation2 + $0x28] sm:$0xf] %vm211_vm0, %v351_v59 }
  0xc2   : > { %v795_v41 = vld [vmem:[#allocation2 + $0xbc] sm:$0x1]  ;;  %v1163_v6 = vshll.u32 %v770_v58, 16  ;;  %v1169_v56 = vshll.u32 %v771_v2, 16  ;;  %v1173_v8 = vshrl.u32 %v771_v2, 16  ;;  %v1699_v20 = vrot.slane %v5804_v19, 5 }
  0xc3   : > { %v1231_v11 = vpack.c.b16 %v1207_v63, %v1206_v40  ;;  %v1076_v7 = vsel %vm6151_vm10, %v1071_v1, %v1075_v46  ;;  %v1081_v15 = vrot.slane %v1080_v50, 4  ;;  %v1162_v16 = vrot.slane %v1160_v4, 4  ;;  %648 = vst [vmem:[#allocation2 + $0x2c] sm:$0x1] %v647_v10  ;;  %v5709_v30 = vld [vmem:[#allocation5 + $0xb8] sm:$0xff] }
  0xc4   : > { %v1214_v47 = vunpack.c.l.b16 %v1076_v7  ;;  %v1165_v62 = vrot.slane %v1163_v6, 5  ;;  %v1171_v17 = vrot.slane %v1169_v56, 5  ;;  %v1175_v18 = vrot.slane %v1173_v8, 4  ;;  %v746_v24 = vld [vmem:[#allocation2 + $0x24] sm:$0xf]  ;;  %v5737_v35 = vld [vmem:[#allocation5 + $0x118] sm:$0xff]  ;;  %3361 = vmatpush.bf16.msra.mxu1 %v5709_v30 }
  0xc5   : > { %5145 = vmatmul.msk.bf16.gmra.mxu1 %vm1264_vm11, %v1231_v11  ;;  %v1086_v21 = vsel %vm6151_vm10, %v1081_v15, %v1085_v55  ;;  %v1179_v23 = vshll.u32 %v795_v41, 16  ;;  %v872_v61 = vshrl.u32 %v746_v24, 16  ;;  %v875_v42 = vshll.u32 %v746_v24, 16  ;;  %v5805_v40 = vld [vmem:[#allocation2 + $0x4] sm:$0xf]  ;;  %4784 = vmatpush.bf16.msra.mxu0 %v5737_v35 }
  0xc6   : > { %v1215_v25 = vunpack.c.l.b16 %v1086_v21  ;;  %v1166_v52 = vor.u32 %v1165_v62, %v1162_v16  ;;  %v1176_v43 = vor.u32 %v1175_v18, %v1171_v17  ;;  %v5250_v28 = vrot.slane %v1643_v5, 9  ;;  %v2371_v4 = vld [vmem:[#allocation2 + $0x10] sm:$0xf]  ;;  %v5654_v5 = vld [vmem:[#allocation2] sm:$0xff]  ;;  %v2372_v19 = vld [vmem:[#allocation2 + $0x14] sm:$0x1] }
  0xc7   : > { %v1181_v27 = vrot.slane %v1179_v23, 5  ;;  %v874_v34 = vrot.slane %v872_v61, 4  ;;  %v877_v36 = vrot.slane %v875_v42, 5  ;;  %v1696_v44 = vrot.slane %v5805_v40, 5  ;;  %v2374_v35 = vld [vmem:[#allocation2 + $0x1c] sm:$0xf] }
  0xc8   : > { %v1235_v22 = vpack.c.b16 %v1215_v25, %v1214_v47  ;;  %v1167_v31 = vrot.slane %v1166_v52, 4  ;;  %v1177_v32 = vrot.slane %v1176_v43, 4  ;;  %v6543_v33 = vld [vmem:[#allocation2 + $0x28] sm:$0xf]  ;;  %v2419_v53 = vshrl.u32 %v2370_v26, 16 }
  0xc9   : > { %v881_v39 = vshll.u32 %v6543_v33, 16  ;;  %v885_v37 = vshrl.u32 %v6543_v33, 16  ;;  %v2422_v54 = vshll.u32 %v2370_v26, 16  ;;  %v878_v59 = vor.u32 %v877_v36, %v874_v34 }
  0xca   : > { %5149 = vmatmul.msk.bf16.gmra.mxu2 %vm1264_vm11, %v1235_v22  ;;  %v1172_v46 = vsel %vm6151_vm10, %v1167_v31, %v1171_v17  ;;  %v1182_v48 = vsel %vm6151_vm10, %v1177_v32, %v1181_v27  ;;  %v6552_v51 = vld [vmem:[#allocation2 + $0x2c] sm:$0x1]  ;;  %v1698_v2 = vrot.slane %v1696_v44, 4  ;;  %v2421_v56 = vrot.slane %v2419_v53, 4  ;;  %v2373_v22 = vld [vmem:[#allocation2 + $0x18] sm:$0xf] }
  0xcb   : > { %v1222_v55 = vunpack.c.l.b16 %v1172_v46  ;;  %v1223_v58 = vunpack.c.l.b16 %v1182_v48  ;;  %v883_v60 = vrot.slane %v881_v39, 5  ;;  %v887_v1 = vrot.slane %v885_v37, 4  ;;  %v1645_v31 = vld [vmem:[#allocation2 + $0x18] sm:$0xe]  ;;  %v5682_v48 = vld [vmem:[#allocation2 + $0xc] sm:$0xff] }
  0xcc   : > { %v891_v50 = vshll.u32 %v6552_v51, 16  ;;  %v879_v6 = vrot.slane %v878_v59, 4  ;;  %v1697_v11 = vsel %vm6556_vm14, %v5250_v28, %v1696_v44  ;;  %v2424_v7 = vrot.slane %v2422_v54, 5 }
  0xcd   : > { %v1239_v41 = vpack.c.b16 %v1223_v58, %v1222_v55  ;;  %v888_v8 = vor.u32 %v887_v1, %v883_v60  ;;  %v1700_v16 = vsel %vm6556_vm14, %v1698_v2, %v1699_v20  ;;  %v2428_v47 = vshll.u32 %v2371_v4, 16 }
  0xce   : > { %v893_v10 = vrot.slane %v891_v50, 5  ;;  %v884_v15 = vsel %vm6151_vm10, %v879_v6, %v883_v60  ;;  %v2432_v62 = vshrl.u32 %v2371_v4, 16  ;;  %v2425_v21 = vor.u32 %v2424_v7, %v2421_v56  ;;  %v2375_v7 = vld [vmem:[#allocation2 + $0x20] sm:$0x1] }
  0xcf   : > { %5153 = vmatmul.msk.bf16.gmra.mxu3 %vm1264_vm11, %v1239_v41  ;;  %v889_v17 = vrot.slane %v888_v8, 4  ;;  %v1198_v18 = vunpack.c.l.b16 %v884_v15  ;;  %v2430_v23 = vrot.slane %v2428_v47, 5  ;;  %v1815_v52 = vunpack.c.l.b16 %v1697_v11  ;;  %v5655_v11 = vld [vmem:[#allocation2 + $0xc] sm:$0xff] }
  0xd0   : > { %v2434_v24 = vrot.slane %v2432_v62, 4  ;;  %v1816_v43 = vunpack.c.l.b16 %v1700_v16  ;;  %v2438_v27 = vshll.u32 %v2372_v19, 16  ;;  %v2426_v20 = vrot.slane %v2425_v21, 4  ;;  %v2376_v21 = vld [vmem:[#allocation2 + $0x24] sm:$0xf] }
  0xd1   : > { %v894_v25 = vsel %vm6151_vm10, %v889_v17, %v893_v10  ;;  %v1703_v30 = vrot.slane %v6388_v45, 5  ;;  %v5251_v39 = vrot.slane %v1644_v29, 9  ;;  %v1706_v37 = vrot.slane %v6393_v49, 5 }
  0xd2   : > { %v1199_v61 = vunpack.c.l.b16 %v894_v25  ;;  %v2435_v26 = vor.u32 %v2434_v24, %v2430_v23  ;;  %v1847_v28 = vpack.c.b16 %v1816_v43, %v1815_v52  ;;  %v2440_v34 = vrot.slane %v2438_v27, 5  ;;  %v2377_v52 = vld [vmem:[#allocation2 + $0x28] sm:$0xf] }
  0xd3   : > { %v2431_v36 = vsel %vm6151_vm10, %v2426_v20, %v2430_v23  ;;  %v2443_v40 = vshrl.u32 %v2373_v22, 16  ;;  %v5252_v44 = vrot.slane %v1645_v31, 9  ;;  %v1710_v46 = vrot.slane %v6478_v3, 5 }
  0xd4   : > { %v1227_v42 = vpack.c.b16 %v1199_v61, %v1198_v18  ;;  %v2436_v32 = vrot.slane %v2435_v26, 4  ;;  %v1705_v53 = vrot.slane %v1703_v30, 4  ;;  %v2446_v45 = vshll.u32 %v2373_v22, 16  ;;  %v5683_v26 = vld [vmem:[#allocation2 + $0x18] sm:$0xff] }
  0xd5   : > { %5234 = vmatmul.msk.bf16.vlgmr.msrb.gmra.mxu1 %vm1264_vm11, %v5654_v5  ;;  %v2452_v54 = vshll.u32 %v2374_v35, 16  ;;  %v1713_v55 = vrot.slane %v6487_v0, 5  ;;  %v2456_v59 = vshrl.u32 %v2374_v35, 16  ;;  %v1711_v60 = vsel %vm6556_vm14, %v5252_v44, %v1710_v46  ;;  %v2378_v35 = vld [vmem:[#allocation2 + $0x2c] sm:$0x1] }
  0xd6   : > { %5141 = vmatmul.msk.bf16.gmra.mxu0 %vm1264_vm11, %v1227_v42  ;;  %v2441_v58 = vsel %vm6151_vm10, %v2436_v32, %v2440_v34  ;;  %v1712_v1 = vrot.slane %v1710_v46, 4  ;;  %v1819_v50 = vunpack.c.l.b16 %v1711_v60  ;;  %v2811_v49 = vunpack.c.l.b16 %v2431_v36  ;;  %v5656_v36 = vld [vmem:[#allocation2 + $0x18] sm:$0xff]  ;;  %v5684_v60 = vld [vmem:[#allocation2 + $0x24] sm:$0xff] }
  0xd7   : > { %v2812_v3 = vunpack.c.l.b16 %v2441_v58  ;;  %v1704_v4 = vsel %vm6556_vm14, %v5251_v39, %v1703_v30  ;;  %v1707_v0 = vsel %vm6556_vm14, %v1705_v53, %v1706_v37  ;;  %v2445_v6 = vrot.slane %v2443_v40, 4  ;;  %v2380_v58 = vld [vmem:[#allocation2 + $0x34] sm:$0xf] }
  0xd8   : > { %v1714_v2 = vsel %vm6556_vm14, %v1712_v1, %v1713_v55  ;;  %v2448_v56 = vrot.slane %v2446_v45, 5  ;;  %v2454_v8 = vrot.slane %v2452_v54, 5  ;;  %v2458_v10 = vrot.slane %v2456_v59, 4  ;;  %v1646_v54 = vld [vmem:[#allocation2 + $0x24] sm:$0xe] }
  0xd9   : > { %v1820_v41 = vunpack.c.l.b16 %v1714_v2  ;;  %v1817_v16 = vunpack.c.l.b16 %v1704_v4  ;;  %v1818_v47 = vunpack.c.l.b16 %v1707_v0  ;;  %v2843_v62 = vpack.c.b16 %v2812_v3, %v2811_v49  ;;  %v2379_v55 = vld [vmem:[#allocation2 + $0x30] sm:$0xf] }
  0xda   : > { %5282 = vmatmul.msk.bf16.vlgmr.msrb.gmra.mxu2 %vm1264_vm11, %v1847_v28  ;;  %v2449_v17 = vor.u32 %v2448_v56, %v2445_v6  ;;  %v2459_v18 = vor.u32 %v2458_v10, %v2454_v8  ;;  %v2462_v5 = vshll.u32 %v2375_v7, 16  ;;  %v2467_v43 = vshrl.u32 %v2376_v21, 16  ;;  %v5728_v10 = vld [vmem:[#allocation5 + $0xd0] sm:$0xff] }
  0xdb   : > { %v1849_v15 = vpack.c.b16 %v1820_v41, %v1819_v50  ;;  %v1848_v19 = vpack.c.b16 %v1818_v47, %v1817_v16  ;;  %v2470_v61 = vshll.u32 %v2376_v21, 16  ;;  %v2476_v27 = vshll.u32 %v2377_v52, 16  ;;  %v2381_v47 = vld [vmem:[#allocation2 + $0x38] sm:$0x1]  ;;  %3677 = vmatpush.bf16.msra.mxu2 %v5728_v10 }
  0xdc   : > { %v2450_v23 = vrot.slane %v2449_v17, 4  ;;  %v2460_v24 = vrot.slane %v2459_v18, 4  ;;  %v2464_v25 = vrot.slane %v2462_v5, 5  ;;  %v2480_v42 = vshrl.u32 %v2377_v52, 16  ;;  %v2383_v52 = vld [vmem:[#allocation2 + $0x40] sm:$0xf] }
  0xdd   : > { %v2469_v29 = vrot.slane %v2467_v43, 4  ;;  %v2472_v30 = vrot.slane %v2470_v61, 5  ;;  %v2478_v32 = vrot.slane %v2476_v27, 5  ;;  %v2486_v44 = vshll.u32 %v2378_v35, 16  ;;  %v5806_v43 = vld [vmem:[#allocation2 + $0x34] sm:$0xf] }
  0xde   : > { %v2455_v20 = vsel %vm6151_vm10, %v2450_v23, %v2454_v8  ;;  %v2465_v28 = vsel %vm6151_vm10, %v2460_v24, %v2464_v25  ;;  %v2482_v34 = vrot.slane %v2480_v42, 4  ;;  %v1717_v45 = vrot.slane %v6543_v33, 5  ;;  %v6613_v24 = vpop.f32.mrf.mxu1  ;;  %v2382_v25 = vld [vmem:[#allocation2 + $0x3c] sm:$0xf]  ;;  %v5708_v27 = vld [vmem:[#allocation5 + $0xb0] sm:$0xff]  ;;  %v5685_v35 = vld [vmem:[#allocation2 + $0x30] sm:$0xff] }
  0xdf   : > { %5378 = vmatmul.msk.bf16.vlgmr.msrb.gmra.mxu3 %vm1264_vm11, %v5682_v48  ;;  %v2813_v22 = vunpack.c.l.b16 %v2455_v20  ;;  %v2814_v31 = vunpack.c.l.b16 %v2465_v28  ;;  %v2473_v39 = vor.u32 %v2472_v30, %v2469_v29  ;;  %v2488_v53 = vrot.slane %v2486_v44, 5  ;;  %v5736_v42 = vld [vmem:[#allocation5 + $0x110] sm:$0xff]  ;;  %v1647_v30 = vld [vmem:[#allocation2 + $0x30] sm:$0xe]  ;;  %3362 = vmatpush.bf16.msra.mxu1 %v5708_v27 }
  0xe0   : > { %v2483_v40 = vor.u32 %v2482_v34, %v2478_v32  ;;  %v5253_v50 = vrot.slane %v1646_v54, 9  ;;  %v1719_v49 = vrot.slane %v1717_v45, 4  ;;  %v1720_v2 = vrot.slane %v6552_v51, 5  ;;  %v5657_v51 = vld [vmem:[#allocation2 + $0x24] sm:$0xff]  ;;  %4785 = vmatpush.bf16.msra.mxu0 %v5736_v42 }
  0xe1   : > { %v2844_v37 = vpack.c.b16 %v2814_v31, %v2813_v22  ;;  %v2474_v46 = vrot.slane %v2473_v39, 4  ;;  %v2491_v3 = vshrl.u32 %v2379_v55, 16  ;;  %v2494_v4 = vshll.u32 %v2379_v55, 16 }
  0xe2   : > { %v2484_v48 = vrot.slane %v2483_v40, 4  ;;  %v2500_v0 = vshll.u32 %v2380_v58, 16  ;;  %v2504_v33 = vshrl.u32 %v2380_v58, 16  ;;  %v1718_v56 = vsel %vm6556_vm14, %v5253_v50, %v1717_v45 }
  0xe3   : > { %v2479_v59 = vsel %vm6151_vm10, %v2474_v46, %v2478_v32  ;;  %v1721_v8 = vsel %vm6556_vm14, %v1719_v49, %v1720_v2  ;;  %v2496_v7 = vrot.slane %v2494_v4, 5  ;;  %v2510_v21 = vshll.u32 %v2381_v47, 16  ;;  %v5658_v49 = vld [vmem:[#allocation2 + $0x30] sm:$0xff]  ;;  %v6634_v47 = vpop.f32.mrf.mxu0 }
  0xe4   : > { %v2489_v1 = vsel %vm6151_vm10, %v2484_v48, %v2488_v53  ;;  %v2815_v41 = vunpack.c.l.b16 %v2479_v59  ;;  %v2506_v16 = vrot.slane %v2504_v33, 4  ;;  %v1822_v17 = vunpack.c.l.b16 %v1721_v8 }
  0xe5   : > { %5235 = vmatmul.msk.bf16.gmra.mxu1 %vm1264_vm11, %v5655_v11  ;;  %v2816_v6 = vunpack.c.l.b16 %v2489_v1  ;;  %v2493_v11 = vrot.slane %v2491_v3, 4  ;;  %v1724_v61 = vrot.slane %v5806_v43, 5  ;;  %v2512_v29 = vrot.slane %v2510_v21, 5  ;;  %v2384_v1 = vld [vmem:[#allocation2 + $0x44] sm:$0x1]  ;;  %v5686_v43 = vld [vmem:[#allocation2 + $0x3c] sm:$0xff] }
  0xe6   : > { %5410 = vmatmul.msk.bf16.vlgmr.msrb.gmra.mxu0 %vm1264_vm11, %v2843_v62  ;;  %v1821_v62 = vunpack.c.l.b16 %v1718_v56  ;;  %v2515_v22 = vshrl.u32 %v2382_v25, 16  ;;  %v2518_v31 = vshll.u32 %v2382_v25, 16  ;;  %v2524_v32 = vshll.u32 %v2383_v52, 16  ;;  %v6626_v50 = vpop.f32.mrf.mxu1  ;;  %v5809_v21 = vld [vmem:[#allocation2 + $0x44] sm:$0x1] }
  0xe7   : > { %v2845_v18 = vpack.c.b16 %v2816_v6, %v2815_v41  ;;  %v2497_v5 = vor.u32 %v2496_v7, %v2493_v11  ;;  %v2528_v34 = vshrl.u32 %v2383_v52, 16  ;;  %v1726_v39 = vrot.slane %v1724_v61, 4 }
  0xe8   : > { %v1850_v23 = vpack.c.b16 %v1822_v17, %v1821_v62  ;;  %v2517_v48 = vrot.slane %v2515_v22, 4  ;;  %v2520_v53 = vrot.slane %v2518_v31, 5  ;;  %v2526_v45 = vrot.slane %v2524_v32, 5  ;;  %v1648_v62 = vld [vmem:[#allocation2 + $0x3c] sm:$0xe] }
  0xe9   : > { %v2498_v20 = vrot.slane %v2497_v5, 4  ;;  %v2530_v54 = vrot.slane %v2528_v34, 4  ;;  %v2534_v41 = vshll.u32 %v2384_v1, 16  ;;  %v2386_v17 = vld [vmem:[#allocation2 + $0x4c] sm:$0xf] }
  0xea   : > { %5283 = vmatmul.msk.bf16.gmra.mxu2 %vm1264_vm11, %v1848_v19  ;;  %v2521_v2 = vor.u32 %v2520_v53, %v2517_v48  ;;  %v2548_v42 = vshll.u32 %v2386_v17, 16 }
  0xeb   : > { %v2531_v33 = vor.u32 %v2530_v54, %v2526_v45  ;;  %v2536_v11 = vrot.slane %v2534_v41, 5  ;;  %v2389_v41 = vld [vmem:[#allocation2 + $0x58] sm:$0xf] }
  0xec   : > { %v2522_v56 = vrot.slane %v2521_v2, 4  ;;  %v2550_v34 = vrot.slane %v2548_v42, 5  ;;  %v5810_v2 = vld [vmem:[#allocation2 + $0x4c] sm:$0xf] }
  0xed   : > { %v2532_v10 = vrot.slane %v2531_v33, 4  ;;  %v2388_v33 = vld [vmem:[#allocation2 + $0x54] sm:$0xf] }
  0xef   : > { %5379 = vmatmul.msk.bf16.gmra.mxu3 %vm1264_vm11, %v5683_v26  ;;  %v5732_v26 = vld [vmem:[#allocation5 + $0xf0] sm:$0xff]  ;;  %v2537_v5 = vsel %vm6151_vm10, %v2532_v10, %v2536_v11 }
  0xf0   : > { %4359 = vmatpush.bf16.msra.mxu3 %v5732_v26  ;;  %v5255_v26 = vrot.slane %v1648_v62, 9 }
  0xf5   : > { %5236 = vmatmul.msk.bf16.gmra.mxu1 %vm1264_vm11, %v5656_v36  ;;  %v5254_v36 = vrot.slane %v1647_v30, 9 }
  0xf6   : > { %5411 = vmatmul.msk.bf16.gmra.mxu0 %vm1264_vm11, %v2844_v37  ;;  %v5807_v37 = vld [vmem:[#allocation2 + $0x38] sm:$0x1] }
  0xf7   : > { %v1727_v40 = vrot.slane %v5807_v37, 5  ;;  %v1725_v59 = vsel %vm6556_vm14, %v5254_v36, %v1724_v61  ;;  %v5659_v37 = vld [vmem:[#allocation2 + $0x3c] sm:$0xff] }
  0xf8   : > { %v1823_v4 = vunpack.c.l.b16 %v1725_v59 }
  0xfa   : > { %5284 = vmatmul.msk.bf16.gmra.mxu2 %vm1264_vm11, %v1849_v15  ;;  %v2502_v15 = vrot.slane %v2500_v0, 5 }
  0xfc   : > { %v2507_v19 = vor.u32 %v2506_v16, %v2502_v15  ;;  %v2503_v44 = vsel %vm6151_vm10, %v2498_v20, %v2502_v15  ;;  %v5808_v15 = vld [vmem:[#allocation2 + $0x40] sm:$0xf]  ;;  %v2552_v20 = vshrl.u32 %v2386_v17, 16  ;;  %v2563_v17 = vshrl.u32 %v2388_v33, 16 }
  0xfd   : > { %v2817_v55 = vunpack.c.l.b16 %v2503_v44  ;;  %v1731_v16 = vrot.slane %v5808_v15, 5 }
  0xfe   : > { %v2508_v28 = vrot.slane %v2507_v19, 4  ;;  %v2565_v42 = vrot.slane %v2563_v17, 4 }
  0xff   : > { %5380 = vmatmul.msk.bf16.gmra.mxu3 %vm1264_vm11, %v5684_v60  ;;  %v1728_v60 = vsel %vm6556_vm14, %v1726_v39, %v1727_v40  ;;  %v6628_v3 = vpop.f32.mrf.mxu2  ;;  %v1733_v27 = vrot.slane %v1731_v16, 4  ;;  %v1732_v31 = vsel %vm6556_vm14, %v5255_v26, %v1731_v16  ;;  %v2387_v39 = vld [vmem:[#allocation2 + $0x50] sm:$0x1]  ;;  %v6652_v40 = vpop.f32.mrf.mxu0 }
 0x100   : > { %v2513_v46 = vsel %vm6151_vm10, %v2508_v28, %v2512_v29  ;;  %v1824_v0 = vunpack.c.l.b16 %v1728_v60  ;;  %v2820_v29 = vunpack.c.l.b16 %v2537_v5  ;;  %v1825_v44 = vunpack.c.l.b16 %v1732_v31  ;;  %v5811_v16 = vld [vmem:[#allocation2 + $0x50] sm:$0x1] }
 0x101   : > { %v2818_v58 = vunpack.c.l.b16 %v2513_v46  ;;  %v2558_v54 = vshll.u32 %v2387_v39, 16  ;;  %v2572_v5 = vshll.u32 %v2389_v41, 16 }
 0x102   : > { %v1851_v8 = vpack.c.b16 %v1824_v0, %v1823_v4  ;;  %v6631_v7 = vpop.f32.mrf.mxu3  ;;  %v1738_v4 = vrot.slane %v5810_v2, 5  ;;  %v1649_v0 = vld [vmem:[#allocation2 + $0x48] sm:$0xe]  ;;  %v1650_v2 = vld [vmem:[#allocation2 + $0x54] sm:$0xe] }
 0x103   : > { %v2846_v6 = vpack.c.b16 %v2818_v58, %v2817_v55  ;;  %v6641_v19 = vpop.f32.mrf.mxu1  ;;  %v5256_v11 = vrot.slane %v1649_v0, 9 }
 0x104   : > { %v1740_v15 = vrot.slane %v1738_v4, 4 }
 0x105   : > { %5237 = vmatmul.msk.bf16.gmra.mxu1 %vm1264_vm11, %v5657_v51  ;;  %v2385_v51 = vld [vmem:[#allocation2 + $0x48] sm:$0xf]  ;;  %v1739_v26 = vsel %vm6556_vm14, %v5256_v11, %v1738_v4 }
 0x106   : > { %5412 = vmatmul.msk.bf16.gmra.mxu0 %vm1264_vm11, %v2845_v18  ;;  %v2527_v18 = vsel %vm6151_vm10, %v2522_v56, %v2526_v45  ;;  %v2539_v25 = vshrl.u32 %v2385_v51, 16  ;;  %v2542_v52 = vshll.u32 %v2385_v51, 16  ;;  %v1741_v51 = vrot.slane %v5811_v16, 5 }
 0x107   : > { %v6643_v61 = vpop.f32.mrf.mxu2  ;;  %v2819_v28 = vunpack.c.l.b16 %v2527_v18  ;;  %v2566_v18 = vshll.u32 %v2388_v33, 16  ;;  %v1827_v31 = vunpack.c.l.b16 %v1739_v26 }
 0x108   : > { %v2541_v30 = vrot.slane %v2539_v25, 4  ;;  %v2544_v22 = vrot.slane %v2542_v52, 5 }
 0x109   : > { %v2847_v53 = vpack.c.b16 %v2820_v29, %v2819_v28  ;;  %v2574_v28 = vrot.slane %v2572_v5, 5 }
 0x10a   : > { %5285 = vmatmul.msk.bf16.gmra.mxu2 %vm1264_vm11, %v1850_v23  ;;  %v1734_v23 = vrot.slane %v5809_v21, 5  ;;  %v6650_v36 = vpop.f32.mrf.mxu3  ;;  %v2545_v48 = vor.u32 %v2544_v22, %v2541_v30  ;;  %v2576_v21 = vshrl.u32 %v2389_v41, 16  ;;  %v5660_v30 = vld [vmem:[#allocation2 + $0x48] sm:$0xff]  ;;  %v2390_v22 = vld [vmem:[#allocation2 + $0x5c] sm:$0x1] }
 0x10b   : > { %v6654_v55 = vpop.f32.mrf.mxu1 }
 0x10c   : > { %v1735_v32 = vsel %vm6556_vm14, %v1733_v27, %v1734_v23  ;;  %v2546_v60 = vrot.slane %v2545_v48, 4  ;;  %v1742_v27 = vsel %vm6556_vm14, %v1740_v15, %v1741_v51  ;;  %v2578_v29 = vrot.slane %v2576_v21, 4 }
 0x10d   : > { %v1826_v46 = vunpack.c.l.b16 %v1735_v32  ;;  %v1828_v32 = vunpack.c.l.b16 %v1742_v27  ;;  %v2393_v27 = vld [vmem:[#allocation2 + $0x68] sm:$0x1] }
 0x10f   : > { %5381 = vmatmul.msk.bf16.gmra.mxu3 %vm1264_vm11, %v5685_v35  ;;  %v2554_v35 = vrot.slane %v2552_v20, 4  ;;  %v6657_v58 = vpop.f32.mrf.mxu2  ;;  %v1852_v59 = vpack.c.b16 %v1826_v46, %v1825_v44  ;;  %v2568_v20 = vrot.slane %v2566_v18, 5  ;;  %v2582_v44 = vshll.u32 %v2390_v22, 16 }
 0x110   : > { %v6667_v62 = vpop.f32.mrf.mxu0  ;;  %v1853_v48 = vpack.c.b16 %v1828_v32, %v1827_v31  ;;  %v2606_v32 = vshll.u32 %v2393_v27, 16 }
 0x111   : > { %v2555_v45 = vor.u32 %v2554_v35, %v2550_v34  ;;  %v2569_v39 = vor.u32 %v2568_v20, %v2565_v42  ;;  %v5661_v20 = vld [vmem:[#allocation2 + $0x54] sm:$0xff] }
 0x113   : > { %v2556_v1 = vrot.slane %v2555_v45, 4  ;;  %v6663_v56 = vpop.f32.mrf.mxu3  ;;  %v1745_v45 = vrot.slane %v6510_v57, 5  ;;  %v1748_v57 = vrot.slane %v6516_v14, 5 }
 0x115   : > { %5238 = vmatmul.msk.bf16.gmra.mxu1 %vm1264_vm11, %v5658_v49  ;;  %v2560_v49 = vrot.slane %v2558_v54, 5  ;;  %v2392_v54 = vld [vmem:[#allocation2 + $0x64] sm:$0xf]  ;;  %v1747_v11 = vrot.slane %v1745_v45, 4 }
 0x116   : > { %5413 = vmatmul.msk.bf16.gmra.mxu0 %vm1264_vm11, %v2846_v6  ;;  %v2551_v6 = vsel %vm6151_vm10, %v2546_v60, %v2550_v34  ;;  %v2596_v41 = vshll.u32 %v2392_v54, 16 }
 0x117   : > { %v2561_v10 = vsel %vm6151_vm10, %v2556_v1, %v2560_v49  ;;  %v2821_v25 = vunpack.c.l.b16 %v2551_v6  ;;  %v2584_v1 = vrot.slane %v2582_v44, 5  ;;  %v2600_v6 = vshrl.u32 %v2392_v54, 16  ;;  %v5812_v54 = vld [vmem:[#allocation2 + $0x64] sm:$0xf] }
 0x118   : > { %v2822_v52 = vunpack.c.l.b16 %v2561_v10  ;;  %v6681_v46 = vpop.f32.mrf.mxu0  ;;  %v5257_v10 = vrot.slane %v1650_v2, 9  ;;  %v2598_v5 = vrot.slane %v2596_v41, 5  ;;  %v1749_v14 = vsel %vm6556_vm14, %v1747_v11, %v1748_v57  ;;  %v5707_v2 = vld [vmem:[#allocation5 + $0xa8] sm:$0xff]  ;;  %v2395_v41 = vld [vmem:[#allocation2 + $0x70] sm:$0xf] }
 0x119   : > { %v2602_v21 = vrot.slane %v2600_v6, 4  ;;  %v1830_v22 = vunpack.c.l.b16 %v1749_v14  ;;  %v5813_v6 = vld [vmem:[#allocation2 + $0x68] sm:$0x1]  ;;  %3363 = vmatpush.bf16.msra.mxu1 %v5707_v2  ;;  %v5735_v14 = vld [vmem:[#allocation5 + $0x108] sm:$0xff] }
 0x11a   : > { %5286 = vmatmul.msk.bf16.gmra.mxu2 %vm1264_vm11, %v1851_v8  ;;  %v5687_v8 = vld [vmem:[#allocation2 + $0x48] sm:$0xff]  ;;  %v2848_v34 = vpack.c.b16 %v2822_v52, %v2821_v25  ;;  %v1746_v26 = vsel %vm6556_vm14, %v5257_v10, %v1745_v45  ;;  %v2608_v45 = vrot.slane %v2606_v32, 5  ;;  %4786 = vmatpush.bf16.msra.mxu0 %v5735_v14 }
 0x11b   : > { %v6678_v35 = vpop.f32.mrf.mxu3  ;;  %v2603_v31 = vor.u32 %v2602_v21, %v2598_v5 }
 0x11f   : > { %5382 = vmatmul.msk.bf16.gmra.mxu3 %vm1264_vm11, %v5686_v43  ;;  %v6672_v43 = vpop.f32.mrf.mxu2 }
 0x120   : > { %v6669_v23 = vpop.f32.mrf.mxu1 }
 0x125   : > { %5239 = vmatmul.msk.bf16.gmra.mxu1 %vm1264_vm11, %v5659_v37  ;;  %v2579_v37 = vor.u32 %v2578_v29, %v2574_v28 }
 0x126   : > { %5414 = vmatmul.msk.bf16.gmra.mxu0 %vm1264_vm11, %v2847_v53  ;;  %v2391_v53 = vld [vmem:[#allocation2 + $0x60] sm:$0xf] }
 0x127   : > { %v2580_v60 = vrot.slane %v2579_v37, 4  ;;  %v2587_v0 = vshrl.u32 %v2391_v53, 16  ;;  %v2590_v33 = vshll.u32 %v2391_v53, 16  ;;  %v5727_v37 = vld [vmem:[#allocation5 + $0xc8] sm:$0xff]  ;;  %v2604_v53 = vrot.slane %v2603_v31, 4 }
 0x128   : > { %v6685_v49 = vpop.f32.mrf.mxu1  ;;  %3678 = vmatpush.bf16.msra.mxu2 %v5727_v37  ;;  %v2396_v37 = vld [vmem:[#allocation2 + $0x74] sm:$0x1] }
 0x129   : > { %v2585_v16 = vsel %vm6151_vm10, %v2580_v60, %v2584_v1  ;;  %v2589_v51 = vrot.slane %v2587_v0, 4  ;;  %v2592_v17 = vrot.slane %v2590_v33, 5  ;;  %v2394_v60 = vld [vmem:[#allocation2 + $0x6c] sm:$0xf]  ;;  %v5731_v1 = vld [vmem:[#allocation5 + $0xe8] sm:$0xff]  ;;  %v2609_v57 = vsel %vm6151_vm10, %v2604_v53, %v2608_v45 }
 0x12a   : > { %5287 = vmatmul.msk.bf16.gmra.mxu2 %vm1264_vm11, %v1852_v59  ;;  %v2570_v59 = vrot.slane %v2569_v39, 4  ;;  %v2824_v52 = vunpack.c.l.b16 %v2585_v16  ;;  %v1651_v33 = vld [vmem:[#allocation2 + $0x60] sm:$0xe]  ;;  %4360 = vmatpush.bf16.msra.mxu3 %v5731_v1  ;;  %v2611_v16 = vshrl.u32 %v2394_v60, 16 }
 0x12b   : > { %v5258_v21 = vrot.slane %v1651_v33, 9  ;;  %v2630_v33 = vshll.u32 %v2396_v37, 16 }
 0x12c   : > { %v2575_v15 = vsel %vm6151_vm10, %v2570_v59, %v2574_v28  ;;  %v2593_v28 = vor.u32 %v2592_v17, %v2589_v51  ;;  %v1752_v59 = vrot.slane %v5812_v54, 5  ;;  %v2614_v51 = vshll.u32 %v2394_v60, 16  ;;  %v5689_v17 = vld [vmem:[#allocation2 + $0x60] sm:$0xff] }
 0x12d   : > { %v6687_v4 = vpop.f32.mrf.mxu2  ;;  %v2823_v25 = vunpack.c.l.b16 %v2575_v15 }
 0x12f   : > { %5383 = vmatmul.msk.bf16.gmra.mxu3 %vm1264_vm11, %v5687_v8  ;;  %v5688_v8 = vld [vmem:[#allocation2 + $0x54] sm:$0xff] }
 0x131   : > { %v6695_v18 = vpop.f32.mrf.mxu3 }
 0x135   : > { %5240 = vmatmul.msk.bf16.gmra.mxu1 %vm1264_vm11, %v5660_v30  ;;  %v1829_v30 = vunpack.c.l.b16 %v1746_v26  ;;  %v6706_v39 = vpop.f32.mrf.mxu2  ;;  %v2624_v26 = vshrl.u32 %v2395_v41, 16 }
 0x136   : > { %5415 = vmatmul.msk.bf16.gmra.mxu0 %vm1264_vm11, %v2848_v34  ;;  %v6702_v42 = vpop.f32.mrf.mxu0  ;;  %v2849_v34 = vpack.c.b16 %v2824_v52, %v2823_v25  ;;  %v1754_v25 = vrot.slane %v1752_v59, 4  ;;  %v2620_v52 = vshll.u32 %v2395_v41, 16 }
 0x137   : > { %v1854_v44 = vpack.c.b16 %v1830_v22, %v1829_v30  ;;  %v2613_v30 = vrot.slane %v2611_v16, 4  ;;  %v2616_v22 = vrot.slane %v2614_v51, 5  ;;  %v5814_v16 = vld [vmem:[#allocation2 + $0x70] sm:$0xf] }
 0x138   : > { %v2622_v32 = vrot.slane %v2620_v52, 5  ;;  %v1759_v51 = vrot.slane %v5814_v16, 5  ;;  %v5815_v52 = vld [vmem:[#allocation2 + $0x74] sm:$0x1] }
 0x139   : > { %v6710_v0 = vpop.f32.mrf.mxu3  ;;  %v2617_v60 = vor.u32 %v2616_v22, %v2613_v30  ;;  %v5690_v30 = vld [vmem:[#allocation2 + $0x6c] sm:$0xff] }
 0x13a   : > { %5288 = vmatmul.msk.bf16.gmra.mxu2 %vm1264_vm11, %v1853_v48  ;;  %v2594_v48 = vrot.slane %v2593_v28, 4  ;;  %v2826_v28 = vunpack.c.l.b16 %v2609_v57  ;;  %v2632_v57 = vrot.slane %v2630_v33, 5 }
 0x13c   : > { %v2599_v11 = vsel %vm6151_vm10, %v2594_v48, %v2598_v5  ;;  %v1753_v5 = vsel %vm6556_vm14, %v5258_v21, %v1752_v59  ;;  %v2397_v21 = vld [vmem:[#allocation2 + $0x78] sm:$0xf] }
 0x13d   : > { %v1831_v45 = vunpack.c.l.b16 %v1753_v5 }
 0x13e   : > { %v6712_v10 = vpop.f32.mrf.mxu0 }
 0x13f   : > { %5384 = vmatmul.msk.bf16.gmra.mxu3 %vm1264_vm11, %v5688_v8  ;;  %v1755_v8 = vrot.slane %v5813_v6, 5 }
 0x141   : > { %v1756_v31 = vsel %vm6556_vm14, %v1754_v25, %v1755_v8  ;;  %v2618_v8 = vrot.slane %v2617_v60, 4  ;;  %v2398_v25 = vld [vmem:[#allocation2 + $0x7c] sm:$0xf] }
 0x142   : > { %v6704_v29 = vpop.f32.mrf.mxu1  ;;  %v1832_v54 = vunpack.c.l.b16 %v1756_v31  ;;  %v1761_v31 = vrot.slane %v1759_v51, 4  ;;  %v2648_v60 = vshrl.u32 %v2398_v25, 16 }
 0x144   : > { %v1855_v59 = vpack.c.b16 %v1832_v54, %v1831_v45  ;;  %v2638_v45 = vshll.u32 %v2397_v21, 16  ;;  %v2644_v54 = vshll.u32 %v2398_v25, 16 }
 0x145   : > { %5241 = vmatmul.msk.bf16.gmra.mxu1 %vm1264_vm11, %v5661_v20  ;;  %v2825_v20 = vunpack.c.l.b16 %v2599_v11 }
 0x146   : > { %5416 = vmatmul.msk.bf16.gmra.mxu0 %vm1264_vm11, %v2849_v34  ;;  %v2626_v34 = vrot.slane %v2624_v26, 4  ;;  %v1762_v26 = vrot.slane %v5815_v52, 5  ;;  %v2646_v16 = vrot.slane %v2644_v54, 5  ;;  %v5816_v54 = vld [vmem:[#allocation2 + $0x7c] sm:$0xf] }
 0x147   : > { %v2850_v1 = vpack.c.b16 %v2826_v28, %v2825_v20  ;;  %v2623_v20 = vsel %vm6151_vm10, %v2618_v8, %v2622_v32 }
 0x148   : > { %v2627_v2 = vor.u32 %v2626_v34, %v2622_v32  ;;  %v2635_v34 = vshrl.u32 %v2397_v21, 16  ;;  %v2827_v32 = vunpack.c.l.b16 %v2623_v20  ;;  %v1763_v8 = vsel %vm6556_vm14, %v1761_v31, %v1762_v26 }
 0x14a   : > { %5289 = vmatmul.msk.bf16.gmra.mxu2 %vm1264_vm11, %v1854_v44  ;;  %v6719_v15 = vpop.f32.mrf.mxu1  ;;  %v5662_v44 = vld [vmem:[#allocation2 + $0x60] sm:$0xff]  ;;  %v2628_v11 = vrot.slane %v2627_v2, 4 }
 0x14c   : > { %v2633_v22 = vsel %vm6151_vm10, %v2628_v11, %v2632_v57  ;;  %v2637_v11 = vrot.slane %v2635_v34, 4  ;;  %v2640_v57 = vrot.slane %v2638_v45, 5  ;;  %v2400_v45 = vld [vmem:[#allocation2 + $0x84] sm:$0xf] }
 0x14d   : > { %v6721_v27 = vpop.f32.mrf.mxu2  ;;  %v2828_v33 = vunpack.c.l.b16 %v2633_v22 }
 0x14f   : > { %5385 = vmatmul.msk.bf16.gmra.mxu3 %vm1264_vm11, %v5689_v17  ;;  %v1652_v17 = vld [vmem:[#allocation2 + $0x6c] sm:$0xe] }
 0x150   : > { %v5259_v5 = vrot.slane %v1652_v17, 9  ;;  %v2650_v17 = vrot.slane %v2648_v60, 4  ;;  %v1766_v60 = vrot.slane %v5816_v54, 5 }
 0x152   : > { %v6728_v48 = vpop.f32.mrf.mxu3  ;;  %v1563_v53 = vpop.f32.mrf.mxu1 }
 0x153   : > { %7549 = vst [vmem:[#allocation9_spill] sm:$0xff] %v6728_v48  ;;  %v6730_v41 = vpop.f32.mrf.mxu0 }
 0x155   : > { %v6732_v6 = vpop.f32.mrf.mxu2  ;;  %5242 = vmatmul.msk.bf16.gmra.mxu1 %vm1264_vm11, %v5662_v44  ;;  %v1564_v44 = vadd.f32 %v1563_v53, %v6634_v47  ;;  %v5663_v47 = vld [vmem:[#allocation2 + $0x6c] sm:$0xff]  ;;  %v2399_v53 = vld [vmem:[#allocation2 + $0x80] sm:$0x1] }
 0x156   : > { %5417 = vmatmul.msk.bf16.gmra.mxu0 %vm1264_vm11, %v2850_v1 }
 0x15a   : > { %v6736_v14 = vpop.f32.mrf.mxu3  ;;  %5290 = vmatmul.msk.bf16.gmra.mxu2 %vm1264_vm11, %v1855_v59  ;;  %v1565_v28 = vpop.f32.mrf.mxu1  ;;  %v1760_v59 = vsel %vm6556_vm14, %v5259_v5, %v1759_v51  ;;  %v2651_v51 = vor.u32 %v2650_v17, %v2646_v16  ;;  %v2654_v5 = vshll.u32 %v2399_v53, 16 }
 0x15b   : > { %7550 = vst [vmem:[#allocation10_spill] sm:$0xff] %v6736_v14  ;;  %v6743_v37 = vpop.f32.mrf.mxu0  ;;  %v1833_v52 = vunpack.c.l.b16 %v1760_v59  ;;  %v1566_v22 = vadd.f32 %v1565_v28, %v6652_v40  ;;  %v2641_v14 = vor.u32 %v2640_v57, %v2637_v11  ;;  %v1653_v40 = vld [vmem:[#allocation2 + $0x78] sm:$0xe]  ;;  %v2659_v28 = vshrl.u32 %v2400_v45, 16 }
 0x15c   : > { %v2656_v59 = vrot.slane %v2654_v5, 5 }
 0x15d   : > { %v1944_v1 = vpop.f32.mrf.mxu2  ;;  %v2661_v5 = vrot.slane %v2659_v28, 4 }
 0x15e   : > { %v2024_v2 = vadd.f32 %v1944_v1, %v1564_v44  ;;  %v1834_v44 = vunpack.c.l.b16 %v1763_v8  ;;  %v2851_v1 = vpack.c.b16 %v2828_v33, %v2827_v32  ;;  %v2401_v32 = vld [vmem:[#allocation2 + $0x88] sm:$0xf]  ;;  %v2652_v33 = vrot.slane %v2651_v51, 4 }
 0x15f   : > { %5386 = vmatmul.msk.bf16.gmra.mxu3 %vm1264_vm11, %v5690_v30  ;;  %v2662_v8 = vshll.u32 %v2400_v45, 16  ;;  %v2668_v17 = vshll.u32 %v2401_v32, 16 }
 0x160   : > { %v1856_v34 = vpack.c.b16 %v1834_v44, %v1833_v52  ;;  %v5691_v52 = vld [vmem:[#allocation2 + $0x78] sm:$0xff]  ;;  %v5260_v44 = vrot.slane %v1653_v40, 9 }
 0x162   : > { %v2258_v21 = vpop.f32.mrf.mxu3  ;;  %v1568_v25 = vpop.f32.mrf.mxu1 }
 0x163   : > { %v2338_v30 = vadd.f32 %v2258_v21, %v2024_v2  ;;  %v2940_v20 = vpop.f32.mrf.mxu0  ;;  %v2642_v2 = vrot.slane %v2641_v14, 4  ;;  %v1569_v14 = vadd.f32 %v1568_v25, %v6667_v62  ;;  %v1767_v62 = vsel %vm6556_vm14, %v5260_v44, %v1766_v60  ;;  %v2402_v25 = vld [vmem:[#allocation2 + $0x8c] sm:$0x1] }
 0x165   : > { %v1946_v48 = vpop.f32.mrf.mxu2  ;;  %5243 = vmatmul.msk.bf16.gmra.mxu1 %vm1264_vm11, %v5663_v47  ;;  %v6753_v26 = vadd.f32 %v2940_v20, %v2338_v30  ;;  %v2672_v47 = vshrl.u32 %v2401_v32, 16  ;;  %v2647_v20 = vsel %vm6151_vm10, %v2642_v2, %v2646_v16  ;;  %v2670_v32 = vrot.slane %v2668_v17, 5  ;;  %v5664_v2 = vld [vmem:[#allocation2 + $0x78] sm:$0xff] }
 0x166   : > { %v2025_v31 = vadd.f32 %v1946_v48, %v1566_v22  ;;  %5418 = vmatmul.msk.bf16.gmra.mxu0 %vm1264_vm11, %v2851_v1  ;;  %v5817_v48 = vld [vmem:[#allocation2 + $0x80] sm:$0x1]  ;;  %v1768_v1 = vrot.slane %v1766_v60, 4  ;;  %v2657_v22 = vsel %vm6151_vm10, %v2652_v33, %v2656_v59  ;;  %v2829_v40 = vunpack.c.l.b16 %v2647_v20 }
 0x167   : > { %v1769_v53 = vrot.slane %v5817_v48, 5  ;;  %v2678_v17 = vshll.u32 %v2402_v25, 16 }
 0x169   : > { %v1770_v16 = vsel %vm6556_vm14, %v1768_v1, %v1769_v53 }
 0x16a   : > { %v2260_v11 = vpop.f32.mrf.mxu3  ;;  %5291 = vmatmul.msk.bf16.gmra.mxu2 %vm1264_vm11, %v1856_v34  ;;  %v1570_v57 = vpop.f32.mrf.mxu1  ;;  %v2664_v34 = vrot.slane %v2662_v8, 5  ;;  %v1835_v8 = vunpack.c.l.b16 %v1767_v62  ;;  %v1836_v48 = vunpack.c.l.b16 %v1770_v16 }
 0x16b   : > { %v2339_v21 = vadd.f32 %v2260_v11, %v2025_v31  ;;  %v2942_v30 = vpop.f32.mrf.mxu0  ;;  %v2674_v31 = vrot.slane %v2672_v47, 4  ;;  %v2830_v11 = vunpack.c.l.b16 %v2657_v22  ;;  %v1571_v20 = vadd.f32 %v1570_v57, %v6681_v46 }
 0x16c   : > { %v2665_v33 = vor.u32 %v2664_v34, %v2661_v5  ;;  %v1857_v22 = vpack.c.b16 %v1836_v48, %v1835_v8  ;;  %v2680_v5 = vrot.slane %v2678_v17, 5  ;;  %v5818_v34 = vld [vmem:[#allocation2 + $0x88] sm:$0xf] }
 0x16d   : > { %v1949_v51 = vpop.f32.mrf.mxu2  ;;  %v6762_v45 = vadd.f32 %v2942_v30, %v2339_v21  ;;  %v2675_v21 = vor.u32 %v2674_v31, %v2670_v32  ;;  %v2852_v47 = vpack.c.b16 %v2830_v11, %v2829_v40  ;;  %v1773_v31 = vrot.slane %v5818_v34, 5  ;;  %v2403_v40 = vld [vmem:[#allocation2 + $0x90] sm:$0xf]  ;;  %v5819_v11 = vld [vmem:[#allocation2 + $0x8c] sm:$0x1] }
 0x16e   : > { %v2026_v54 = vadd.f32 %v1949_v51, %v1569_v14  ;;  %v2666_v53 = vrot.slane %v2665_v33, 4  ;;  %v1776_v62 = vrot.slane %v5819_v11, 5  ;;  %v5692_v33 = vld [vmem:[#allocation2 + $0x84] sm:$0xff]  ;;  %v2686_v17 = vshll.u32 %v2403_v40, 16 }
 0x16f   : > { %5387 = vmatmul.msk.bf16.gmra.mxu3 %vm1264_vm11, %v5691_v52  ;;  %v2676_v51 = vrot.slane %v2675_v21, 4  ;;  %v1775_v8 = vrot.slane %v1773_v31, 4  ;;  %v2683_v21 = vshrl.u32 %v2403_v40, 16  ;;  %v2405_v40 = vld [vmem:[#allocation2 + $0x98] sm:$0x1] }
 0x170   : > { %v2671_v57 = vsel %vm6151_vm10, %v2666_v53, %v2670_v32 }
 0x171   : > { %v2681_v16 = vsel %vm6151_vm10, %v2676_v51, %v2680_v5  ;;  %v2831_v32 = vunpack.c.l.b16 %v2671_v57  ;;  %v2688_v51 = vrot.slane %v2686_v17, 5 }
 0x172   : > { %v2263_v59 = vpop.f32.mrf.mxu3  ;;  %v1573_v28 = vpop.f32.mrf.mxu1  ;;  %v2832_v53 = vunpack.c.l.b16 %v2681_v16 }
 0x173   : > { %v2340_v30 = vadd.f32 %v2263_v59, %v2026_v54  ;;  %v1574_v52 = vadd.f32 %v1573_v28, %v6702_v42  ;;  %v2945_v14 = vpop.f32.mrf.mxu0  ;;  %v1654_v54 = vld [vmem:[#allocation2 + $0x84] sm:$0xe]  ;;  %v2404_v42 = vld [vmem:[#allocation2 + $0x94] sm:$0xf] }
 0x174   : > { %v5261_v28 = vrot.slane %v1654_v54, 9  ;;  %v5665_v54 = vld [vmem:[#allocation2 + $0x84] sm:$0xff] }
 0x175   : > { %v1951_v60 = vpop.f32.mrf.mxu2  ;;  %5244 = vmatmul.msk.bf16.gmra.mxu1 %vm1264_vm11, %v5664_v2  ;;  %v6772_v44 = vadd.f32 %v2945_v14, %v2340_v30  ;;  %v2696_v30 = vshrl.u32 %v2404_v42, 16 }
 0x176   : > { %v2027_v1 = vadd.f32 %v1951_v60, %v1571_v20  ;;  %5419 = vmatmul.msk.bf16.gmra.mxu0 %vm1264_vm11, %v2852_v47  ;;  %v2692_v47 = vshll.u32 %v2404_v42, 16 }
 0x177   : > { %v2698_v34 = vrot.slane %v2696_v30, 4  ;;  %v2407_v30 = vld [vmem:[#allocation2 + $0xa0] sm:$0xf] }
 0x178   : > { %v2694_v5 = vrot.slane %v2692_v47, 5 }
 0x17a   : > { %v2265_v46 = vpop.f32.mrf.mxu3  ;;  %5292 = vmatmul.msk.bf16.gmra.mxu2 %vm1264_vm11, %v1857_v22  ;;  %v1575_v25 = vpop.f32.mrf.mxu1  ;;  %v2685_v22 = vrot.slane %v2683_v21, 4 }
 0x17b   : > { %v2341_v2 = vadd.f32 %v2265_v46, %v2027_v1  ;;  %v1576_v59 = vadd.f32 %v1575_v25, %v6712_v10  ;;  %v2947_v48 = vpop.f32.mrf.mxu0  ;;  %v1774_v1 = vsel %vm6556_vm14, %v5261_v28, %v1773_v31  ;;  %v1777_v10 = vsel %vm6556_vm14, %v1775_v8, %v1776_v62  ;;  %v2406_v8 = vld [vmem:[#allocation2 + $0x9c] sm:$0xf] }
 0x17c   : > { %v1837_v46 = vunpack.c.l.b16 %v1774_v1  ;;  %v2853_v25 = vpack.c.b16 %v2832_v53, %v2831_v32  ;;  %v2699_v31 = vor.u32 %v2698_v34, %v2694_v5  ;;  %v2702_v28 = vshll.u32 %v2405_v40, 16  ;;  %v5706_v32 = vld [vmem:[#allocation5 + $0xa0] sm:$0xff] }
 0x17d   : > { %v1954_v14 = vpop.f32.mrf.mxu2  ;;  %v6781_v20 = vadd.f32 %v2947_v48, %v2341_v2  ;;  %v5726_v48 = vld [vmem:[#allocation5 + $0xc0] sm:$0xff]  ;;  %v2710_v34 = vshll.u32 %v2406_v8, 16  ;;  %v2720_v40 = vshrl.u32 %v2407_v30, 16  ;;  %3364 = vmatpush.bf16.msra.mxu1 %v5706_v32 }
 0x17e   : > { %v2028_v60 = vadd.f32 %v1954_v14, %v1574_v52  ;;  %v1838_v52 = vunpack.c.l.b16 %v1777_v10  ;;  %3679 = vmatpush.bf16.msra.mxu2 %v5726_v48  ;;  %v5820_v14 = vld [vmem:[#allocation2 + $0x94] sm:$0xf]  ;;  %v2700_v1 = vrot.slane %v2699_v31, 4  ;;  %v2704_v10 = vrot.slane %v2702_v28, 5 }
 0x17f   : > { %5388 = vmatmul.msk.bf16.gmra.mxu3 %vm1264_vm11, %v5692_v33  ;;  %v2689_v33 = vor.u32 %v2688_v51, %v2685_v22  ;;  %v1655_v22 = vld [vmem:[#allocation2 + $0x90] sm:$0xe]  ;;  %v2707_v51 = vshrl.u32 %v2406_v8, 16  ;;  %v5734_v8 = vld [vmem:[#allocation5 + $0x100] sm:$0xff] }
 0x180   : > { %v1858_v47 = vpack.c.b16 %v1838_v52, %v1837_v46  ;;  %v2705_v48 = vsel %vm6151_vm10, %v2700_v1, %v2704_v10  ;;  %4787 = vmatpush.bf16.msra.mxu0 %v5734_v8  ;;  %v2408_v1 = vld [vmem:[#allocation2 + $0xa4] sm:$0x1]  ;;  %v5666_v10 = vld [vmem:[#allocation2 + $0x90] sm:$0xff] }
 0x181   : > { %v2690_v53 = vrot.slane %v2689_v33, 4 }
 0x182   : > { %v2268_v42 = vpop.f32.mrf.mxu3  ;;  %v1578_v11 = vpop.f32.mrf.mxu1 }
 0x183   : > { %v2342_v2 = vadd.f32 %v2268_v42, %v2028_v60  ;;  %v1579_v57 = vadd.f32 %v1578_v11, %v6730_v41  ;;  %v2950_v16 = vpop.f32.mrf.mxu0  ;;  %v1780_v60 = vrot.slane %v5820_v14, 5  ;;  %v5730_v41 = vld [vmem:[#allocation5 + $0xe0] sm:$0xff]  ;;  %v2695_v28 = vsel %vm6151_vm10, %v2690_v53, %v2694_v5 }
 0x184   : > { %4361 = vmatpush.bf16.msra.mxu3 %v5730_v41  ;;  %v2712_v14 = vrot.slane %v2710_v34, 5 }
 0x185   : > { %v1956_v62 = vpop.f32.mrf.mxu2  ;;  %5245 = vmatmul.msk.bf16.gmra.mxu1 %vm1264_vm11, %v5665_v54  ;;  %v6790_v21 = vadd.f32 %v2950_v16, %v2342_v2  ;;  %v2716_v54 = vshll.u32 %v2407_v30, 16  ;;  %v5262_v16 = vrot.slane %v1655_v22, 9  ;;  %v1782_v33 = vrot.slane %v1780_v60, 4 }
 0x186   : > { %v2029_v17 = vadd.f32 %v1956_v62, %v1576_v59  ;;  %5420 = vmatmul.msk.bf16.gmra.mxu0 %vm1264_vm11, %v2853_v25  ;;  %v5821_v59 = vld [vmem:[#allocation2 + $0x98] sm:$0x1]  ;;  %v5693_v25 = vld [vmem:[#allocation2 + $0x90] sm:$0xff]  ;;  %v2709_v62 = vrot.slane %v2707_v51, 4  ;;  %v2834_v22 = vunpack.c.l.b16 %v2705_v48 }
 0x187   : > { %7551 = vst [vmem:[#allocation11_spill] sm:$0xff] %v6790_v21  ;;  %v1783_v42 = vrot.slane %v5821_v59, 5  ;;  %v2718_v41 = vrot.slane %v2716_v54, 5  ;;  %v1781_v5 = vsel %vm6556_vm14, %v5262_v16, %v1780_v60 }
 0x188   : > { %v2713_v51 = vor.u32 %v2712_v14, %v2709_v62  ;;  %v1839_v59 = vunpack.c.l.b16 %v1781_v5  ;;  %v5822_v62 = vld [vmem:[#allocation2 + $0xa0] sm:$0xf]  ;;  %v1656_v14 = vld [vmem:[#allocation2 + $0x9c] sm:$0xe] }
 0x189   : > { %v1784_v53 = vsel %vm6556_vm14, %v1782_v33, %v1783_v42  ;;  %v1787_v8 = vrot.slane %v5822_v62, 5 }
 0x18a   : > { %v2270_v11 = vpop.f32.mrf.mxu3  ;;  %5293 = vmatmul.msk.bf16.gmra.mxu2 %vm1264_vm11, %v1858_v47  ;;  %v1580_v46 = vpop.f32.mrf.mxu1  ;;  %v2722_v47 = vrot.slane %v2720_v40, 4 }
 0x18b   : > { %v2343_v52 = vadd.f32 %v2270_v11, %v2029_v17  ;;  %v1581_v2 = vadd.f32 %v1580_v46, %v6743_v37  ;;  %v2952_v31 = vpop.f32.mrf.mxu0  ;;  %v2833_v37 = vunpack.c.l.b16 %v2695_v28  ;;  %v1840_v11 = vunpack.c.l.b16 %v1784_v53 }
 0x18c   : > { %v2723_v34 = vor.u32 %v2722_v47, %v2718_v41  ;;  %v2714_v28 = vrot.slane %v2713_v51, 4  ;;  %v2410_v47 = vld [vmem:[#allocation2 + $0xac] sm:$0xf]  ;;  %v1789_v51 = vrot.slane %v1787_v8, 4 }
 0x18d   : > { %v1959_v30 = vpop.f32.mrf.mxu2  ;;  %v6799_v32 = vadd.f32 %v2952_v31, %v2343_v52  ;;  %v2854_v46 = vpack.c.b16 %v2834_v22, %v2833_v37  ;;  %v1859_v33 = vpack.c.b16 %v1840_v11, %v1839_v59  ;;  %v5694_v11 = vld [vmem:[#allocation2 + $0x9c] sm:$0xff] }
 0x18e   : > { %v2030_v17 = vadd.f32 %v1959_v30, %v1579_v57  ;;  %v2726_v57 = vshll.u32 %v2408_v1, 16  ;;  %v2724_v60 = vrot.slane %v2723_v34, 4  ;;  %v2409_v30 = vld [vmem:[#allocation2 + $0xa8] sm:$0xf]  ;;  %v2719_v22 = vsel %vm6151_vm10, %v2714_v28, %v2718_v41 }
 0x18f   : > { %7552 = vst [vmem:[#allocation12_spill] sm:$0xff] %v6799_v32  ;;  %5389 = vmatmul.msk.bf16.gmra.mxu3 %vm1264_vm11, %v5693_v25  ;;  %v2731_v5 = vshrl.u32 %v2409_v30, 16  ;;  %v2734_v34 = vshll.u32 %v2409_v30, 16 }
 0x190   : > { %v2728_v48 = vrot.slane %v2726_v57, 5  ;;  %v2740_v57 = vshll.u32 %v2410_v47, 16 }
 0x191   : > { %v2733_v62 = vrot.slane %v2731_v5, 4  ;;  %v5667_v5 = vld [vmem:[#allocation2 + $0x9c] sm:$0xff] }
 0x192   : > { %v2273_v54 = vpop.f32.mrf.mxu3  ;;  %v1583_v40 = vpop.f32.mrf.mxu1 }
 0x193   : > { %v2344_v52 = vadd.f32 %v2273_v54, %v2030_v17  ;;  %v2955_v25 = vpop.f32.mrf.mxu0  ;;  %v5823_v17 = vld [vmem:[#allocation2 + $0xa4] sm:$0x1]  ;;  %v297_v54 = vld [vmem:[%s6068_s6 + $0x78] sm:$0xf]  ;;  %v1584_v41 = vadd.f32 %v1583_v40, %v6613_v24 }
 0x194   : > { %v1790_v37 = vrot.slane %v5823_v17, 5  ;;  %v298_v17 = vld [vmem:[%s6068_s6 + $0x7c] sm:$0xf]  ;;  %v561_v40 = vshll.u32 %v297_v54, 16 }
 0x195   : > { %v1961_v31 = vpop.f32.mrf.mxu2  ;;  %5246 = vmatmul.msk.bf16.gmra.mxu1 %vm1264_vm11, %v5666_v10  ;;  %v6807_v16 = vadd.f32 %v2955_v25, %v2344_v52  ;;  %v5263_v10 = vrot.slane %v1656_v14, 9  ;;  %v558_v52 = vshrl.u32 %v297_v54, 16 }
 0x196   : > { %v2031_v42 = vadd.f32 %v1961_v31, %v1581_v2  ;;  %5421 = vmatmul.msk.bf16.gmra.mxu0 %vm1264_vm11, %v2854_v46  ;;  %v2729_v2 = vsel %vm6151_vm10, %v2724_v60, %v2728_v48  ;;  %v2744_v46 = vshrl.u32 %v2410_v47, 16  ;;  %v2835_v31 = vunpack.c.l.b16 %v2719_v22 }
 0x197   : > { %7553 = vst [vmem:[#allocation13_spill] sm:$0xff] %v6807_v16  ;;  %v2836_v28 = vunpack.c.l.b16 %v2729_v2  ;;  %v1788_v30 = vsel %vm6556_vm14, %v5263_v10, %v1787_v8  ;;  %v560_v14 = vrot.slane %v558_v52, 7  ;;  %v2736_v47 = vrot.slane %v2734_v34, 5 }
 0x198   : > { %v2746_v24 = vrot.slane %v2744_v46, 4  ;;  %v566_v22 = vshrl.u32 %v298_v17, 16  ;;  %v1841_v2 = vunpack.c.l.b16 %v1788_v30  ;;  %v569_v16 = vshll.u32 %v298_v17, 16 }
 0x199   : > { %v564_v8 = vrot.slane %v560_v14, 4 }
 0x19a   : > { %v2275_v53 = vpop.f32.mrf.mxu3  ;;  %5294 = vmatmul.msk.bf16.gmra.mxu2 %vm1264_vm11, %v1859_v33  ;;  %v1585_v1 = vpop.f32.mrf.mxu1  ;;  %v568_v10 = vrot.slane %v566_v22, 7 }
 0x19b   : > { %v2345_v59 = vadd.f32 %v2275_v53, %v2031_v42  ;;  %v2957_v25 = vpop.f32.mrf.mxu0  ;;  %v1791_v42 = vsel %vm6556_vm14, %v1789_v51, %v1790_v37  ;;  %v6825_v53 = vrot.slane %v2740_v57, 5  ;;  %v733_v37 = vld [vmem:[#allocation2 + $0xc0] sm:$0xf]  ;;  %v2855_v51 = vpack.c.b16 %v2836_v28, %v2835_v31 }
 0x19c   : > { %v1586_v54 = vadd.f32 %v1585_v1, %v6626_v50  ;;  %v571_v32 = vor.u32 %v569_v16, %v568_v10  ;;  %v573_v30 = vrot.slane %v568_v10, 4  ;;  %v5824_v1 = vld [vmem:[#allocation2 + $0xac] sm:$0xf] }
 0x19d   : > { %v1964_v33 = vpop.f32.mrf.mxu2  ;;  %v6818_v60 = vadd.f32 %v2957_v25, %v2345_v59  ;;  %v1842_v59 = vunpack.c.l.b16 %v1791_v42  ;;  %v2411_v25 = vld [vmem:[#allocation2 + $0xb0] sm:$0x1]  ;;  %v2747_v34 = vor.u32 %v2746_v24, %v6825_v53  ;;  %v737_v42 = vld [vmem:[#allocation2 + $0xc8] sm:$0x1]  ;;  %v2413_v24 = vld [vmem:[#allocation2 + $0xb8] sm:$0xf] }
 0x19e   : > { %v2032_v48 = vadd.f32 %v1964_v33, %v1584_v41  ;;  %v2750_v46 = vshll.u32 %v2411_v25, 16  ;;  %v738_v50 = vsel %vm6110_vm7, %v573_v30, %v737_v42  ;;  %v2764_v13 = vshll.u32 %v2413_v24, 16 }
 0x19f   : > { %7554 = vst [vmem:[#allocation14_spill] sm:$0xff] %v6818_v60  ;;  %5390 = vmatmul.msk.bf16.gmra.mxu3 %vm1264_vm11, %v5694_v11  ;;  %v563_v60 = vor.u32 %v561_v40, %v560_v14  ;;  %v2737_v11 = vor.u32 %v2736_v47, %v2733_v62  ;;  %v1860_v28 = vpack.c.b16 %v1842_v59, %v1841_v2  ;;  %v2412_v62 = vld [vmem:[#allocation2 + $0xb4] sm:$0xf]  ;;  %v1794_v47 = vrot.slane %v5824_v1, 5  ;;  %v5825_v2 = vld [vmem:[#allocation2 + $0xb0] sm:$0x1] }
 0x1a0   : > { %v2748_v12 = vrot.slane %v2747_v34, 4  ;;  %739 = vst [vmem:[#allocation2 + $0xc8] sm:$0x1] %v738_v50  ;;  %v2755_v40 = vshrl.u32 %v2412_v62, 16  ;;  %v2758_v22 = vshll.u32 %v2412_v62, 16  ;;  %v1797_v59 = vrot.slane %v5825_v2, 5 }
 0x1a1   : > { %v734_v14 = vsel %vm6102_vm6, %v563_v60, %v733_v37  ;;  %v2738_v16 = vrot.slane %v2737_v11, 4  ;;  %v2752_v60 = vrot.slane %v2750_v46, 5  ;;  %v1796_v10 = vrot.slane %v1794_v47, 4  ;;  %v5668_v62 = vld [vmem:[#allocation2 + $0xa8] sm:$0xff] }
 0x1a2   : > { %v2278_v41 = vpop.f32.mrf.mxu3  ;;  %v1588_v33 = vpop.f32.mrf.mxu1  ;;  %735 = vst [vmem:[#allocation2 + $0xc0] sm:$0xf] %v734_v14  ;;  %v2766_v42 = vrot.slane %v2764_v13, 5 }
 0x1a3   : > { %v2346_v52 = vadd.f32 %v2278_v41, %v2032_v48  ;;  %v2960_v57 = vpop.f32.mrf.mxu0  ;;  %v572_v48 = vsel %vm6095_vm5, %v564_v8, %v571_v32  ;;  %v5695_v41 = vld [vmem:[#allocation2 + $0xa8] sm:$0xff]  ;;  %v2753_v11 = vsel %vm6151_vm10, %v2748_v12, %v2752_v60 }
 0x1a4   : > { %736 = vst.msk [vmem:[#allocation2 + $0xc4] sm:$0xf] %vm211_vm0, %v572_v48 }
 0x1a5   : > { %v1966_v21 = vpop.f32.mrf.mxu2  ;;  %5247 = vmatmul.msk.bf16.gmra.mxu1 %vm1264_vm11, %v5667_v5  ;;  %v6832_v17 = vadd.f32 %v2960_v57, %v2346_v52  ;;  %v2768_v5 = vshrl.u32 %v2413_v24, 16  ;;  %v2743_v52 = vsel %vm6151_vm10, %v2738_v16, %v6825_v53  ;;  %v2757_v57 = vrot.slane %v2755_v40, 4 }
 0x1a6   : > { %v2033_v31 = vadd.f32 %v1966_v21, %v1586_v54  ;;  %5422 = vmatmul.msk.bf16.gmra.mxu0 %vm1264_vm11, %v2855_v51  ;;  %v1657_v21 = vld [vmem:[#allocation2 + $0xa8] sm:$0xe]  ;;  %v1589_v51 = vadd.f32 %v1588_v33, %v6641_v19  ;;  %v2760_v54 = vrot.slane %v2758_v22, 5  ;;  %v1798_v53 = vsel %vm6556_vm14, %v1796_v10, %v1797_v59  ;;  %v2414_v33 = vld [vmem:[#allocation2 + $0xbc] sm:$0x1] }
 0x1a7   : > { %v5264_v8 = vrot.slane %v1657_v21, 9  ;;  %v2770_v14 = vrot.slane %v2768_v5, 4  ;;  %v1844_v24 = vunpack.c.l.b16 %v1798_v53  ;;  %v2774_v60 = vshll.u32 %v2414_v33, 16  ;;  %v5826_v10 = vld [vmem:[#allocation2 + $0xb8] sm:$0xf] }
 0x1a8   : > { %v2761_v48 = vor.u32 %v2760_v54, %v2757_v57  ;;  %v5696_v33 = vld [vmem:[#allocation2 + $0xb4] sm:$0xff] }
 0x1a9   : > { %v1795_v19 = vsel %vm6556_vm14, %v5264_v8, %v1794_v47  ;;  %v2771_v12 = vor.u32 %v2770_v14, %v2766_v42  ;;  %v1658_v8 = vld [vmem:[#allocation2 + $0xb4] sm:$0xe] }
 0x1aa   : > { %v2280_v9 = vpop.f32.mrf.mxu3  ;;  %5295 = vmatmul.msk.bf16.gmra.mxu2 %vm1264_vm11, %v1860_v28  ;;  %v1590_v32 = vpop.f32.mrf.mxu1  ;;  %v2838_v28 = vunpack.c.l.b16 %v2753_v11  ;;  %v1843_v1 = vunpack.c.l.b16 %v1795_v19  ;;  %v2762_v47 = vrot.slane %v2761_v48, 4 }
 0x1ab   : > { %v2347_v25 = vadd.f32 %v2280_v9, %v2033_v31  ;;  %v2962_v37 = vpop.f32.mrf.mxu0  ;;  %v2837_v31 = vunpack.c.l.b16 %v2743_v52  ;;  %v1591_v9 = vadd.f32 %v1590_v32, %v6654_v55  ;;  %v5827_v52 = vld [vmem:[#allocation2 + $0x10] sm:$0xf]  ;;  %v5828_v55 = vld [vmem:[#allocation2 + $0xbc] sm:$0x1] }
 0x1ac   : > { %v1861_v59 = vpack.c.b16 %v1844_v24, %v1843_v1  ;;  %v3118_v11 = vrot.slane %v5827_v52, 5  ;;  %v1804_v32 = vrot.slane %v5828_v55, 5  ;;  %v2767_v57 = vsel %vm6151_vm10, %v2762_v47, %v2766_v42  ;;  %v5829_v24 = vld [vmem:[#allocation2 + $0x14] sm:$0x1] }
 0x1ad   : > { %v1969_v34 = vpop.f32.mrf.mxu2  ;;  %v6847_v46 = vadd.f32 %v2962_v37, %v2347_v25  ;;  %v2856_v21 = vpack.c.b16 %v2838_v28, %v2837_v31  ;;  %v2772_v25 = vrot.slane %v2771_v12, 4  ;;  %v1801_v37 = vrot.slane %v5826_v10, 5  ;;  %v2417_v10 = vld [vmem:[#allocation2 + $0xc8] sm:$0x1] }
 0x1ae   : > { %v2034_v30 = vadd.f32 %v1969_v34, %v1589_v51  ;;  %v2415_v51 = vld [vmem:[#allocation2 + $0xc0] sm:$0xf]  ;;  %v2416_v34 = vld [vmem:[#allocation2 + $0xc4] sm:$0xf]  ;;  %v5265_v31 = vrot.slane %v1658_v8, 9  ;;  %v3120_v1 = vrot.slane %v3118_v11, 4 }
 0x1af   : > { %5391 = vmatmul.msk.bf16.gmra.mxu3 %vm1264_vm11, %v5695_v41  ;;  %v2776_v41 = vrot.slane %v2774_v60, 5  ;;  %v2779_v28 = vshrl.u32 %v2415_v51, 16  ;;  %v2782_v19 = vshll.u32 %v2415_v51, 16  ;;  %v2788_v48 = vshll.u32 %v2416_v34, 16 }
 0x1b0   : > { %v3121_v12 = vrot.slane %v5829_v24, 5 }
 0x1b2   : > { %v2283_v50 = vpop.f32.mrf.mxu3  ;;  %v1593_v16 = vpop.f32.mrf.mxu1  ;;  %v3122_v52 = vsel %vm6556_vm14, %v3120_v1, %v3121_v12 }
 0x1b3   : > { %v2348_v40 = vadd.f32 %v2283_v50, %v2034_v30  ;;  %v2965_v22 = vpop.f32.mrf.mxu0  ;;  %v2777_v30 = vsel %vm6151_vm10, %v2772_v25, %v2776_v41  ;;  %v2792_v50 = vshrl.u32 %v2416_v34, 16  ;;  %v1594_v42 = vadd.f32 %v1593_v16, %v6669_v23  ;;  %v3793_v34 = vld [vmem:[#allocation2 + $0x18] sm:$0xf] }
 0x1b4   : > { %v2784_v25 = vrot.slane %v2782_v19, 5  ;;  %v1802_v41 = vsel %vm6556_vm14, %v5265_v31, %v1801_v37  ;;  %v2790_v23 = vrot.slane %v2788_v48, 5  ;;  %v3845_v12 = vshll.u32 %v3793_v34, 16 }
 0x1b5   : > { %v1971_v13 = vpop.f32.mrf.mxu2  ;;  %5248 = vmatmul.msk.bf16.gmra.mxu1 %vm1264_vm11, %v5668_v62  ;;  %v6856_v5 = vadd.f32 %v2965_v22, %v2348_v40  ;;  %v1803_v62 = vrot.slane %v1801_v37, 4  ;;  %v2840_v40 = vunpack.c.l.b16 %v2777_v30  ;;  %v2794_v16 = vrot.slane %v2792_v50, 4 }
 0x1b6   : > { %v2035_v2 = vadd.f32 %v1971_v13, %v1591_v9  ;;  %5423 = vmatmul.msk.bf16.gmra.mxu0 %vm1264_vm11, %v2856_v21  ;;  %v2839_v21 = vunpack.c.l.b16 %v2767_v57  ;;  %v3052_v9 = vld [vmem:[#allocation2 + $0xc] sm:$0xe]  ;;  %v5669_v57 = vld [vmem:[#allocation2 + $0xb4] sm:$0xff]  ;;  %v3238_v30 = vunpack.c.l.b16 %v3122_v52  ;;  %v1845_v19 = vunpack.c.l.b16 %v1802_v41  ;;  %v5697_v52 = vld [vmem:[#allocation2 + $0xc0] sm:$0xff] }
 0x1b7   : > { %v1805_v8 = vsel %vm6556_vm14, %v1803_v62, %v1804_v32  ;;  %v2795_v48 = vor.u32 %v2794_v16, %v2790_v23  ;;  %v3847_v41 = vrot.slane %v3845_v12, 5  ;;  %v6899_v12 = vld [vmem:[#allocation2 + $0x28] sm:$0xf] }
 0x1b8   : > { %v2857_v55 = vpack.c.b16 %v2840_v40, %v2839_v21  ;;  %v1846_v32 = vunpack.c.l.b16 %v1805_v8  ;;  %v6887_v8 = vld [vmem:[#allocation2 + $0x20] sm:$0x1] }
 0x1ba   : > { %v2285_v54 = vpop.f32.mrf.mxu3  ;;  %5296 = vmatmul.msk.bf16.gmra.mxu2 %vm1264_vm11, %v1861_v59  ;;  %v1595_v14 = vpop.f32.mrf.mxu1  ;;  %v2781_v59 = vrot.slane %v2779_v28, 4  ;;  %v6876_v28 = vld [vmem:[#allocation2 + $0x1c] sm:$0xf] }
 0x1bb   : > { %v2349_v53 = vadd.f32 %v2285_v54, %v2035_v2  ;;  %v2967_v60 = vpop.f32.mrf.mxu0  ;;  %v5426_v2 = vrot.slane %v3052_v9, 9  ;;  %v1596_v1 = vadd.f32 %v1595_v14, %v6685_v49  ;;  %v1862_v9 = vpack.c.b16 %v1846_v32, %v1845_v19 }
 0x1bc   : > { %v3861_v19 = vshll.u32 %v6887_v8, 16 }
 0x1bd   : > { %v1974_v22 = vpop.f32.mrf.mxu2  ;;  %v6865_v13 = vadd.f32 %v2967_v60, %v2349_v53  ;;  %v3119_v51 = vsel %vm6556_vm14, %v5426_v2, %v3118_v11  ;;  %v2785_v53 = vor.u32 %v2784_v25, %v2781_v59  ;;  %v3842_v11 = vshrl.u32 %v3793_v34, 16 }
 0x1be   : > { %v2036_v47 = vadd.f32 %v1974_v22, %v1594_v42  ;;  %v3237_v54 = vunpack.c.l.b16 %v3119_v51  ;;  %v3851_v60 = vshll.u32 %v6876_v28, 16  ;;  %v3855_v42 = vshrl.u32 %v6876_v28, 16 }
 0x1bf   : > { %5392 = vmatmul.msk.bf16.gmra.mxu3 %vm1264_vm11, %v5696_v33  ;;  %v2798_v33 = vshll.u32 %v2417_v10, 16  ;;  %v2796_v59 = vrot.slane %v2795_v48, 4  ;;  %v3844_v2 = vrot.slane %v3842_v11, 4 }
 0x1c0   : > { %v6878_v50 = vpack.c.b16 %v3238_v30, %v3237_v54  ;;  %v3853_v49 = vrot.slane %v3851_v60, 5  ;;  %v3857_v14 = vrot.slane %v3855_v42, 4  ;;  %v4475_v60 = vld [vmem:[#allocation2 + $0x18] sm:$0xe]  ;;  %v5830_v42 = vld [vmem:[#allocation2 + $0x20] sm:$0x1] }
 0x1c1   : > { %v2800_v25 = vrot.slane %v2798_v33, 5  ;;  %v3848_v30 = vor.u32 %v3847_v41, %v3844_v2 }
 0x1c2   : > { %v2288_v37 = vpop.f32.mrf.mxu3  ;;  %v1598_v31 = vpop.f32.mrf.mxu1 }
 0x1c3   : > { %v2350_v62 = vadd.f32 %v2288_v37, %v2036_v47  ;;  %v2970_v24 = vpop.f32.mrf.mxu0  ;;  %v2786_v47 = vrot.slane %v2785_v53, 4  ;;  %v1599_v54 = vadd.f32 %v1598_v31, %v6704_v29  ;;  %v3858_v37 = vor.u32 %v3857_v14, %v3853_v49  ;;  %v3053_v14 = vld [vmem:[#allocation2 + $0x18] sm:$0xe] }
 0x1c4   : > { %v4541_v29 = vrot.slane %v6876_v28, 5 }
 0x1c5   : > { %v1976_v21 = vpop.f32.mrf.mxu2  ;;  %5249 = vmatmul.msk.bf16.gmra.mxu1 %vm1264_vm11, %v5669_v57  ;;  %v6884_v40 = vadd.f32 %v2970_v24, %v2350_v62  ;;  %v2791_v34 = vsel %vm6151_vm10, %v2786_v47, %v2790_v23  ;;  %v3796_v62 = vld [vmem:[#allocation2 + $0x24] sm:$0xf]  ;;  %v3849_v23 = vrot.slane %v3848_v30, 4  ;;  %v3859_v24 = vrot.slane %v3858_v37, 4  ;;  %v5831_v47 = vld [vmem:[#allocation2 + $0x1c] sm:$0xf] }
 0x1c6   : > { %v2037_v22 = vadd.f32 %v1976_v21, %v1596_v1  ;;  %5424 = vmatmul.msk.bf16.gmra.mxu0 %vm1264_vm11, %v2857_v55  ;;  %v2801_v55 = vsel %vm6151_vm10, %v2796_v59, %v2800_v25  ;;  %v2841_v48 = vunpack.c.l.b16 %v2791_v34  ;;  %v3863_v1 = vrot.slane %v3861_v19, 5 }
 0x1c7   : > { %v2842_v11 = vunpack.c.l.b16 %v2801_v55  ;;  %v3866_v31 = vshrl.u32 %v3796_v62, 16  ;;  %v3128_v21 = vrot.slane %v5830_v42, 5  ;;  %v3125_v59 = vrot.slane %v5831_v47, 5 }
 0x1c8   : > { %v3869_v25 = vshll.u32 %v3796_v62, 16  ;;  %v3854_v28 = vsel %vm6151_vm10, %v3849_v23, %v3853_v49  ;;  %v3864_v55 = vsel %vm6151_vm10, %v3859_v24, %v3863_v1  ;;  %v4543_v30 = vrot.slane %v4541_v29, 4  ;;  %v5710_v62 = vld [vmem:[#allocation2 + $0x18] sm:$0xff]  ;;  %v6915_v1 = vld [vmem:[#allocation2 + $0x2c] sm:$0x1] }
 0x1c9   : > { %v2858_v2 = vpack.c.b16 %v2842_v11, %v2841_v48  ;;  %v4544_v37 = vrot.slane %v6887_v8, 5  ;;  %v3868_v19 = vrot.slane %v3866_v31, 4  ;;  %v4234_v49 = vunpack.c.l.b16 %v3854_v28 }
 0x1ca   : > { %v2290_v10 = vpop.f32.mrf.mxu3  ;;  %5297 = vmatmul.msk.bf16.gmra.mxu2 %vm1264_vm11, %v1862_v9  ;;  %v1600_v16 = vpop.f32.mrf.mxu1  ;;  %v3871_v48 = vrot.slane %v3869_v25, 5  ;;  %v4235_v11 = vunpack.c.l.b16 %v3864_v55 }
 0x1cb   : > { %v2351_v51 = vadd.f32 %v2290_v10, %v2037_v22  ;;  %v2972_v57 = vpop.f32.mrf.mxu0  ;;  %v3875_v10 = vshll.u32 %v6899_v12, 16  ;;  %v1601_v34 = vadd.f32 %v1600_v16, %v6719_v15  ;;  %v5427_v15 = vrot.slane %v3053_v14, 9 }
 0x1cc   : > { %v3127_v16 = vrot.slane %v3125_v59, 4  ;;  %v3872_v47 = vor.u32 %v3871_v48, %v3868_v19  ;;  %v3885_v14 = vshll.u32 %v6915_v1, 16  ;;  %v4548_v48 = vrot.slane %v6899_v12, 5 }
 0x1cd   : > { %v1979_v32 = vpop.f32.mrf.mxu2  ;;  %v6896_v53 = vadd.f32 %v2972_v57, %v2351_v51  ;;  %v3879_v51 = vshrl.u32 %v6899_v12, 16  ;;  %v5602_v57 = vrot.slane %v4475_v60, 9  ;;  %v3877_v23 = vrot.slane %v3875_v10, 5 }
 0x1ce   : > { %v2038_v33 = vadd.f32 %v1979_v32, %v1599_v54  ;;  %v4545_v60 = vsel %vm6556_vm14, %v4543_v30, %v4544_v37  ;;  %v3126_v42 = vsel %vm6556_vm14, %v5427_v15, %v3125_v59  ;;  %v3887_v30 = vrot.slane %v3885_v14, 5  ;;  %v3799_v37 = vld [vmem:[#allocation2 + $0x30] sm:$0xf] }
 0x1cf   : > { %5393 = vmatmul.msk.bf16.gmra.mxu3 %vm1264_vm11, %v5697_v52  ;;  %v3881_v24 = vrot.slane %v3879_v51, 4 }
 0x1d2   : > { %v2293_v22 = vpop.f32.mrf.mxu3  ;;  %v1603_v9 = vpop.f32.mrf.mxu1 }
 0x1d3   : > { %v2352_v41 = vadd.f32 %v2293_v22, %v2038_v33  ;;  %v2975_v52 = vpop.f32.mrf.mxu0  ;;  %v3129_v22 = vsel %vm6556_vm14, %v3127_v16, %v3128_v21  ;;  %v1604_v10 = vadd.f32 %v1603_v9, %v6628_v3  ;;  %v4476_v16 = vld [vmem:[#allocation2 + $0x24] sm:$0xe] }
 0x1d5   : > { %v1981_v54 = vpop.f32.mrf.mxu2  ;;  %5458 = vmatmul.msk.bf16.vlgmr.msra.gmra.mxu1 %vm1264_vm11, %v6878_v50  ;;  %v6912_v32 = vadd.f32 %v2975_v52, %v2352_v41  ;;  %v4542_v50 = vsel %vm6556_vm14, %v5602_v57, %v4541_v29  ;;  %v3882_v41 = vor.u32 %v3881_v24, %v3877_v23  ;;  %v3239_v52 = vunpack.c.l.b16 %v3126_v42 }
 0x1d6   : > { %v2039_v33 = vadd.f32 %v1981_v54, %v1601_v34  ;;  %5425 = vmatmul.msk.bf16.gmra.mxu0 %vm1264_vm11, %v2858_v2  ;;  %v4266_v2 = vpack.c.b16 %v4235_v11, %v4234_v49  ;;  %v3240_v34 = vunpack.c.l.b16 %v3129_v22  ;;  %v4660_v55 = vunpack.c.l.b16 %v4542_v50  ;;  %v5832_v49 = vld [vmem:[#allocation2 + $0x28] sm:$0xf] }
 0x1d7   : > { %v4661_v57 = vunpack.c.l.b16 %v4545_v60  ;;  %v3873_v54 = vrot.slane %v3872_v47, 4  ;;  %v3883_v21 = vrot.slane %v3882_v41, 4  ;;  %v3132_v11 = vrot.slane %v5832_v49, 5 }
 0x1d8   : > { %v3270_v19 = vpack.c.b16 %v3240_v34, %v3239_v52  ;;  %v3890_v60 = vshrl.u32 %v3799_v37, 16  ;;  %v3893_v42 = vshll.u32 %v3799_v37, 16  ;;  %v5711_v52 = vld [vmem:[#allocation2 + $0x24] sm:$0xff]  ;;  %v6946_v37 = vld [vmem:[#allocation2 + $0x38] sm:$0x1] }
 0x1d9   : > { %v3878_v9 = vsel %vm6151_vm10, %v3873_v54, %v3877_v23  ;;  %v3888_v50 = vsel %vm6151_vm10, %v3883_v21, %v3887_v30  ;;  %v5833_v23 = vld [vmem:[#allocation2 + $0x2c] sm:$0x1] }
 0x1da   : > { %v2295_v8 = vpop.f32.mrf.mxu3  ;;  %5554 = vmatmul.msk.bf16.vlgmr.msra.gmra.mxu2 %vm1264_vm11, %v5710_v62  ;;  %v1605_v31 = vpop.f32.mrf.mxu1  ;;  %v4692_v62 = vpack.c.b16 %v4661_v57, %v4660_v55  ;;  %v3135_v41 = vrot.slane %v5833_v23, 5  ;;  %v4236_v12 = vunpack.c.l.b16 %v3878_v9  ;;  %v4237_v34 = vunpack.c.l.b16 %v3888_v50 }
 0x1db   : > { %v2353_v25 = vadd.f32 %v2295_v8, %v2039_v33  ;;  %v2977_v29 = vpop.f32.mrf.mxu0  ;;  %v6931_v33 = vld [vmem:[#allocation2 + $0x34] sm:$0xf]  ;;  %v3054_v8 = vld [vmem:[#allocation2 + $0x24] sm:$0xe]  ;;  %v1606_v47 = vadd.f32 %v1605_v31, %v6643_v61  ;;  %v3134_v57 = vrot.slane %v3132_v11, 4  ;;  %v4550_v61 = vrot.slane %v4548_v48, 4 }
 0x1dc   : > { %v5428_v55 = vrot.slane %v3054_v8, 9  ;;  %v4551_v31 = vrot.slane %v6915_v1, 5  ;;  %v3895_v54 = vrot.slane %v3893_v42, 5  ;;  %v4267_v49 = vpack.c.b16 %v4237_v34, %v4236_v12  ;;  %v6962_v34 = vld [vmem:[#allocation2 + $0x40] sm:$0xf] }
 0x1dd   : > { %v1984_v51 = vpop.f32.mrf.mxu2  ;;  %v6928_v28 = vadd.f32 %v2977_v29, %v2353_v25  ;;  %v3899_v25 = vshll.u32 %v6931_v33, 16  ;;  %v5603_v29 = vrot.slane %v4476_v16, 9 }
 0x1de   : > { %v2040_v59 = vadd.f32 %v1984_v51, %v1604_v10  ;;  %v3133_v16 = vsel %vm6556_vm14, %v5428_v55, %v3132_v11 }
 0x1df   : > { %5586 = vmatmul.msk.bf16.vlgmr.msra.gmra.mxu3 %vm1264_vm11, %v4266_v2  ;;  %v3903_v2 = vshrl.u32 %v6931_v33, 16  ;;  %v3901_v21 = vrot.slane %v3899_v25, 5 }
 0x1e1   : > { %v3905_v30 = vrot.slane %v3903_v2, 4 }
 0x1e2   : > { %v2298_v15 = vpop.f32.mrf.mxu3  ;;  %v1608_v3 = vpop.f32.mrf.mxu1 }
 0x1e3   : > { %v2354_v24 = vadd.f32 %v2298_v15, %v2040_v59  ;;  %v2980_v22 = vpop.f32.mrf.mxu0  ;;  %v3892_v59 = vrot.slane %v3890_v60, 4  ;;  %v4549_v15 = vsel %vm6556_vm14, %v5603_v29, %v4548_v48  ;;  %v1609_v60 = vadd.f32 %v1608_v3, %v6657_v58 }
 0x1e4   : > { %v3906_v42 = vor.u32 %v3905_v30, %v3901_v21  ;;  %v4662_v11 = vunpack.c.l.b16 %v4549_v15  ;;  %v4477_v30 = vld [vmem:[#allocation2 + $0x30] sm:$0xe] }
 0x1e5   : > { %v1986_v14 = vpop.f32.mrf.mxu2  ;;  %5459 = vmatmul.msk.bf16.gmra.mxu1 %vm1264_vm11, %v3270_v19  ;;  %v6942_v10 = vadd.f32 %v2980_v22, %v2354_v24  ;;  %v4552_v24 = vsel %vm6556_vm14, %v4550_v61, %v4551_v31  ;;  %v3896_v50 = vor.u32 %v3895_v54, %v3892_v59  ;;  %v3909_v22 = vshll.u32 %v6946_v37, 16  ;;  %v5834_v61 = vld [vmem:[#allocation2 + $0x34] sm:$0xf] }
 0x1e6   : > { %v2041_v51 = vadd.f32 %v1986_v14, %v1606_v47  ;;  %5634 = vmatmul.msk.bf16.vlgmr.msra.gmra.mxu0 %vm1264_vm11, %v4692_v62  ;;  %v3136_v62 = vsel %vm6556_vm14, %v3134_v57, %v3135_v41  ;;  %v3241_v47 = vunpack.c.l.b16 %v3133_v16  ;;  %v4663_v23 = vunpack.c.l.b16 %v4552_v24 }
 0x1e7   : > { %v3242_v25 = vunpack.c.l.b16 %v3136_v62  ;;  %v3897_v14 = vrot.slane %v3896_v50, 4  ;;  %v3907_v12 = vrot.slane %v3906_v42, 4  ;;  %v3911_v29 = vrot.slane %v3909_v22, 5  ;;  %v5835_v50 = vld [vmem:[#allocation2 + $0x38] sm:$0x1]  ;;  %v5712_v22 = vld [vmem:[#allocation2 + $0x30] sm:$0xff] }
 0x1e8   : > { %v4693_v58 = vpack.c.b16 %v4663_v23, %v4662_v11  ;;  %v4555_v57 = vrot.slane %v6931_v33, 5  ;;  %v3139_v31 = vrot.slane %v5834_v61, 5  ;;  %v3923_v24 = vshll.u32 %v6962_v34, 16 }
 0x1e9   : > { %v3902_v54 = vsel %vm6151_vm10, %v3897_v14, %v3901_v21  ;;  %v3927_v33 = vshrl.u32 %v6962_v34, 16  ;;  %v4558_v14 = vrot.slane %v6946_v37, 5 }
 0x1ea   : > { %v2300_v19 = vpop.f32.mrf.mxu3  ;;  %5555 = vmatmul.msk.bf16.gmra.mxu2 %vm1264_vm11, %v5711_v52  ;;  %v1610_v9 = vpop.f32.mrf.mxu1  ;;  %v3271_v52 = vpack.c.b16 %v3242_v25, %v3241_v47  ;;  %v3141_v25 = vrot.slane %v3139_v31, 4 }
 0x1eb   : > { %v2355_v1 = vadd.f32 %v2300_v19, %v2041_v51  ;;  %v2982_v8 = vpop.f32.mrf.mxu0  ;;  %v3802_v51 = vld [vmem:[#allocation2 + $0x3c] sm:$0xf]  ;;  %v3055_v19 = vld [vmem:[#allocation2 + $0x30] sm:$0xe] }
 0x1ec   : > { %v3914_v15 = vshrl.u32 %v3802_v51, 16  ;;  %v3917_v16 = vshll.u32 %v3802_v51, 16  ;;  %v5429_v47 = vrot.slane %v3055_v19, 9  ;;  %v6979_v51 = vld [vmem:[#allocation2 + $0x44] sm:$0x1] }
 0x1ed   : > { %v1989_v48 = vpop.f32.mrf.mxu2  ;;  %v6959_v2 = vadd.f32 %v2982_v8, %v2355_v1  ;;  %v1611_v1 = vadd.f32 %v1610_v9, %v6672_v43  ;;  %v3142_v8 = vrot.slane %v5835_v50, 5  ;;  %v4238_v43 = vunpack.c.l.b16 %v3902_v54 }
 0x1ee   : > { %v2042_v41 = vadd.f32 %v1989_v48, %v1609_v60  ;;  %v5604_v48 = vrot.slane %v4477_v30, 9  ;;  %v3916_v11 = vrot.slane %v3914_v15, 4  ;;  %v3919_v23 = vrot.slane %v3917_v16, 5 }
 0x1ef   : > { %5587 = vmatmul.msk.bf16.gmra.mxu3 %vm1264_vm11, %v4267_v49  ;;  %v3912_v49 = vsel %vm6151_vm10, %v3907_v12, %v3911_v29  ;;  %v6977_v12 = vrot.slane %v3923_v24, 5  ;;  %v3929_v29 = vrot.slane %v3927_v33, 4  ;;  %v3140_v61 = vsel %vm6556_vm14, %v5429_v47, %v3139_v31 }
 0x1f0   : > { %v4239_v9 = vunpack.c.l.b16 %v3912_v49  ;;  %v4556_v37 = vsel %vm6556_vm14, %v5604_v48, %v4555_v57  ;;  %v3920_v30 = vor.u32 %v3919_v23, %v3916_v11  ;;  %v3243_v49 = vunpack.c.l.b16 %v3140_v61  ;;  %v4478_v48 = vld [vmem:[#allocation2 + $0x3c] sm:$0xe]  ;;  %v5836_v23 = vld [vmem:[#allocation2 + $0x44] sm:$0x1] }
 0x1f1   : > { %v4562_v47 = vrot.slane %v6962_v34, 5  ;;  %v5605_v34 = vrot.slane %v4478_v48, 9 }
 0x1f2   : > { %v2303_v3 = vpop.f32.mrf.mxu3  ;;  %v1613_v55 = vpop.f32.mrf.mxu1  ;;  %v4268_v54 = vpack.c.b16 %v4239_v9, %v4238_v43 }
 0x1f3   : > { %v2356_v59 = vadd.f32 %v2303_v3, %v2042_v41  ;;  %v2985_v62 = vpop.f32.mrf.mxu0  ;;  %v4557_v41 = vrot.slane %v4555_v57, 4  ;;  %v1614_v15 = vadd.f32 %v1613_v55, %v6687_v4  ;;  %v4664_v57 = vunpack.c.l.b16 %v4556_v37 }
 0x1f4   : > { %v3921_v55 = vrot.slane %v3920_v30, 4  ;;  %v3056_v30 = vld [vmem:[#allocation2 + $0x3c] sm:$0xe] }
 0x1f5   : > { %v1991_v60 = vpop.f32.mrf.mxu2  ;;  %5460 = vmatmul.msk.bf16.gmra.mxu1 %vm1264_vm11, %v3271_v52  ;;  %v6973_v21 = vadd.f32 %v2985_v62, %v2356_v59  ;;  %v4559_v16 = vsel %vm6556_vm14, %v4557_v41, %v4558_v14  ;;  %v3930_v62 = vor.u32 %v3929_v29, %v6977_v12  ;;  %v3149_v41 = vrot.slane %v5836_v23, 5 }
 0x1f6   : > { %v2043_v42 = vadd.f32 %v1991_v60, %v1611_v1  ;;  %5635 = vmatmul.msk.bf16.gmra.mxu0 %vm1264_vm11, %v4693_v58  ;;  %v3143_v58 = vsel %vm6556_vm14, %v3141_v25, %v3142_v8  ;;  %v3933_v1 = vshll.u32 %v6979_v51, 16  ;;  %v3805_v8 = vld [vmem:[#allocation2 + $0x48] sm:$0xf]  ;;  %v6995_v60 = vld [vmem:[#allocation2 + $0x4c] sm:$0xf]  ;;  %v4665_v4 = vunpack.c.l.b16 %v4559_v16 }
 0x1f7   : > { %v3244_v24 = vunpack.c.l.b16 %v3143_v58  ;;  %v3938_v43 = vshrl.u32 %v3805_v8, 16  ;;  %v3941_v9 = vshll.u32 %v3805_v8, 16  ;;  %v3947_v11 = vshll.u32 %v6995_v60, 16 }
 0x1f8   : > { %v3951_v58 = vshrl.u32 %v6995_v60, 16  ;;  %v3926_v37 = vsel %vm6151_vm10, %v3921_v55, %v6977_v12 }
 0x1f9   : > { %v3272_v25 = vpack.c.b16 %v3244_v24, %v3243_v49  ;;  %v3940_v49 = vrot.slane %v3938_v43, 4  ;;  %v3943_v24 = vrot.slane %v3941_v9, 5 }
 0x1fa   : > { %v2305_v52 = vpop.f32.mrf.mxu3  ;;  %5556 = vmatmul.msk.bf16.gmra.mxu2 %vm1264_vm11, %v5712_v22  ;;  %v1615_v3 = vpop.f32.mrf.mxu1  ;;  %v3935_v22 = vrot.slane %v3933_v1, 5  ;;  %v4565_v1 = vrot.slane %v6979_v51, 5  ;;  %v3953_v48 = vrot.slane %v3951_v58, 4  ;;  %v4563_v51 = vsel %vm6556_vm14, %v5605_v34, %v4562_v47 }
 0x1fb   : > { %v2357_v59 = vadd.f32 %v2305_v52, %v2043_v42  ;;  %v2987_v19 = vpop.f32.mrf.mxu0  ;;  %v3931_v42 = vrot.slane %v3930_v62, 4  ;;  %v5837_v52 = vld [vmem:[#allocation2 + $0x40] sm:$0xf]  ;;  %v4564_v62 = vrot.slane %v4562_v47, 4 }
 0x1fc   : > { %v3146_v61 = vrot.slane %v5837_v52, 5 }
 0x1fd   : > { %v1994_v31 = vpop.f32.mrf.mxu2  ;;  %v6993_v33 = vadd.f32 %v2987_v19, %v2357_v59  ;;  %v4694_v59 = vpack.c.b16 %v4665_v4, %v4664_v57  ;;  %v3936_v16 = vsel %vm6151_vm10, %v3931_v42, %v3935_v22  ;;  %v5713_v57 = vld [vmem:[#allocation2 + $0x3c] sm:$0xff]  ;;  %v5430_v4 = vrot.slane %v3056_v30, 9  ;;  %v7012_v42 = vld [vmem:[#allocation2 + $0x50] sm:$0x1] }
 0x1fe   : > { %v2044_v50 = vadd.f32 %v1994_v31, %v1614_v15  ;;  %v1616_v15 = vadd.f32 %v1615_v3, %v6706_v39  ;;  %v3148_v55 = vrot.slane %v3146_v61, 4  ;;  %v4240_v39 = vunpack.c.l.b16 %v3926_v37 }
 0x1ff   : > { %5588 = vmatmul.msk.bf16.gmra.mxu3 %vm1264_vm11, %v4268_v54  ;;  %v4241_v3 = vunpack.c.l.b16 %v3936_v16  ;;  %v4566_v22 = vsel %vm6556_vm14, %v4564_v62, %v4565_v1  ;;  %v3957_v52 = vshll.u32 %v7012_v42, 16  ;;  %v4666_v37 = vunpack.c.l.b16 %v4563_v51 }
 0x200   : > { %v3150_v23 = vsel %vm6556_vm14, %v3148_v55, %v3149_v41  ;;  %v4667_v34 = vunpack.c.l.b16 %v4566_v22  ;;  %v3808_v41 = vld [vmem:[#allocation2 + $0x54] sm:$0xf] }
 0x201   : > { %v3962_v51 = vshrl.u32 %v3808_v41, 16 }
 0x202   : > { %v2308_v14 = vpop.f32.mrf.mxu3  ;;  %v1618_v29 = vpop.f32.mrf.mxu1 }
 0x203   : > { %v2358_v54 = vadd.f32 %v2308_v14, %v2044_v50  ;;  %v2990_v19 = vpop.f32.mrf.mxu0  ;;  %v3949_v50 = vrot.slane %v3947_v11, 5  ;;  %v3147_v11 = vsel %vm6556_vm14, %v5430_v4, %v3146_v61 }
 0x205   : > { %v1996_v31 = vpop.f32.mrf.mxu2  ;;  %5461 = vmatmul.msk.bf16.gmra.mxu1 %vm1264_vm11, %v3272_v25  ;;  %v7009_v8 = vadd.f32 %v2990_v19, %v2358_v54  ;;  %v3944_v25 = vor.u32 %v3943_v24, %v3940_v49  ;;  %v3954_v14 = vor.u32 %v3953_v48, %v3949_v50  ;;  %v1619_v54 = vadd.f32 %v1618_v29, %v6721_v27  ;;  %v7028_v49 = vld [vmem:[#allocation2 + $0x58] sm:$0xf] }
 0x206   : > { %v2045_v12 = vadd.f32 %v1996_v31, %v1616_v15  ;;  %5636 = vmatmul.msk.bf16.gmra.mxu0 %vm1264_vm11, %v4694_v59  ;;  %v4269_v59 = vpack.c.b16 %v4241_v3, %v4240_v39  ;;  %v3245_v19 = vunpack.c.l.b16 %v3147_v11  ;;  %v3246_v15 = vunpack.c.l.b16 %v3150_v23  ;;  %v5838_v39 = vld [vmem:[#allocation2 + $0x4c] sm:$0xf] }
 0x207   : > { %v3945_v61 = vrot.slane %v3944_v25, 4  ;;  %v3955_v1 = vrot.slane %v3954_v14, 4  ;;  %v3959_v31 = vrot.slane %v3957_v52, 5  ;;  %v4695_v24 = vpack.c.b16 %v4667_v34, %v4666_v37  ;;  %v3057_v25 = vld [vmem:[#allocation2 + $0x48] sm:$0xe] }
 0x208   : > { %v4569_v27 = vrot.slane %v6995_v60, 5  ;;  %v3153_v3 = vrot.slane %v5838_v39, 5  ;;  %v3971_v11 = vshll.u32 %v7028_v49, 16  ;;  %v3975_v23 = vshrl.u32 %v7028_v49, 16  ;;  %v5839_v14 = vld [vmem:[#allocation2 + $0x50] sm:$0x1] }
 0x209   : > { %v3950_v55 = vsel %vm6151_vm10, %v3945_v61, %v3949_v50  ;;  %v3960_v48 = vsel %vm6151_vm10, %v3955_v1, %v3959_v31  ;;  %v3156_v60 = vrot.slane %v5839_v14, 5  ;;  %v3964_v1 = vrot.slane %v3962_v51, 4 }
 0x20a   : > { %v2310_v43 = vpop.f32.mrf.mxu3  ;;  %5557 = vmatmul.msk.bf16.gmra.mxu2 %vm1264_vm11, %v5713_v57  ;;  %v1620_v9 = vpop.f32.mrf.mxu1  ;;  %v4479_v57 = vld [vmem:[#allocation2 + $0x48] sm:$0xe]  ;;  %v4571_v37 = vrot.slane %v4569_v27, 4  ;;  %v3155_v61 = vrot.slane %v3153_v3, 4 }
 0x20b   : > { %v2359_v58 = vadd.f32 %v2310_v43, %v2045_v12  ;;  %v2992_v47 = vpop.f32.mrf.mxu0  ;;  %v3273_v12 = vpack.c.b16 %v3246_v15, %v3245_v19  ;;  %v3965_v43 = vshll.u32 %v3808_v41, 16  ;;  %v5714_v19 = vld [vmem:[#allocation2 + $0x48] sm:$0xff]  ;;  %v4572_v15 = vrot.slane %v7012_v42, 5  ;;  %v7043_v41 = vld [vmem:[#allocation2 + $0x5c] sm:$0x1] }
 0x20d   : > { %v1999_v30 = vpop.f32.mrf.mxu2  ;;  %v7025_v16 = vadd.f32 %v2992_v47, %v2359_v58  ;;  %v1621_v58 = vadd.f32 %v1620_v9, %v6732_v6  ;;  %v4242_v47 = vunpack.c.l.b16 %v3950_v55  ;;  %v3967_v31 = vrot.slane %v3965_v43, 5 }
 0x20e   : > { %v2046_v62 = vadd.f32 %v1999_v30, %v1619_v54  ;;  %v4243_v54 = vunpack.c.l.b16 %v3960_v48  ;;  %v3973_v6 = vrot.slane %v3971_v11, 5  ;;  %v3977_v9 = vrot.slane %v3975_v23, 4 }
 0x20f   : > { %5589 = vmatmul.msk.bf16.gmra.mxu3 %vm1264_vm11, %v4269_v59  ;;  %v5606_v59 = vrot.slane %v4479_v57, 9  ;;  %v4573_v42 = vsel %vm6556_vm14, %v4571_v37, %v4572_v15  ;;  %v3157_v48 = vsel %vm6556_vm14, %v3155_v61, %v3156_v60  ;;  %v3968_v51 = vor.u32 %v3967_v31, %v3964_v1 }
 0x210   : > { %v3248_v14 = vunpack.c.l.b16 %v3157_v48 }
 0x212   : > { %v2313_v29 = vpop.f32.mrf.mxu3  ;;  %v1623_v4 = vpop.f32.mrf.mxu1 }
 0x213   : > { %v2360_v22 = vadd.f32 %v2313_v29, %v2046_v62  ;;  %v2995_v52 = vpop.f32.mrf.mxu0  ;;  %v5431_v62 = vrot.slane %v3057_v25, 9  ;;  %v4270_v29 = vpack.c.b16 %v4243_v54, %v4242_v47  ;;  %v3981_v25 = vshll.u32 %v7043_v41, 16  ;;  %v3811_v54 = vld [vmem:[#allocation2 + $0x60] sm:$0xf] }
 0x214   : > { %v1624_v43 = vadd.f32 %v1623_v4, %v6631_v7  ;;  %v4576_v4 = vrot.slane %v7028_v49, 5  ;;  %v3989_v48 = vshll.u32 %v3811_v54, 16 }
 0x215   : > { %v2001_v50 = vpop.f32.mrf.mxu2  ;;  %5462 = vmatmul.msk.bf16.gmra.mxu1 %vm1264_vm11, %v3273_v12  ;;  %v7039_v34 = vadd.f32 %v2995_v52, %v2360_v22  ;;  %v4570_v12 = vsel %vm6556_vm14, %v5606_v59, %v4569_v27  ;;  %v3978_v22 = vor.u32 %v3977_v9, %v3973_v6  ;;  %v4669_v59 = vunpack.c.l.b16 %v4573_v42 }
 0x216   : > { %v2047_v30 = vadd.f32 %v2001_v50, %v1621_v58  ;;  %5637 = vmatmul.msk.bf16.gmra.mxu0 %vm1264_vm11, %v4695_v24  ;;  %v3154_v24 = vsel %vm6556_vm14, %v5431_v62, %v3153_v3  ;;  %v4668_v58 = vunpack.c.l.b16 %v4570_v12  ;;  %v3969_v3 = vrot.slane %v3968_v51, 4  ;;  %v5840_v62 = vld [vmem:[#allocation2 + $0x58] sm:$0xf]  ;;  %v4480_v12 = vld [vmem:[#allocation2 + $0x54] sm:$0xe] }
 0x217   : > { %v3247_v23 = vunpack.c.l.b16 %v3154_v24  ;;  %v3979_v60 = vrot.slane %v3978_v22, 4  ;;  %v3983_v47 = vrot.slane %v3981_v25, 5  ;;  %v3160_v61 = vrot.slane %v5840_v62, 5  ;;  %v5841_v51 = vld [vmem:[#allocation2 + $0x5c] sm:$0x1] }
 0x218   : > { %v3974_v31 = vsel %vm6151_vm10, %v3969_v3, %v3973_v6  ;;  %v3163_v22 = vrot.slane %v5841_v51, 5  ;;  %v3991_v3 = vrot.slane %v3989_v48, 5 }
 0x219   : > { %v3274_v37 = vpack.c.b16 %v3248_v14, %v3247_v23  ;;  %v3984_v9 = vsel %vm6151_vm10, %v3979_v60, %v3983_v47  ;;  %v3162_v14 = vrot.slane %v3160_v61, 4 }
 0x21a   : > { %v2315_v57 = vpop.f32.mrf.mxu3  ;;  %5558 = vmatmul.msk.bf16.gmra.mxu2 %vm1264_vm11, %v5714_v19  ;;  %v1625_v55 = vpop.f32.mrf.mxu1  ;;  %v4696_v19 = vpack.c.b16 %v4669_v59, %v4668_v58  ;;  %v4578_v58 = vrot.slane %v4576_v4, 4  ;;  %v4579_v59 = vrot.slane %v7043_v41, 5 }
 0x21b   : > { %v2361_v39 = vadd.f32 %v2315_v57, %v2047_v30  ;;  %v2997_v27 = vpop.f32.mrf.mxu0  ;;  %v7059_v30 = vld [vmem:[#allocation2 + $0x64] sm:$0xf]  ;;  %v3058_v57 = vld [vmem:[#allocation2 + $0x54] sm:$0xe]  ;;  %v1626_v24 = vadd.f32 %v1625_v55, %v6650_v36  ;;  %v4244_v36 = vunpack.c.l.b16 %v3974_v31  ;;  %v4245_v55 = vunpack.c.l.b16 %v3984_v9 }
 0x21c   : > { %v3999_v49 = vshrl.u32 %v7059_v30, 16  ;;  %v5432_v23 = vrot.slane %v3058_v57, 9  ;;  %v4580_v9 = vsel %vm6556_vm14, %v4578_v58, %v4579_v59 }
 0x21d   : > { %v2004_v11 = vpop.f32.mrf.mxu2  ;;  %v7056_v52 = vadd.f32 %v2997_v27, %v2361_v39  ;;  %v3995_v39 = vshll.u32 %v7059_v30, 16  ;;  %v4271_v31 = vpack.c.b16 %v4245_v55, %v4244_v36 }
 0x21e   : > { %v2048_v50 = vadd.f32 %v2004_v11, %v1624_v43  ;;  %v5715_v43 = vld [vmem:[#allocation2 + $0x54] sm:$0xff]  ;;  %v5607_v11 = vrot.slane %v4480_v12, 9  ;;  %v4001_v47 = vrot.slane %v3999_v49, 4  ;;  %v3161_v62 = vsel %vm6556_vm14, %v5432_v23, %v3160_v61  ;;  %v4481_v23 = vld [vmem:[#allocation2 + $0x60] sm:$0xe] }
 0x21f   : > { %5590 = vmatmul.msk.bf16.gmra.mxu3 %vm1264_vm11, %v4270_v29  ;;  %v3986_v29 = vshrl.u32 %v3811_v54, 16  ;;  %v7074_v60 = vrot.slane %v3995_v39, 5  ;;  %v7076_v54 = vld [vmem:[#allocation2 + $0x68] sm:$0x1]  ;;  %v3249_v48 = vunpack.c.l.b16 %v3161_v62 }
 0x220   : > { %v4577_v41 = vsel %vm6556_vm14, %v5607_v11, %v4576_v4 }
 0x221   : > { %v4670_v4 = vunpack.c.l.b16 %v4577_v41  ;;  %v3059_v41 = vld [vmem:[#allocation2 + $0x60] sm:$0xe] }
 0x222   : > { %v2318_v15 = vpop.f32.mrf.mxu3  ;;  %v1628_v7 = vpop.f32.mrf.mxu1 }
 0x223   : > { %v2362_v1 = vadd.f32 %v2318_v15, %v2048_v50  ;;  %v3000_v42 = vpop.f32.mrf.mxu0  ;;  %v3988_v50 = vrot.slane %v3986_v29, 4  ;;  %v1629_v57 = vadd.f32 %v1628_v7, %v6663_v56 }
 0x225   : > { %v2006_v25 = vpop.f32.mrf.mxu2  ;;  %5463 = vmatmul.msk.bf16.gmra.mxu1 %vm1264_vm11, %v3274_v37  ;;  %v7070_v6 = vadd.f32 %v3000_v42, %v2362_v1  ;;  %v3992_v29 = vor.u32 %v3991_v3, %v3988_v50  ;;  %v4002_v42 = vor.u32 %v4001_v47, %v7074_v60  ;;  %v5842_v50 = vld [vmem:[#allocation2 + $0x64] sm:$0xf] }
 0x226   : > { %v2049_v27 = vadd.f32 %v2006_v25, %v1626_v24  ;;  %5638 = vmatmul.msk.bf16.gmra.mxu0 %vm1264_vm11, %v4696_v19  ;;  %v3164_v19 = vsel %vm6556_vm14, %v3162_v14, %v3163_v22  ;;  %v4005_v24 = vshll.u32 %v7076_v54, 16  ;;  %v3814_v22 = vld [vmem:[#allocation2 + $0x6c] sm:$0xf]  ;;  %v7092_v25 = vld [vmem:[#allocation2 + $0x70] sm:$0xf]  ;;  %v3167_v3 = vrot.slane %v5842_v50, 5 }
 0x227   : > { %v3250_v39 = vunpack.c.l.b16 %v3164_v19  ;;  %v4003_v56 = vrot.slane %v4002_v42, 4  ;;  %v4010_v14 = vshrl.u32 %v3814_v22, 16  ;;  %v4013_v36 = vshll.u32 %v3814_v22, 16  ;;  %v5716_v22 = vld [vmem:[#allocation2 + $0x60] sm:$0xff] }
 0x228   : > { %v4007_v7 = vrot.slane %v4005_v24, 5  ;;  %v4019_v55 = vshll.u32 %v7092_v25, 16  ;;  %v4023_v47 = vshrl.u32 %v7092_v25, 16  ;;  %v5608_v42 = vrot.slane %v4481_v23, 9 }
 0x229   : > { %v3275_v11 = vpack.c.b16 %v3250_v39, %v3249_v48  ;;  %v4015_v48 = vrot.slane %v4013_v36, 5 }
 0x22a   : > { %v2320_v37 = vpop.f32.mrf.mxu3  ;;  %5559 = vmatmul.msk.bf16.gmra.mxu2 %vm1264_vm11, %v5715_v43  ;;  %v1630_v15 = vpop.f32.mrf.mxu1  ;;  %v3993_v43 = vrot.slane %v3992_v29, 4  ;;  %v4008_v29 = vsel %vm6151_vm10, %v4003_v56, %v4007_v7  ;;  %v4021_v39 = vrot.slane %v4019_v55, 5  ;;  %v4586_v56 = vrot.slane %v7076_v54, 5  ;;  %v7109_v7 = vld [vmem:[#allocation2 + $0x74] sm:$0x1] }
 0x22b   : > { %v2363_v1 = vadd.f32 %v2320_v37, %v2049_v27  ;;  %v3002_v12 = vpop.f32.mrf.mxu0  ;;  %v4671_v27 = vunpack.c.l.b16 %v4580_v9  ;;  %v5843_v37 = vld [vmem:[#allocation2 + $0x68] sm:$0x1] }
 0x22c   : > { %v3170_v62 = vrot.slane %v5843_v37, 5 }
 0x22d   : > { %v2009_v61 = vpop.f32.mrf.mxu2  ;;  %v7090_v49 = vadd.f32 %v3002_v12, %v2363_v1  ;;  %v4697_v19 = vpack.c.b16 %v4671_v27, %v4670_v4  ;;  %v1631_v12 = vadd.f32 %v1630_v15, %v6678_v35  ;;  %v5433_v4 = vrot.slane %v3059_v41, 9 }
 0x22e   : > { %v2050_v51 = vadd.f32 %v2009_v61, %v1629_v57  ;;  %v3998_v57 = vsel %vm6151_vm10, %v3993_v43, %v7074_v60  ;;  %v4012_v61 = vrot.slane %v4010_v14, 4  ;;  %v3169_v35 = vrot.slane %v3167_v3, 4 }
 0x22f   : > { %5591 = vmatmul.msk.bf16.gmra.mxu3 %vm1264_vm11, %v4271_v31  ;;  %v4583_v31 = vrot.slane %v7059_v30, 5  ;;  %v4025_v15 = vrot.slane %v4023_v47, 4  ;;  %v4246_v60 = vunpack.c.l.b16 %v3998_v57  ;;  %v4247_v27 = vunpack.c.l.b16 %v4008_v29 }
 0x230   : > { %v4016_v23 = vor.u32 %v4015_v48, %v4012_v61  ;;  %v3168_v55 = vsel %vm6556_vm14, %v5433_v4, %v3167_v3  ;;  %v4029_v47 = vshll.u32 %v7109_v7, 16  ;;  %v3817_v48 = vld [vmem:[#allocation2 + $0x78] sm:$0xf]  ;;  %v4590_v4 = vrot.slane %v7092_v25, 5 }
 0x231   : > { %v4585_v43 = vrot.slane %v4583_v31, 4  ;;  %v4026_v50 = vor.u32 %v4025_v15, %v4021_v39  ;;  %v4272_v37 = vpack.c.b16 %v4247_v27, %v4246_v60 }
 0x232   : > { %v2323_v58 = vpop.f32.mrf.mxu3  ;;  %v1633_v59 = vpop.f32.mrf.mxu1  ;;  %v4017_v29 = vrot.slane %v4016_v23, 4  ;;  %v4031_v61 = vrot.slane %v4029_v47, 5 }
 0x233   : > { %v2364_v1 = vadd.f32 %v2323_v58, %v2050_v51  ;;  %v3005_v9 = vpop.f32.mrf.mxu0  ;;  %v3171_v58 = vsel %vm6556_vm14, %v3169_v35, %v3170_v62 }
 0x234   : > { %v3252_v57 = vunpack.c.l.b16 %v3171_v58 }
 0x235   : > { %v2011_v24 = vpop.f32.mrf.mxu2  ;;  %5464 = vmatmul.msk.bf16.gmra.mxu1 %vm1264_vm11, %v3275_v11  ;;  %v7105_v51 = vadd.f32 %v3005_v9, %v2364_v1  ;;  %v4584_v11 = vsel %vm6556_vm14, %v5608_v42, %v4583_v31  ;;  %v1634_v31 = vadd.f32 %v1633_v59, %v6695_v18  ;;  %v4022_v18 = vsel %vm6151_vm10, %v4017_v29, %v4021_v39  ;;  %v4482_v59 = vld [vmem:[#allocation2 + $0x6c] sm:$0xe] }
 0x236   : > { %v2051_v30 = vadd.f32 %v2011_v24, %v1631_v12  ;;  %5639 = vmatmul.msk.bf16.gmra.mxu0 %vm1264_vm11, %v4697_v19  ;;  %v4587_v19 = vsel %vm6556_vm14, %v4585_v43, %v4586_v56  ;;  %v4672_v41 = vunpack.c.l.b16 %v4584_v11  ;;  %v3251_v12 = vunpack.c.l.b16 %v3168_v55  ;;  %v5844_v43 = vld [vmem:[#allocation2 + $0x70] sm:$0xf] }
 0x237   : > { %v4673_v42 = vunpack.c.l.b16 %v4587_v19  ;;  %v4027_v24 = vrot.slane %v4026_v50, 4  ;;  %v3174_v56 = vrot.slane %v5844_v43, 5  ;;  %v4034_v11 = vshrl.u32 %v3817_v48, 16 }
 0x238   : > { %v4037_v55 = vshll.u32 %v3817_v48, 16  ;;  %v4248_v25 = vunpack.c.l.b16 %v4022_v18  ;;  %v7142_v48 = vld [vmem:[#allocation2 + $0x80] sm:$0x1] }
 0x239   : > { %v4698_v35 = vpack.c.b16 %v4673_v42, %v4672_v41  ;;  %v4032_v27 = vsel %vm6151_vm10, %v4027_v24, %v4031_v61  ;;  %v3176_v29 = vrot.slane %v3174_v56, 4  ;;  %v5845_v42 = vld [vmem:[#allocation2 + $0x74] sm:$0x1] }
 0x23a   : > { %v2325_v14 = vpop.f32.mrf.mxu3  ;;  %5560 = vmatmul.msk.bf16.gmra.mxu2 %vm1264_vm11, %v5716_v22  ;;  %v1635_v36 = vpop.f32.mrf.mxu1  ;;  %v3276_v22 = vpack.c.b16 %v3252_v57, %v3251_v12  ;;  %v4249_v19 = vunpack.c.l.b16 %v4032_v27  ;;  %v5717_v12 = vld [vmem:[#allocation2 + $0x6c] sm:$0xff] }
 0x23b   : > { %v2365_v54 = vadd.f32 %v2325_v14, %v2051_v30  ;;  %v3007_v1 = vpop.f32.mrf.mxu0  ;;  %v7125_v30 = vld [vmem:[#allocation2 + $0x7c] sm:$0xf]  ;;  %v3060_v14 = vld [vmem:[#allocation2 + $0x6c] sm:$0xe]  ;;  %v1636_v47 = vadd.f32 %v1635_v36, %v6710_v0  ;;  %v4036_v0 = vrot.slane %v4034_v11, 4  ;;  %v4039_v36 = vrot.slane %v4037_v55, 5 }
 0x23c   : > { %v4043_v58 = vshll.u32 %v7125_v30, 16  ;;  %v4047_v50 = vshrl.u32 %v7125_v30, 16  ;;  %v5434_v57 = vrot.slane %v3060_v14, 9  ;;  %v4273_v18 = vpack.c.b16 %v4249_v19, %v4248_v25  ;;  %v7555_v55 = vld [vmem:[#allocation9_spill] sm:$0xff] }
 0x23d   : > { %v2014_v9 = vpop.f32.mrf.mxu2  ;;  %v7122_v3 = vadd.f32 %v3007_v1, %v2365_v54  ;;  %v5609_v54 = vrot.slane %v4482_v59, 9  ;;  %v4592_v1 = vrot.slane %v4590_v4, 4  ;;  %v4040_v11 = vor.u32 %v4039_v36, %v4036_v0 }
 0x23e   : > { %v2052_v62 = vadd.f32 %v2014_v9, %v1634_v31  ;;  %v4593_v31 = vrot.slane %v7109_v7, 5  ;;  %v7140_v24 = vrot.slane %v4043_v58, 5  ;;  %v4049_v61 = vrot.slane %v4047_v50, 4  ;;  %v3820_v50 = vld [vmem:[#allocation2 + $0x84] sm:$0xf] }
 0x23f   : > { %5592 = vmatmul.msk.bf16.gmra.mxu3 %vm1264_vm11, %v4272_v37  ;;  %v4591_v7 = vsel %vm6556_vm14, %v5609_v54, %v4590_v4  ;;  %v4053_v4 = vshll.u32 %v7142_v48, 16  ;;  %v7156_v54 = vld [vmem:[#allocation2 + $0x88] sm:$0xf] }
 0x240   : > { %v4594_v59 = vsel %vm6556_vm14, %v4592_v1, %v4593_v31  ;;  %v4041_v31 = vrot.slane %v4040_v11, 4 }
 0x241   : > { %v4675_v19 = vunpack.c.l.b16 %v4594_v59 }
 0x242   : > { %v2328_v15 = vpop.f32.mrf.mxu3  ;;  %v1638_v60 = vpop.f32.mrf.mxu1 }
 0x243   : > { %v2366_v23 = vadd.f32 %v2328_v15, %v2052_v62  ;;  %v3010_v39 = vpop.f32.mrf.mxu0  ;;  %v3177_v62 = vrot.slane %v5845_v42, 5  ;;  %v1639_v58 = vadd.f32 %v1638_v60, %v7555_v55  ;;  %v4067_v60 = vshll.u32 %v7156_v54, 16  ;;  %v4483_v55 = vld [vmem:[#allocation2 + $0x78] sm:$0xe] }
 0x244   : > { %v4071_v42 = vshrl.u32 %v7156_v54, 16 }
 0x245   : > { %v2016_v37 = vpop.f32.mrf.mxu2  ;;  %5465 = vmatmul.msk.bf16.gmra.mxu1 %vm1264_vm11, %v3276_v22  ;;  %v7137_v41 = vadd.f32 %v3010_v39, %v2366_v23  ;;  %v3178_v27 = vsel %vm6556_vm14, %v3176_v29, %v3177_v62  ;;  %v4050_v23 = vor.u32 %v4049_v61, %v7140_v24  ;;  %v4061_v29 = vshll.u32 %v3820_v50, 16 }
 0x246   : > { %v2053_v9 = vadd.f32 %v2016_v37, %v1636_v47  ;;  %5640 = vmatmul.msk.bf16.gmra.mxu0 %vm1264_vm11, %v4698_v35  ;;  %v3175_v35 = vsel %vm6556_vm14, %v5434_v57, %v3174_v56  ;;  %v3254_v25 = vunpack.c.l.b16 %v3178_v27  ;;  %v4674_v56 = vunpack.c.l.b16 %v4591_v7  ;;  %v5846_v7 = vld [vmem:[#allocation2 + $0x7c] sm:$0xf] }
 0x247   : > { %v3253_v47 = vunpack.c.l.b16 %v3175_v35  ;;  %v4058_v57 = vshrl.u32 %v3820_v50, 16  ;;  %v3181_v59 = vrot.slane %v5846_v7, 5  ;;  %v7170_v50 = vrot.slane %v4067_v60, 5 }
 0x248   : > { %v4699_v0 = vpack.c.b16 %v4675_v19, %v4674_v56  ;;  %v5718_v56 = vld [vmem:[#allocation2 + $0x78] sm:$0xff] }
 0x249   : > { %v3277_v62 = vpack.c.b16 %v3254_v25, %v3253_v47  ;;  %v4060_v11 = vrot.slane %v4058_v57, 4  ;;  %v7173_v47 = vld [vmem:[#allocation2 + $0x8c] sm:$0x1]  ;;  %v5610_v57 = vrot.slane %v4483_v55, 9 }
 0x24a   : > { %v2330_v22 = vpop.f32.mrf.mxu3  ;;  %5561 = vmatmul.msk.bf16.gmra.mxu2 %vm1264_vm11, %v5717_v12  ;;  %v1640_v15 = vpop.f32.mrf.mxu1  ;;  %v4055_v12 = vrot.slane %v4053_v4, 5  ;;  %v7556_v4 = vld [vmem:[#allocation10_spill] sm:$0xff] }
 0x24b   : > { %v2367_v43 = vadd.f32 %v2330_v22, %v2053_v9  ;;  %v3012_v14 = vpop.f32.mrf.mxu0  ;;  %v4051_v9 = vrot.slane %v4050_v23, 4  ;;  %v4597_v22 = vrot.slane %v7125_v30, 5  ;;  %v4073_v30 = vrot.slane %v4071_v42, 4 }
 0x24d   : > { %v2019_v39 = vpop.f32.mrf.mxu2  ;;  %v7158_v37 = vadd.f32 %v3012_v14, %v2367_v43  ;;  %v4056_v27 = vsel %vm6151_vm10, %v4051_v9, %v4055_v12  ;;  %v3061_v43 = vld [vmem:[#allocation2 + $0x78] sm:$0xe]  ;;  %v1641_v14 = vadd.f32 %v1640_v15, %v7556_v4  ;;  %v4599_v60 = vrot.slane %v4597_v22, 4 }
 0x24e   : > { %v2054_v1 = vadd.f32 %v2019_v39, %v1639_v58  ;;  %v4063_v58 = vrot.slane %v4061_v29, 5  ;;  %v5435_v19 = vrot.slane %v3061_v43, 9  ;;  %v4251_v12 = vunpack.c.l.b16 %v4056_v27 }
 0x24f   : > { %5593 = vmatmul.msk.bf16.gmra.mxu3 %vm1264_vm11, %v4273_v18  ;;  %v4046_v18 = vsel %vm6151_vm10, %v4041_v31, %v7140_v24  ;;  %v5847_v31 = vld [vmem:[#allocation2 + $0x80] sm:$0x1]  ;;  %v4600_v29 = vrot.slane %v7142_v48, 5  ;;  %v4598_v48 = vsel %vm6556_vm14, %v5610_v57, %v4597_v22 }
 0x250   : > { %v3184_v9 = vrot.slane %v5847_v31, 5  ;;  %v4250_v15 = vunpack.c.l.b16 %v4046_v18  ;;  %v4064_v42 = vor.u32 %v4063_v58, %v4060_v11  ;;  %v3182_v43 = vsel %vm6556_vm14, %v5435_v19, %v3181_v59 }
 0x251   : > { %v4676_v22 = vunpack.c.l.b16 %v4598_v48  ;;  %v4604_v31 = vrot.slane %v7156_v54, 5 }
 0x252   : > { %v2333_v36 = vpop.f32.mrf.mxu3  ;;  %v3366_v61 = vpop.f32.mrf.mxu1  ;;  %v4274_v27 = vpack.c.b16 %v4251_v12, %v4250_v15  ;;  %v4065_v4 = vrot.slane %v4064_v42, 4  ;;  %v4484_v12 = vld [vmem:[#allocation2 + $0x84] sm:$0xe]  ;;  %v5848_v42 = vld [vmem:[#allocation2 + $0x88] sm:$0xf] }
 0x253   : > { %v2368_v35 = vadd.f32 %v2333_v36, %v2054_v1  ;;  %v3015_v23 = vpop.f32.mrf.mxu0  ;;  %v3183_v1 = vrot.slane %v3181_v59, 4  ;;  %v4077_v36 = vshll.u32 %v7173_v47, 16  ;;  %v3446_v58 = vadd.f32 %v3366_v61, %v6753_v26 }
 0x254   : > { %v4070_v26 = vsel %vm6151_vm10, %v4065_v4, %v7170_v50  ;;  %v4607_v4 = vrot.slane %v7173_v47, 5 }
 0x255   : > { %v2021_v39 = vpop.f32.mrf.mxu2  ;;  %5466 = vmatmul.msk.bf16.gmra.mxu1 %vm1264_vm11, %v3277_v62  ;;  %v7175_v25 = vadd.f32 %v3015_v23, %v2368_v35  ;;  %v4074_v62 = vor.u32 %v4073_v30, %v7170_v50  ;;  %v4601_v23 = vsel %vm6556_vm14, %v4599_v60, %v4600_v29  ;;  %v4079_v55 = vrot.slane %v4077_v36, 5  ;;  %v3062_v50 = vld [vmem:[#allocation2 + $0x84] sm:$0xe] }
 0x256   : > { %v2055_v24 = vadd.f32 %v2021_v39, %v1641_v14  ;;  %5641 = vmatmul.msk.bf16.gmra.mxu0 %vm1264_vm11, %v4699_v0  ;;  %v3185_v0 = vsel %vm6556_vm14, %v3183_v1, %v3184_v9  ;;  %v3255_v39 = vunpack.c.l.b16 %v3182_v43  ;;  %v4677_v19 = vunpack.c.l.b16 %v4601_v23  ;;  %v7196_v9 = vld [vmem:[#allocation2 + $0x94] sm:$0xf]  ;;  %v7209_v43 = vld [vmem:[%s7534_s2] ss:$0 sm:$0xff] }
 0x257   : > { %v4075_v14 = vrot.slane %v4074_v62, 4  ;;  %v3256_v59 = vunpack.c.l.b16 %v3185_v0  ;;  %v3188_v62 = vrot.slane %v5848_v42, 5  ;;  %v4091_v0 = vshll.u32 %v7196_v9, 16 }
 0x258   : > { %v4700_v54 = vpack.c.b16 %v4677_v19, %v4676_v22  ;;  %v4252_v48 = vunpack.c.l.b16 %v4070_v26  ;;  %v5611_v23 = vrot.slane %v4484_v12, 9  ;;  %v5849_v19 = vld [vmem:[#allocation2 + $0x8c] sm:$0x1] }
 0x259   : > { %v3278_v15 = vpack.c.b16 %v3256_v59, %v3255_v39  ;;  %v4080_v61 = vsel %vm6151_vm10, %v4075_v14, %v4079_v55  ;;  %v5719_v59 = vld [vmem:[#allocation2 + $0x84] sm:$0xff]  ;;  %v3190_v22 = vrot.slane %v3188_v62, 4 }
 0x25a   : > { %v2335_v7 = vpop.f32.mrf.mxu3  ;;  %5562 = vmatmul.msk.bf16.gmra.mxu2 %vm1264_vm11, %v5718_v56  ;;  %v3368_v35 = vpop.f32.mrf.mxu1 }
 0x25b   : > { %v2369_v18 = vadd.f32 %v2335_v7, %v2055_v24  ;;  %v3017_v11 = vpop.f32.mrf.mxu0  ;;  %v3823_v24 = vld [vmem:[#allocation2 + $0x90] sm:$0xf]  ;;  %v3447_v55 = vadd.f32 %v3368_v35, %v6762_v45  ;;  %v7221_v35 = vld [vmem:[#allocation2 + $0x98] sm:$0x1] }
 0x25c   : > { %v4082_v57 = vshrl.u32 %v3823_v24, 16  ;;  %v4085_v36 = vshll.u32 %v3823_v24, 16  ;;  %v5436_v24 = vrot.slane %v3062_v50, 9 }
 0x25d   : > { %v3681_v30 = vpop.f32.mrf.mxu2  ;;  %v7191_v56 = vadd.f32 %v3017_v11, %v2369_v18  ;;  %v4095_v18 = vshrl.u32 %v7196_v9, 16  ;;  %v4253_v11 = vunpack.c.l.b16 %v4080_v61  ;;  %v7219_v61 = vrot.slane %v4091_v0, 5 }
 0x25e   : > { %v3761_v1 = vadd.f32 %v3681_v30, %v3446_v58  ;;  %v4606_v30 = vrot.slane %v4604_v31, 4  ;;  %v4084_v39 = vrot.slane %v4082_v57, 4  ;;  %v4605_v57 = vsel %vm6556_vm14, %v5611_v23, %v4604_v31 }
 0x25f   : > { %5594 = vmatmul.msk.bf16.gmra.mxu3 %vm1264_vm11, %v4274_v27  ;;  %v4097_v45 = vrot.slane %v4095_v18, 4  ;;  %v4275_v12 = vpack.c.b16 %v4253_v11, %v4252_v48  ;;  %v4101_v48 = vshll.u32 %v7221_v35, 16 }
 0x262   : > { %v4363_v29 = vpop.f32.mrf.mxu3  ;;  %v3371_v60 = vpop.f32.mrf.mxu1 }
 0x263   : > { %v4443_v7 = vadd.f32 %v4363_v29, %v3761_v1  ;;  %v4789_v27 = vpop.f32.mrf.mxu0  ;;  %v3191_v1 = vrot.slane %v5849_v19, 5  ;;  %v4087_v29 = vrot.slane %v4085_v36, 5  ;;  %v4608_v36 = vsel %vm6556_vm14, %v4606_v30, %v4607_v4  ;;  %v7242_v30 = vld [vmem:[#allocation2 + $0xa0] sm:$0xf] }
 0x264   : > { %v3448_v4 = vadd.f32 %v3371_v60, %v6772_v44  ;;  %v4115_v44 = vshll.u32 %v7242_v30, 16  ;;  %v4119_v60 = vshrl.u32 %v7242_v30, 16 }
 0x265   : > { %v4869_v14 = vadd.f32 %v4789_v27, %v4443_v7  ;;  %v3683_v58 = vpop.f32.mrf.mxu2  ;;  %5467 = vmatmul.msk.bf16.gmra.mxu1 %vm1264_vm11, %v3278_v15  ;;  %v3189_v7 = vsel %vm6556_vm14, %v5436_v24, %v3188_v62  ;;  %v3192_v50 = vsel %vm6556_vm14, %v3190_v22, %v3191_v1  ;;  %v4088_v31 = vor.u32 %v4087_v29, %v4084_v39  ;;  %v3826_v62 = vld [vmem:[#allocation2 + $0x9c] sm:$0xf] }
 0x266   : > { %5642 = vmatmul.msk.bf16.gmra.mxu0 %vm1264_vm11, %v4700_v54  ;;  %v3762_v47 = vadd.f32 %v3683_v58, %v3447_v55  ;;  %v4098_v27 = vor.u32 %v4097_v45, %v7219_v61  ;;  %v3257_v55 = vunpack.c.l.b16 %v3189_v7  ;;  %v3258_v58 = vunpack.c.l.b16 %v3192_v50 }
 0x267   : > { %v4905_v26 = vadd.f32 %v7209_v43, %v4869_v14  ;;  %v4679_v39 = vunpack.c.l.b16 %v4608_v36  ;;  %v4089_v24 = vrot.slane %v4088_v31, 4  ;;  %v4103_v29 = vrot.slane %v4101_v48, 5  ;;  %v4485_v36 = vld [vmem:[#allocation2 + $0x90] sm:$0xe]  ;;  %v5850_v31 = vld [vmem:[#allocation2 + $0x94] sm:$0xf] }
 0x268   : > { %v4099_v1 = vrot.slane %v4098_v27, 4  ;;  %v4611_v50 = vrot.slane %v7196_v9, 5 }
 0x269   : > { %v4937_v15 = vmax.f32 %v4905_v26, 0.0  ;;  %v4106_v26 = vshrl.u32 %v3826_v62, 16  ;;  %v4094_v27 = vsel %vm6151_vm10, %v4089_v24, %v7219_v61  ;;  %v4614_v61 = vrot.slane %v7221_v35, 5  ;;  %v7261_v24 = vld [vmem:[#allocation2 + $0xa4] sm:$0x1] }
 0x26a   : > { %v4365_v42 = vpop.f32.mrf.mxu3  ;;  %5563 = vmatmul.msk.bf16.gmra.mxu2 %vm1264_vm11, %v5719_v59  ;;  %v3373_v54 = vpop.f32.mrf.mxu1  ;;  %v4678_v59 = vunpack.c.l.b16 %v4605_v57  ;;  %v4104_v48 = vsel %vm6151_vm10, %v4099_v1, %v4103_v29  ;;  %v4125_v35 = vshll.u32 %v7261_v24, 16 }
 0x26b   : > { %v4969_v0 = vpack.c.bf16 %v4937_v15, %v4937_v15  ;;  %v4444_v18 = vadd.f32 %v4365_v42, %v3762_v47  ;;  %v4791_v11 = vpop.f32.mrf.mxu0  ;;  %v4109_v47 = vshll.u32 %v3826_v62, 16  ;;  %v3279_v15 = vpack.c.b16 %v3258_v58, %v3257_v55 }
 0x26c   : > { %v4701_v42 = vpack.c.b16 %v4679_v39, %v4678_v59  ;;  %v7254_v55 = vrot.slane %v4115_v44, 5  ;;  %v4121_v58 = vrot.slane %v4119_v60, 4  ;;  %v3449_v62 = vadd.f32 %v3373_v54, %v6781_v20 }
 0x26d   : > { %5001 = vst.msk [vmem:[%s7228_s8] sm:$0xf] %vm211_vm0, %v4969_v0  ;;  %v4870_v23 = vadd.f32 %v4791_v11, %v4444_v18  ;;  %v3686_v14 = vpop.f32.mrf.mxu2  ;;  %v3063_v11 = vld [vmem:[#allocation2 + $0x90] sm:$0xe]  ;;  %v5612_v39 = vrot.slane %v4485_v36, 9  ;;  %v4255_v20 = vunpack.c.l.b16 %v4104_v48  ;;  %v4613_v54 = vrot.slane %v4611_v50, 4 }
 0x26e   : > { %v3763_v19 = vadd.f32 %v3686_v14, %v3448_v4  ;;  %v4108_v4 = vrot.slane %v4106_v26, 4  ;;  %v4111_v14 = vrot.slane %v4109_v47, 5  ;;  %v5437_v1 = vrot.slane %v3063_v11, 9  ;;  %v5851_v26 = vld [vmem:[#allocation2 + $0x98] sm:$0x1] }
 0x26f   : > { %v4906_v22 = vadd.f32 %v7209_v43, %v4870_v23  ;;  %5595 = vmatmul.msk.bf16.gmra.mxu3 %vm1264_vm11, %v4275_v12  ;;  %v3195_v12 = vrot.slane %v5850_v31, 5  ;;  %v3198_v47 = vrot.slane %v5851_v26, 5  ;;  %v4612_v31 = vsel %vm6556_vm14, %v5612_v39, %v4611_v50  ;;  %v3829_v26 = vld [vmem:[#allocation2 + $0xa8] sm:$0xf] }
 0x271   : > { %v4938_v45 = vmax.f32 %v4906_v22, 0.0  ;;  %v5720_v22 = vld [vmem:[#allocation2 + $0x90] sm:$0xff]  ;;  %v3197_v29 = vrot.slane %v3195_v12, 4 }
 0x272   : > { %v4368_v7 = vpop.f32.mrf.mxu3  ;;  %v3376_v57 = vpop.f32.mrf.mxu1 }
 0x273   : > { %v4970_v0 = vpack.c.bf16 %v4938_v45, %v4938_v45  ;;  %v4445_v18 = vadd.f32 %v4368_v7, %v3763_v19  ;;  %v4794_v23 = vpop.f32.mrf.mxu0  ;;  %v4254_v19 = vunpack.c.l.b16 %v4094_v27  ;;  %v4112_v45 = vor.u32 %v4111_v14, %v4108_v4 }
 0x275   : > { %5002 = vst.msk [vmem:[%s7228_s8 + $0x4] sm:$0xf] %vm211_vm0, %v4970_v0  ;;  %v4871_v9 = vadd.f32 %v4794_v23, %v4445_v18  ;;  %v3688_v59 = vpop.f32.mrf.mxu2  ;;  %5468 = vmatmul.msk.bf16.gmra.mxu1 %vm1264_vm11, %v3279_v15  ;;  %v4122_v15 = vor.u32 %v4121_v58, %v7254_v55  ;;  %v3199_v18 = vsel %vm6556_vm14, %v3197_v29, %v3198_v47  ;;  %v4113_v14 = vrot.slane %v4112_v45, 4  ;;  %v4486_v45 = vld [vmem:[#allocation2 + $0x9c] sm:$0xe] }
 0x276   : > { %5643 = vmatmul.msk.bf16.gmra.mxu0 %vm1264_vm11, %v4701_v42  ;;  %v3764_v60 = vadd.f32 %v3688_v59, %v3449_v62  ;;  %v3196_v42 = vsel %vm6556_vm14, %v5437_v1, %v3195_v12  ;;  %v4276_v11 = vpack.c.b16 %v4255_v20, %v4254_v19  ;;  %v4615_v23 = vsel %vm6556_vm14, %v4613_v54, %v4614_v61  ;;  %v7557_v62 = vld [vmem:[#allocation11_spill] sm:$0xff] }
 0x277   : > { %v4907_v44 = vadd.f32 %v7209_v43, %v4871_v9  ;;  %v4123_v58 = vrot.slane %v4122_v15, 4  ;;  %v4127_v9 = vrot.slane %v4125_v35, 5  ;;  %v3450_v59 = vadd.f32 %v3376_v57, %v7557_v62  ;;  %v7558_v62 = vld [vmem:[#allocation12_spill] sm:$0xff] }
 0x278   : > { %v3259_v12 = vunpack.c.l.b16 %v3196_v42  ;;  %v4680_v1 = vunpack.c.l.b16 %v4612_v31  ;;  %v4681_v29 = vunpack.c.l.b16 %v4615_v23  ;;  %v4118_v47 = vsel %vm6151_vm10, %v4113_v14, %v7254_v55  ;;  %v5852_v31 = vld [vmem:[#allocation2 + $0xa0] sm:$0xf] }
 0x279   : > { %v4939_v7 = vmax.f32 %v4907_v44, 0.0  ;;  %v4618_v44 = vrot.slane %v7242_v30, 5  ;;  %v4128_v54 = vsel %vm6151_vm10, %v4123_v58, %v4127_v9  ;;  %v4130_v15 = vshrl.u32 %v3829_v26, 16 }
 0x27a   : > { %v4370_v36 = vpop.f32.mrf.mxu3  ;;  %5564 = vmatmul.msk.bf16.gmra.mxu2 %vm1264_vm11, %v5720_v22  ;;  %v3378_v0 = vpop.f32.mrf.mxu1  ;;  %v3260_v22 = vunpack.c.l.b16 %v3199_v18  ;;  %v4702_v35 = vpack.c.b16 %v4681_v29, %v4680_v1  ;;  %v3202_v42 = vrot.slane %v5852_v31, 5  ;;  %v4133_v18 = vshll.u32 %v3829_v26, 16  ;;  %v5721_v1 = vld [vmem:[#allocation2 + $0x9c] sm:$0xff] }
 0x27b   : > { %v4971_v27 = vpack.c.bf16 %v4939_v7, %v4939_v7  ;;  %v4446_v48 = vadd.f32 %v4370_v36, %v3764_v60  ;;  %v4796_v4 = vpop.f32.mrf.mxu0  ;;  %v7285_v60 = vld [vmem:[#allocation2 + $0xac] sm:$0xf]  ;;  %v4257_v14 = vunpack.c.l.b16 %v4128_v54  ;;  %v5613_v58 = vrot.slane %v4486_v45, 9 }
 0x27c   : > { %v3280_v20 = vpack.c.b16 %v3260_v22, %v3259_v12  ;;  %v4139_v30 = vshll.u32 %v7285_v60, 16  ;;  %v4620_v9 = vrot.slane %v4618_v44, 4  ;;  %v4621_v12 = vrot.slane %v7261_v24, 5 }
 0x27d   : > { %5003 = vst.msk [vmem:[%s7228_s8 + $0x8] sm:$0xf] %vm211_vm0, %v4971_v27  ;;  %v4872_v50 = vadd.f32 %v4796_v4, %v4446_v48  ;;  %v3691_v39 = vpop.f32.mrf.mxu2  ;;  %v3064_v48 = vld [vmem:[#allocation2 + $0x9c] sm:$0xe]  ;;  %v4256_v4 = vunpack.c.l.b16 %v4118_v47  ;;  %v4132_v22 = vrot.slane %v4130_v15, 4  ;;  %v3204_v26 = vrot.slane %v3202_v42, 4 }
 0x27e   : > { %v3765_v61 = vadd.f32 %v3691_v39, %v3450_v59  ;;  %v3451_v59 = vadd.f32 %v3378_v0, %v7558_v62  ;;  %v5438_v29 = vrot.slane %v3064_v48, 9  ;;  %v4135_v47 = vrot.slane %v4133_v18, 5  ;;  %v7298_v0 = vld [vmem:[#allocation2 + $0xb0] sm:$0x1] }
 0x27f   : > { %v4908_v19 = vadd.f32 %v7209_v43, %v4872_v50  ;;  %5596 = vmatmul.msk.bf16.gmra.mxu3 %vm1264_vm11, %v4276_v11  ;;  %v4143_v11 = vshrl.u32 %v7285_v60, 16  ;;  %v4141_v45 = vrot.slane %v4139_v30, 5  ;;  %v4277_v31 = vpack.c.b16 %v4257_v14, %v4256_v4 }
 0x280   : > { %v4619_v24 = vsel %vm6556_vm14, %v5613_v58, %v4618_v44  ;;  %v4622_v18 = vsel %vm6556_vm14, %v4620_v9, %v4621_v12  ;;  %v4136_v48 = vor.u32 %v4135_v47, %v4132_v22  ;;  %v4149_v4 = vshll.u32 %v7298_v0, 16  ;;  %v7559_v58 = vld [vmem:[#allocation13_spill] sm:$0xff] }
 0x281   : > { %v4940_v57 = vmax.f32 %v4908_v19, 0.0  ;;  %v5853_v19 = vld [vmem:[#allocation2 + $0xa4] sm:$0x1]  ;;  %v4682_v12 = vunpack.c.l.b16 %v4619_v24 }
 0x282   : > { %v4373_v7 = vpop.f32.mrf.mxu3  ;;  %v3381_v36 = vpop.f32.mrf.mxu1  ;;  %v4137_v22 = vrot.slane %v4136_v48, 4 }
 0x283   : > { %v4972_v27 = vpack.c.bf16 %v4940_v57, %v4940_v57  ;;  %v4447_v55 = vadd.f32 %v4373_v7, %v3765_v61  ;;  %v4799_v23 = vpop.f32.mrf.mxu0  ;;  %v3205_v61 = vrot.slane %v5853_v19, 5  ;;  %v4145_v7 = vrot.slane %v4143_v11, 4 }
 0x284   : > { %v4142_v24 = vsel %vm6151_vm10, %v4137_v22, %v4141_v45  ;;  %v7330_v22 = vld [vmem:[#allocation2 + $0xbc] sm:$0x1] }
 0x285   : > { %5004 = vst.msk [vmem:[%s7228_s8 + $0xc] sm:$0xf] %vm211_vm0, %v4972_v27  ;;  %v4873_v50 = vadd.f32 %v4799_v23, %v4447_v55  ;;  %v3693_v39 = vpop.f32.mrf.mxu2  ;;  %5469 = vmatmul.msk.bf16.gmra.mxu1 %vm1264_vm11, %v3280_v20  ;;  %v3203_v27 = vsel %vm6556_vm14, %v5438_v29, %v3202_v42  ;;  %v3206_v55 = vsel %vm6556_vm14, %v3204_v26, %v3205_v61  ;;  %v7313_v42 = vld [vmem:[#allocation2 + $0xb8] sm:$0xf]  ;;  %v4151_v61 = vrot.slane %v4149_v4, 5 }
 0x286   : > { %5644 = vmatmul.msk.bf16.gmra.mxu0 %vm1264_vm11, %v4702_v35  ;;  %v3766_v54 = vadd.f32 %v3693_v39, %v3451_v59  ;;  %v4146_v23 = vor.u32 %v4145_v7, %v4141_v45  ;;  %v3261_v62 = vunpack.c.l.b16 %v3203_v27  ;;  %v3262_v59 = vunpack.c.l.b16 %v3206_v55  ;;  %v3832_v39 = vld [vmem:[#allocation2 + $0xb4] sm:$0xf]  ;;  %v5854_v55 = vld [vmem:[#allocation2 + $0xac] sm:$0xf] }
 0x287   : > { %v4909_v57 = vadd.f32 %v7209_v43, %v4873_v50  ;;  %v3452_v50 = vadd.f32 %v3381_v36, %v7559_v58  ;;  %v4154_v47 = vshrl.u32 %v3832_v39, 16  ;;  %v4163_v36 = vshll.u32 %v7313_v42, 16 }
 0x288   : > { %v4147_v19 = vrot.slane %v4146_v23, 4  ;;  %v3209_v48 = vrot.slane %v5854_v55, 5 }
 0x289   : > { %v4941_v20 = vmax.f32 %v4909_v57, 0.0  ;;  %v4157_v57 = vshll.u32 %v3832_v39, 16  ;;  %v4156_v58 = vrot.slane %v4154_v47, 4  ;;  %v5855_v47 = vld [vmem:[#allocation2 + $0xb0] sm:$0x1] }
 0x28a   : > { %v4375_v15 = vpop.f32.mrf.mxu3  ;;  %5565 = vmatmul.msk.bf16.gmra.mxu2 %vm1264_vm11, %v5721_v1  ;;  %v3383_v35 = vpop.f32.mrf.mxu1  ;;  %v4683_v1 = vunpack.c.l.b16 %v4622_v18  ;;  %v4487_v18 = vld [vmem:[#allocation2 + $0xa8] sm:$0xe]  ;;  %v4152_v4 = vsel %vm6151_vm10, %v4147_v19, %v4151_v61  ;;  %v3211_v61 = vrot.slane %v3209_v48, 4 }
 0x28b   : > { %v4973_v30 = vpack.c.bf16 %v4941_v20, %v4941_v20  ;;  %v4448_v11 = vadd.f32 %v4375_v15, %v3766_v54  ;;  %v4801_v44 = vpop.f32.mrf.mxu0  ;;  %v4167_v54 = vshrl.u32 %v7313_v42, 16  ;;  %v3281_v20 = vpack.c.b16 %v3262_v59, %v3261_v62  ;;  %v7560_v59 = vld [vmem:[#allocation14_spill] sm:$0xff] }
 0x28d   : > { %5005 = vst.msk [vmem:[%s7228_s8 + $0x10] sm:$0xf] %vm211_vm0, %v4973_v30  ;;  %v4874_v14 = vadd.f32 %v4801_v44, %v4448_v11  ;;  %v3696_v9 = vpop.f32.mrf.mxu2  ;;  %v4703_v11 = vpack.c.b16 %v4683_v1, %v4682_v12  ;;  %v3065_v44 = vld [vmem:[#allocation2 + $0xa8] sm:$0xe]  ;;  %v4169_v62 = vrot.slane %v4167_v54, 4  ;;  %v4258_v12 = vunpack.c.l.b16 %v4142_v24 }
 0x28e   : > { %v3767_v26 = vadd.f32 %v3696_v9, %v3452_v50  ;;  %v4159_v50 = vrot.slane %v4157_v57, 5  ;;  %v7324_v9 = vrot.slane %v4163_v36, 5  ;;  %v5614_v1 = vrot.slane %v4487_v18, 9 }
 0x28f   : > { %v4910_v29 = vadd.f32 %v7209_v43, %v4874_v14  ;;  %5597 = vmatmul.msk.bf16.gmra.mxu3 %vm1264_vm11, %v4277_v31  ;;  %v4625_v31 = vrot.slane %v7285_v60, 5  ;;  %v3453_v60 = vadd.f32 %v3383_v35, %v7560_v59  ;;  %v5439_v19 = vrot.slane %v3065_v44, 9 }
 0x290   : > { %v3212_v57 = vrot.slane %v5855_v47, 5  ;;  %v4628_v35 = vrot.slane %v7298_v0, 5  ;;  %v4173_v24 = vshll.u32 %v7330_v22, 16 }
 0x291   : > { %v4942_v7 = vmax.f32 %v4910_v29, 0.0  ;;  %v5722_v29 = vld [vmem:[#allocation2 + $0xa8] sm:$0xff] }
 0x292   : > { %v4378_v15 = vpop.f32.mrf.mxu3  ;;  %v3386_v27 = vpop.f32.mrf.mxu1  ;;  %v3213_v0 = vsel %vm6556_vm14, %v3211_v61, %v3212_v57  ;;  %v4175_v59 = vrot.slane %v4173_v24, 5  ;;  %v3835_v61 = vld [vmem:[#allocation2 + $0xc0] sm:$0xf]  ;;  %v4632_v57 = vrot.slane %v7313_v42, 5 }
 0x293   : > { %v4974_v30 = vpack.c.bf16 %v4942_v7, %v4942_v7  ;;  %v4449_v23 = vadd.f32 %v4378_v15, %v3767_v26  ;;  %v4804_v14 = vpop.f32.mrf.mxu0  ;;  %v4627_v26 = vrot.slane %v4625_v31, 4  ;;  %v4259_v7 = vunpack.c.l.b16 %v4152_v4 }
 0x294   : > { %v4160_v15 = vor.u32 %v4159_v50, %v4156_v58 }
 0x295   : > { %5006 = vst.msk [vmem:[%s7228_s8 + $0x14] sm:$0xf] %vm211_vm0, %v4974_v30  ;;  %v4875_v45 = vadd.f32 %v4804_v14, %v4449_v23  ;;  %v3698_v39 = vpop.f32.mrf.mxu2  ;;  %5470 = vmatmul.msk.bf16.gmra.mxu1 %vm1264_vm11, %v3281_v20  ;;  %v4170_v20 = vor.u32 %v4169_v62, %v7324_v9  ;;  %v4626_v30 = vsel %vm6556_vm14, %v5614_v1, %v4625_v31  ;;  %v3264_v1 = vunpack.c.l.b16 %v3213_v0  ;;  %v3066_v0 = vld [vmem:[#allocation2 + $0xb4] sm:$0xe] }
 0x296   : > { %5645 = vmatmul.msk.bf16.gmra.mxu0 %vm1264_vm11, %v4703_v11  ;;  %v3768_v54 = vadd.f32 %v3698_v39, %v3453_v60  ;;  %v3210_v23 = vsel %vm6556_vm14, %v5439_v19, %v3209_v48  ;;  %v4278_v14 = vpack.c.b16 %v4259_v7, %v4258_v12  ;;  %v4629_v58 = vsel %vm6556_vm14, %v4627_v26, %v4628_v35  ;;  %v4488_v7 = vld [vmem:[#allocation2 + $0xb4] sm:$0xe] }
 0x297   : > { %v4911_v36 = vadd.f32 %v7209_v43, %v4875_v45  ;;  %v4161_v62 = vrot.slane %v4160_v15, 4  ;;  %v4171_v45 = vrot.slane %v4170_v20, 4  ;;  %v3454_v60 = vadd.f32 %v3386_v27, %v6832_v17 }
 0x298   : > { %v3263_v48 = vunpack.c.l.b16 %v3210_v23  ;;  %v4685_v19 = vunpack.c.l.b16 %v4629_v58  ;;  %v4178_v35 = vshrl.u32 %v3835_v61, 16 }
 0x299   : > { %v4943_v18 = vmax.f32 %v4911_v36, 0.0  ;;  %v4166_v47 = vsel %vm6151_vm10, %v4161_v62, %v7324_v9  ;;  %v7355_v36 = vld [vmem:[#allocation2 + $0xc4] sm:$0xf]  ;;  %v4634_v62 = vrot.slane %v4632_v57, 4 }
 0x29a   : > { %v4380_v55 = vpop.f32.mrf.mxu3  ;;  %5566 = vmatmul.msk.bf16.gmra.mxu2 %vm1264_vm11, %v5722_v29  ;;  %v3388_v11 = vpop.f32.mrf.mxu1  ;;  %v4684_v29 = vunpack.c.l.b16 %v4626_v30  ;;  %v3282_v27 = vpack.c.b16 %v3264_v1, %v3263_v48  ;;  %v4181_v30 = vshll.u32 %v3835_v61, 16  ;;  %v4187_v42 = vshll.u32 %v7355_v36, 16  ;;  %v5723_v48 = vld [vmem:[#allocation2 + $0xb4] sm:$0xff] }
 0x29b   : > { %v4975_v4 = vpack.c.bf16 %v4943_v18, %v4943_v18  ;;  %v4450_v44 = vadd.f32 %v4380_v55, %v3768_v54  ;;  %v4806_v50 = vpop.f32.mrf.mxu0  ;;  %v4176_v54 = vsel %vm6151_vm10, %v4171_v45, %v4175_v59  ;;  %v5856_v18 = vld [vmem:[#allocation2 + $0xb8] sm:$0xf]  ;;  %v3455_v59 = vadd.f32 %v3388_v11, %v6847_v46  ;;  %v7368_v46 = vld [vmem:[#allocation2 + $0xc8] sm:$0x1] }
 0x29c   : > { %v4704_v15 = vpack.c.b16 %v4685_v19, %v4684_v29  ;;  %v3216_v55 = vrot.slane %v5856_v18, 5  ;;  %v4261_v58 = vunpack.c.l.b16 %v4176_v54  ;;  %v5440_v1 = vrot.slane %v3066_v0, 9  ;;  %v5857_v19 = vld [vmem:[#allocation2 + $0xbc] sm:$0x1] }
 0x29d   : > { %5007 = vst.msk [vmem:[%s7228_s8 + $0x18] sm:$0xf] %vm211_vm0, %v4975_v4  ;;  %v4876_v31 = vadd.f32 %v4806_v50, %v4450_v44  ;;  %v3701_v39 = vpop.f32.mrf.mxu2  ;;  %v4191_v4 = vshrl.u32 %v7355_v36, 16  ;;  %v5615_v50 = vrot.slane %v4488_v7, 9  ;;  %v3219_v61 = vrot.slane %v5857_v19, 5 }
 0x29e   : > { %v3769_v26 = vadd.f32 %v3701_v39, %v3454_v60  ;;  %v4635_v60 = vrot.slane %v7330_v22, 5  ;;  %v4180_v39 = vrot.slane %v4178_v35, 4  ;;  %v3218_v29 = vrot.slane %v3216_v55, 4  ;;  %v7385_v19 = vld [vmem:[#allocation2 + $0xd0] sm:$0xf] }
 0x29f   : > { %v4912_v12 = vadd.f32 %v7209_v43, %v4876_v31  ;;  %5598 = vmatmul.msk.bf16.gmra.mxu3 %vm1264_vm11, %v4278_v14  ;;  %v4260_v14 = vunpack.c.l.b16 %v4166_v47  ;;  %v4193_v54 = vrot.slane %v4191_v4, 4  ;;  %v4633_v22 = vsel %vm6556_vm14, %v5615_v50, %v4632_v57 }
 0x2a0   : > { %v4636_v35 = vsel %vm6556_vm14, %v4634_v62, %v4635_v60  ;;  %v3220_v18 = vsel %vm6556_vm14, %v3218_v29, %v3219_v61  ;;  %v4686_v62 = vunpack.c.l.b16 %v4633_v22  ;;  %v3838_v29 = vld [vmem:[#allocation2 + $0xcc] sm:$0xf] }
 0x2a1   : > { %v4944_v17 = vmax.f32 %v4912_v12, 0.0  ;;  %v4183_v12 = vrot.slane %v4181_v30, 5  ;;  %v3266_v50 = vunpack.c.l.b16 %v3220_v18  ;;  %v4202_v18 = vshrl.u32 %v3838_v29, 16 }
 0x2a2   : > { %v4383_v20 = vpop.f32.mrf.mxu3  ;;  %v3391_v24 = vpop.f32.mrf.mxu1 }
 0x2a3   : > { %v4976_v23 = vpack.c.bf16 %v4944_v17, %v4944_v17  ;;  %v4451_v9 = vadd.f32 %v4383_v20, %v3769_v26  ;;  %v4809_v44 = vpop.f32.mrf.mxu0  ;;  %v4189_v17 = vrot.slane %v4187_v42, 5  ;;  %v3217_v20 = vsel %vm6556_vm14, %v5440_v1, %v3216_v55 }
 0x2a4   : > { %v4184_v30 = vor.u32 %v4183_v12, %v4180_v39  ;;  %v4197_v42 = vshll.u32 %v7368_v46, 16  ;;  %v4687_v55 = vunpack.c.l.b16 %v4636_v35  ;;  %v4489_v12 = vld [vmem:[#allocation2 + $0xc0] sm:$0xe] }
 0x2a5   : > { %5008 = vst.msk [vmem:[%s7228_s8 + $0x1c] sm:$0xf] %vm211_vm0, %v4976_v23  ;;  %v4877_v45 = vadd.f32 %v4809_v44, %v4451_v9  ;;  %v3703_v31 = vpop.f32.mrf.mxu2  ;;  %5471 = vmatmul.msk.bf16.gmra.mxu1 %vm1264_vm11, %v3282_v27  ;;  %v4279_v27 = vpack.c.b16 %v4261_v58, %v4260_v14  ;;  %v4194_v0 = vor.u32 %v4193_v54, %v4189_v17  ;;  %v3265_v58 = vunpack.c.l.b16 %v3217_v20  ;;  %v3067_v35 = vld [vmem:[#allocation2 + $0xc0] sm:$0xe] }
 0x2a6   : > { %5646 = vmatmul.msk.bf16.gmra.mxu0 %vm1264_vm11, %v4704_v15  ;;  %v3770_v47 = vadd.f32 %v3703_v31, %v3455_v59  ;;  %v3456_v44 = vadd.f32 %v3391_v24, %v6856_v5  ;;  %v4199_v39 = vrot.slane %v4197_v42, 5 }
 0x2a7   : > { %v4913_v26 = vadd.f32 %v7209_v43, %v4877_v45  ;;  %v4185_v45 = vrot.slane %v4184_v30, 4  ;;  %v4195_v60 = vrot.slane %v4194_v0, 4  ;;  %v3283_v1 = vpack.c.b16 %v3266_v50, %v3265_v58  ;;  %v5859_v50 = vld [vmem:[#allocation2 + $0xc8] sm:$0x1] }
 0x2a8   : > { %v4205_v30 = vshll.u32 %v3838_v29, 16 }
 0x2a9   : > { %v4945_v11 = vmax.f32 %v4913_v26, 0.0  ;;  %v4190_v24 = vsel %vm6151_vm10, %v4185_v45, %v4189_v17  ;;  %v4639_v26 = vrot.slane %v7355_v36, 5 }
 0x2aa   : > { %v4385_v7 = vpop.f32.mrf.mxu3  ;;  %5567 = vmatmul.msk.bf16.gmra.mxu2 %vm1264_vm11, %v5723_v48  ;;  %v3393_v15 = vpop.f32.mrf.mxu1  ;;  %v4262_v42 = vunpack.c.l.b16 %v4190_v24 }
 0x2ab   : > { %v4977_v23 = vpack.c.bf16 %v4945_v11, %v4945_v11  ;;  %v4452_v9 = vadd.f32 %v4385_v7, %v3770_v47  ;;  %v4811_v57 = vpop.f32.mrf.mxu0  ;;  %v5858_v47 = vld [vmem:[#allocation2 + $0xc4] sm:$0xf]  ;;  %v4200_v7 = vsel %vm6151_vm10, %v4195_v60, %v4199_v39  ;;  %v3457_v36 = vadd.f32 %v3393_v15, %v6865_v13 }
 0x2ac   : > { %v3223_v54 = vrot.slane %v5858_v47, 5  ;;  %v4204_v13 = vrot.slane %v4202_v18, 4  ;;  %v4207_v15 = vrot.slane %v4205_v30, 5 }
 0x2ad   : > { %5009 = vst.msk [vmem:[%s7228_s8 + $0x20] sm:$0xf] %vm211_vm0, %v4977_v23  ;;  %v4878_v4 = vadd.f32 %v4811_v57, %v4452_v9  ;;  %v3706_v14 = vpop.f32.mrf.mxu2  ;;  %v4211_v23 = vshll.u32 %v7385_v19, 16  ;;  %v4215_v9 = vshrl.u32 %v7385_v19, 16  ;;  %v5616_v57 = vrot.slane %v4489_v12, 9 }
 0x2ae   : > { %v3771_v31 = vadd.f32 %v3706_v14, %v3456_v44  ;;  %v4641_v44 = vrot.slane %v4639_v26, 4  ;;  %v5441_v14 = vrot.slane %v3067_v35, 9  ;;  %v3225_v58 = vrot.slane %v3223_v54, 4 }
 0x2af   : > { %v4914_v59 = vadd.f32 %v7209_v43, %v4878_v4  ;;  %5599 = vmatmul.msk.bf16.gmra.mxu3 %vm1264_vm11, %v4279_v27  ;;  %v4705_v27 = vpack.c.b16 %v4687_v55, %v4686_v62  ;;  %v5724_v4 = vld [vmem:[#allocation2 + $0xc0] sm:$0xff]  ;;  %v3226_v62 = vrot.slane %v5859_v50, 5  ;;  %v4213_v60 = vrot.slane %v4211_v23, 5 }
 0x2b0   : > { %v4217_v39 = vrot.slane %v4215_v9, 4  ;;  %v3224_v24 = vsel %vm6556_vm14, %v5441_v14, %v3223_v54  ;;  %v4208_v35 = vor.u32 %v4207_v15, %v4204_v13  ;;  %v4646_v13 = vrot.slane %v7385_v19, 5 }
 0x2b1   : > { %v4946_v48 = vmax.f32 %v4914_v59, 0.0  ;;  %v4263_v59 = vunpack.c.l.b16 %v4200_v7  ;;  %v3227_v12 = vsel %vm6556_vm14, %v3225_v58, %v3226_v62  ;;  %v3267_v9 = vunpack.c.l.b16 %v3224_v24  ;;  %v5725_v24 = vld [vmem:[#allocation2 + $0xcc] sm:$0xff] }
 0x2b2   : > { %v4388_v61 = vpop.f32.mrf.mxu3  ;;  %v3396_v5 = vpop.f32.mrf.mxu1  ;;  %v4648_v19 = vrot.slane %v4646_v13, 4 }
 0x2b3   : > { %v4978_v11 = vpack.c.bf16 %v4946_v48, %v4946_v48  ;;  %v4453_v22 = vadd.f32 %v4388_v61, %v3771_v31  ;;  %v4814_v20 = vpop.f32.mrf.mxu0  ;;  %v4642_v31 = vrot.slane %v7368_v46, 5  ;;  %v3458_v30 = vadd.f32 %v3396_v5, %v6884_v40 }
 0x2b5   : > { %5010 = vst.msk [vmem:[%s7228_s8 + $0x24] sm:$0xf] %vm211_vm0, %v4978_v11  ;;  %v4879_v17 = vadd.f32 %v4814_v20, %v4453_v22  ;;  %v3708_v0 = vpop.f32.mrf.mxu2  ;;  %5472 = vmatmul.msk.bf16.gmra.mxu1 %vm1264_vm11, %v3283_v1  ;;  %v7401_v1 = vld [vmem:[#allocation2 + $0xd4] sm:$0x1]  ;;  %v4280_v11 = vpack.c.b16 %v4263_v59, %v4262_v42  ;;  %v4643_v7 = vsel %vm6556_vm14, %v4641_v44, %v4642_v31 }
 0x2b6   : > { %5647 = vmatmul.msk.bf16.gmra.mxu0 %vm1264_vm11, %v4705_v27  ;;  %v3772_v45 = vadd.f32 %v3708_v0, %v3457_v36  ;;  %v4640_v27 = vsel %vm6556_vm14, %v5616_v57, %v4639_v26  ;;  %v4218_v20 = vor.u32 %v4217_v39, %v4213_v60  ;;  %v4221_v18 = vshll.u32 %v7401_v1, 16 }
 0x2b7   : > { %v4915_v55 = vadd.f32 %v7209_v43, %v4879_v17  ;;  %v3268_v17 = vunpack.c.l.b16 %v3227_v12  ;;  %v4688_v26 = vunpack.c.l.b16 %v4640_v27  ;;  %v4689_v0 = vunpack.c.l.b16 %v4643_v7 }
 0x2b8   : > { %v4209_v57 = vrot.slane %v4208_v35, 4  ;;  %v4223_v44 = vrot.slane %v4221_v18, 5 }
 0x2b9   : > { %v4947_v48 = vmax.f32 %v4915_v55, 0.0  ;;  %v3284_v58 = vpack.c.b16 %v3268_v17, %v3267_v9  ;;  %v4706_v40 = vpack.c.b16 %v4689_v0, %v4688_v26 }
 0x2ba   : > { %v4390_v29 = vpop.f32.mrf.mxu3  ;;  %5568 = vmatmul.msk.bf16.gmra.mxu2 %vm1264_vm11, %v5724_v4  ;;  %v3398_v61 = vpop.f32.mrf.mxu1  ;;  %v4219_v4 = vrot.slane %v4218_v20, 4  ;;  %v4214_v59 = vsel %vm6151_vm10, %v4209_v57, %v4213_v60 }
 0x2bb   : > { %v4979_v47 = vpack.c.bf16 %v4947_v48, %v4947_v48  ;;  %v4454_v46 = vadd.f32 %v4390_v29, %v3772_v45  ;;  %v4816_v22 = vpop.f32.mrf.mxu0  ;;  %v3459_v39 = vadd.f32 %v3398_v61, %v6896_v53  ;;  %v4490_v29 = vld [vmem:[#allocation2 + $0xcc] sm:$0xe]  ;;  %v4264_v38 = vunpack.c.l.b16 %v4214_v59 }
 0x2bc   : > { %v4224_v31 = vsel %vm6151_vm10, %v4219_v4, %v4223_v44 }
 0x2bd   : > { %5011 = vst.msk [vmem:[%s7228_s8 + $0x28] sm:$0xf] %vm211_vm0, %v4979_v47  ;;  %v4880_v54 = vadd.f32 %v4816_v22, %v4454_v46  ;;  %v3711_v23 = vpop.f32.mrf.mxu2  ;;  %v4265_v47 = vunpack.c.l.b16 %v4224_v31  ;;  %v5617_v46 = vrot.slane %v4490_v29, 9 }
 0x2be   : > { %v3773_v42 = vadd.f32 %v3711_v23, %v3458_v30 }
 0x2bf   : > { %v4916_v36 = vadd.f32 %v7209_v43, %v4880_v54  ;;  %5600 = vmatmul.msk.bf16.gmra.mxu3 %vm1264_vm11, %v4280_v11  ;;  %v4649_v11 = vrot.slane %v7401_v1, 5  ;;  %v4281_v35 = vpack.c.b16 %v4265_v47, %v4264_v38  ;;  %v4647_v18 = vsel %vm6556_vm14, %v5617_v46, %v4646_v13 }
 0x2c0   : > { %v4690_v17 = vunpack.c.l.b16 %v4647_v18 }
 0x2c1   : > { %v4948_v14 = vmax.f32 %v4916_v36, 0.0  ;;  %v4650_v54 = vsel %vm6556_vm14, %v4648_v19, %v4649_v11 }
 0x2c2   : > { %v4393_v50 = vpop.f32.mrf.mxu3  ;;  %v3401_v62 = vpop.f32.mrf.mxu1  ;;  %v4691_v36 = vunpack.c.l.b16 %v4650_v54 }
 0x2c3   : > { %v4980_v55 = vpack.c.bf16 %v4948_v14, %v4948_v14  ;;  %v4455_v5 = vadd.f32 %v4393_v50, %v3773_v42  ;;  %v4819_v45 = vpop.f32.mrf.mxu0  ;;  %v3460_v1 = vadd.f32 %v3401_v62, %v6912_v32 }
 0x2c4   : > { %v4707_v63 = vpack.c.b16 %v4691_v36, %v4690_v17 }
 0x2c5   : > { %5012 = vst.msk [vmem:[%s7228_s8 + $0x2c] sm:$0xf] %vm211_vm0, %v4980_v55  ;;  %v4881_v15 = vadd.f32 %v4819_v45, %v4455_v5  ;;  %v3713_v48 = vpop.f32.mrf.mxu2  ;;  %5473 = vmatmul.msk.bf16.gmra.mxu1 %vm1264_vm11, %v3284_v58 }
 0x2c6   : > { %5648 = vmatmul.msk.bf16.gmra.mxu0 %vm1264_vm11, %v4706_v40  ;;  %v3774_v60 = vadd.f32 %v3713_v48, %v3459_v39 }
 0x2c7   : > { %v4917_v12 = vadd.f32 %v7209_v43, %v4881_v15 }
 0x2c9   : > { %v4949_v27 = vmax.f32 %v4917_v12, 0.0 }
 0x2ca   : > { %v4395_v22 = vpop.f32.mrf.mxu3  ;;  %5569 = vmatmul.msk.bf16.gmra.mxu2 %vm1264_vm11, %v5725_v24  ;;  %v3403_v53 = vpop.f32.mrf.mxu1 }
 0x2cb   : > { %v4981_v61 = vpack.c.bf16 %v4949_v27, %v4949_v27  ;;  %v4456_v7 = vadd.f32 %v4395_v22, %v3774_v60  ;;  %v4821_v20 = vpop.f32.mrf.mxu0  ;;  %v3461_v32 = vadd.f32 %v3403_v53, %v6928_v28 }
 0x2cd   : > { %5013 = vst.msk [vmem:[%s7228_s8 + $0x30] sm:$0xf] %vm211_vm0, %v4981_v61  ;;  %v4882_v30 = vadd.f32 %v4821_v20, %v4456_v7  ;;  %v3716_v23 = vpop.f32.mrf.mxu2 }
 0x2ce   : > { %v3775_v26 = vadd.f32 %v3716_v23, %v3460_v1 }
 0x2cf   : > { %v4918_v9 = vadd.f32 %v7209_v43, %v4882_v30  ;;  %5601 = vmatmul.msk.bf16.gmra.mxu3 %vm1264_vm11, %v4281_v35 }
 0x2d1   : > { %v4950_v0 = vmax.f32 %v4918_v9, 0.0 }
 0x2d2   : > { %v4398_v42 = vpop.f32.mrf.mxu3  ;;  %v3406_v57 = vpop.f32.mrf.mxu1 }
 0x2d3   : > { %v4982_v4 = vpack.c.bf16 %v4950_v0, %v4950_v0  ;;  %v4457_v44 = vadd.f32 %v4398_v42, %v3775_v26  ;;  %v4824_v14 = vpop.f32.mrf.mxu0  ;;  %v3462_v39 = vadd.f32 %v3406_v57, %v6942_v10 }
 0x2d5   : > { %5014 = vst.msk [vmem:[%s7228_s8 + $0x34] sm:$0xf] %vm211_vm0, %v4982_v4  ;;  %v4883_v58 = vadd.f32 %v4824_v14, %v4457_v44  ;;  %v3718_v50 = vpop.f32.mrf.mxu2 }
 0x2d6   : > { %5649 = vmatmul.msk.bf16.gmra.mxu0 %vm1264_vm11, %v4707_v63  ;;  %v3776_v55 = vadd.f32 %v3718_v50, %v3461_v32 }
 0x2d7   : > { %v4919_v62 = vadd.f32 %v7209_v43, %v4883_v58 }
 0x2d9   : > { %v4951_v40 = vmax.f32 %v4919_v62, 0.0 }
 0x2da   : > { %v4400_v5 = vpop.f32.mrf.mxu3  ;;  %v3408_v45 = vpop.f32.mrf.mxu1 }
 0x2db   : > { %v4983_v59 = vpack.c.bf16 %v4951_v40, %v4951_v40  ;;  %v4458_v31 = vadd.f32 %v4400_v5, %v3776_v55  ;;  %v4826_v13 = vpop.f32.mrf.mxu0  ;;  %v3463_v11 = vadd.f32 %v3408_v45, %v6959_v2 }
 0x2dd   : > { %5015 = vst.msk [vmem:[%s7228_s8 + $0x38] sm:$0xf] %vm211_vm0, %v4983_v59  ;;  %v4884_v15 = vadd.f32 %v4826_v13, %v4458_v31  ;;  %v3721_v48 = vpop.f32.mrf.mxu2 }
 0x2de   : > { %v3777_v29 = vadd.f32 %v3721_v48, %v3462_v39 }
 0x2df   : > { %v4920_v28 = vadd.f32 %v7209_v43, %v4884_v15 }
 0x2e1   : > { %v4952_v24 = vmax.f32 %v4920_v28, 0.0 }
 0x2e2   : > { %v4403_v12 = vpop.f32.mrf.mxu3  ;;  %v3411_v60 = vpop.f32.mrf.mxu1 }
 0x2e3   : > { %v4984_v38 = vpack.c.bf16 %v4952_v24, %v4952_v24  ;;  %v4459_v47 = vadd.f32 %v4403_v12, %v3777_v29  ;;  %v4829_v46 = vpop.f32.mrf.mxu0  ;;  %v3464_v30 = vadd.f32 %v3411_v60, %v6973_v21  ;;  %v7463_v21 = vld [vmem:[%s7534_s2] ss:$0 sm:$0xff] }
 0x2e5   : > { %5016 = vst.msk [vmem:[%s7228_s8 + $0x3c] sm:$0xf] %vm211_vm0, %v4984_v38  ;;  %v4885_v19 = vadd.f32 %v4829_v46, %v4459_v47  ;;  %v3723_v27 = vpop.f32.mrf.mxu2 }
 0x2e6   : > { %v3778_v10 = vadd.f32 %v3723_v27, %v3463_v11 }
 0x2e7   : > { %v4921_v22 = vadd.f32 %v7209_v43, %v4885_v19 }
 0x2e9   : > { %v4953_v53 = vmax.f32 %v4921_v22, 0.0 }
 0x2ea   : > { %v4405_v61 = vpop.f32.mrf.mxu3  ;;  %v3413_v7 = vpop.f32.mrf.mxu1 }
 0x2eb   : > { %v4985_v35 = vpack.c.bf16 %v4953_v53, %v4953_v53  ;;  %v4460_v20 = vadd.f32 %v4405_v61, %v3778_v10  ;;  %v4831_v18 = vpop.f32.mrf.mxu0  ;;  %v3465_v4 = vadd.f32 %v3413_v7, %v6993_v33 }
 0x2ed   : > { %5017 = vst.msk [vmem:[%s7228_s8 + $0x40] sm:$0xf] %vm211_vm0, %v4985_v35  ;;  %v4886_v54 = vadd.f32 %v4831_v18, %v4460_v20  ;;  %v3726_v1 = vpop.f32.mrf.mxu2 }
 0x2ee   : > { %v3779_v2 = vadd.f32 %v3726_v1, %v3464_v30 }
 0x2ef   : > { %v4922_v23 = vadd.f32 %v7209_v43, %v4886_v54 }
 0x2f1   : > { %v4954_v9 = vmax.f32 %v4922_v23, 0.0 }
 0x2f2   : > { %v4408_v17 = vpop.f32.mrf.mxu3  ;;  %v3416_v36 = vpop.f32.mrf.mxu1 }
 0x2f3   : > { %v4986_v26 = vpack.c.bf16 %v4954_v9, %v4954_v9  ;;  %v4461_v0 = vadd.f32 %v4408_v17, %v3779_v2  ;;  %v4834_v42 = vpop.f32.mrf.mxu0  ;;  %v3466_v33 = vadd.f32 %v3416_v36, %v7009_v8 }
 0x2f5   : > { %5018 = vst.msk [vmem:[%s7228_s8 + $0x44] sm:$0xf] %vm211_vm0, %v4986_v26  ;;  %v4887_v57 = vadd.f32 %v4834_v42, %v4461_v0  ;;  %v3728_v63 = vpop.f32.mrf.mxu2 }
 0x2f6   : > { %v3780_v44 = vadd.f32 %v3728_v63, %v3465_v4 }
 0x2f7   : > { %v4923_v43 = vadd.f32 %v7463_v21, %v4887_v57 }
 0x2f9   : > { %v4955_v14 = vmax.f32 %v4923_v43, 0.0 }
 0x2fa   : > { %v4410_v58 = vpop.f32.mrf.mxu3  ;;  %v3418_v32 = vpop.f32.mrf.mxu1 }
 0x2fb   : > { %v4987_v50 = vpack.c.bf16 %v4955_v14, %v4955_v14  ;;  %v4462_v62 = vadd.f32 %v4410_v58, %v3780_v44  ;;  %v4836_v55 = vpop.f32.mrf.mxu0  ;;  %v3467_v24 = vadd.f32 %v3418_v32, %v7025_v16 }
 0x2fd   : > { %5019 = vst.msk [vmem:[%s7228_s8 + $0x48] sm:$0xf] %vm211_vm0, %v4987_v50  ;;  %v4888_v40 = vadd.f32 %v4836_v55, %v4462_v62  ;;  %v3731_v5 = vpop.f32.mrf.mxu2 }
 0x2fe   : > { %v3781_v59 = vadd.f32 %v3731_v5, %v3466_v33 }
 0x2ff   : > { %v4924_v45 = vadd.f32 %v7463_v21, %v4888_v40 }
 0x301   : > { %v4956_v31 = vmax.f32 %v4924_v45, 0.0 }
 0x302   : > { %v4413_v13 = vpop.f32.mrf.mxu3  ;;  %v3421_v15 = vpop.f32.mrf.mxu1 }
 0x303   : > { %v4988_v39 = vpack.c.bf16 %v4956_v31, %v4956_v31  ;;  %v4463_v48 = vadd.f32 %v4413_v13, %v3781_v59  ;;  %v4839_v28 = vpop.f32.mrf.mxu0  ;;  %v3468_v10 = vadd.f32 %v3421_v15, %v7039_v34 }
 0x305   : > { %5020 = vst.msk [vmem:[%s7228_s8 + $0x4c] sm:$0xf] %vm211_vm0, %v4988_v39  ;;  %v4889_v29 = vadd.f32 %v4839_v28, %v4463_v48  ;;  %v3733_v12 = vpop.f32.mrf.mxu2 }
 0x306   : > { %v3782_v8 = vadd.f32 %v3733_v12, %v3467_v24 }
 0x307   : > { %v4925_v60 = vadd.f32 %v7463_v21, %v4889_v29 }
 0x309   : > { %v4957_v38 = vmax.f32 %v4925_v60, 0.0 }
 0x30a   : > { %v4415_v47 = vpop.f32.mrf.mxu3  ;;  %v3423_v46 = vpop.f32.mrf.mxu1 }
 0x30b   : > { %v4989_v19 = vpack.c.bf16 %v4957_v38, %v4957_v38  ;;  %v4464_v11 = vadd.f32 %v4415_v47, %v3782_v8  ;;  %v4841_v27 = vpop.f32.mrf.mxu0  ;;  %v3469_v23 = vadd.f32 %v3423_v46, %v7056_v52 }
 0x30d   : > { %5021 = vst.msk [vmem:[%s7228_s8 + $0x50] sm:$0xf] %vm211_vm0, %v4989_v19  ;;  %v4890_v22 = vadd.f32 %v4841_v27, %v4464_v11  ;;  %v3736_v53 = vpop.f32.mrf.mxu2 }
 0x30e   : > { %v3783_v16 = vadd.f32 %v3736_v53, %v3468_v10 }
 0x30f   : > { %v4926_v61 = vadd.f32 %v7463_v21, %v4890_v22 }
 0x311   : > { %v4958_v7 = vmax.f32 %v4926_v61, 0.0 }
 0x312   : > { %v4418_v35 = vpop.f32.mrf.mxu3  ;;  %v3426_v20 = vpop.f32.mrf.mxu1 }
 0x313   : > { %v4990_v18 = vpack.c.bf16 %v4958_v7, %v4958_v7  ;;  %v4465_v54 = vadd.f32 %v4418_v35, %v3783_v16  ;;  %v4844_v30 = vpop.f32.mrf.mxu0  ;;  %v3470_v63 = vadd.f32 %v3426_v20, %v7070_v6 }
 0x315   : > { %5022 = vst.msk [vmem:[%s7228_s8 + $0x54] sm:$0xf] %vm211_vm0, %v4990_v18  ;;  %v4891_v1 = vadd.f32 %v4844_v30, %v4465_v54  ;;  %v3738_v2 = vpop.f32.mrf.mxu2 }
 0x316   : > { %v3784_v34 = vadd.f32 %v3738_v2, %v3469_v23 }
 0x317   : > { %v4927_v9 = vadd.f32 %v7463_v21, %v4891_v1 }
 0x319   : > { %v4959_v17 = vmax.f32 %v4927_v9, 0.0 }
 0x31a   : > { %v4420_v36 = vpop.f32.mrf.mxu3  ;;  %v3428_v26 = vpop.f32.mrf.mxu1 }
 0x31b   : > { %v4991_v0 = vpack.c.bf16 %v4959_v17, %v4959_v17  ;;  %v4466_v42 = vadd.f32 %v4420_v36, %v3784_v34  ;;  %v4846_v57 = vpop.f32.mrf.mxu0  ;;  %v3471_v33 = vadd.f32 %v3428_v26, %v7090_v49 }
 0x31d   : > { %5023 = vst.msk [vmem:[%s7228_s8 + $0x58] sm:$0xf] %vm211_vm0, %v4991_v0  ;;  %v4892_v4 = vadd.f32 %v4846_v57, %v4466_v42  ;;  %v3741_v43 = vpop.f32.mrf.mxu2 }
 0x31e   : > { %v3785_v52 = vadd.f32 %v3741_v43, %v3470_v63 }
 0x31f   : > { %v4928_v44 = vadd.f32 %v7463_v21, %v4892_v4 }
 0x321   : > { %v4960_v14 = vmax.f32 %v4928_v44, 0.0 }
 0x322   : > { %v4423_v58 = vpop.f32.mrf.mxu3  ;;  %v3431_v32 = vpop.f32.mrf.mxu1 }
 0x323   : > { %v4992_v50 = vpack.c.bf16 %v4960_v14, %v4960_v14  ;;  %v4467_v62 = vadd.f32 %v4423_v58, %v3785_v52  ;;  %v4849_v55 = vpop.f32.mrf.mxu0  ;;  %v3472_v29 = vadd.f32 %v3431_v32, %v7105_v51 }
 0x325   : > { %5024 = vst.msk [vmem:[%s7228_s8 + $0x5c] sm:$0xf] %vm211_vm0, %v4992_v50  ;;  %v4893_v40 = vadd.f32 %v4849_v55, %v4467_v62  ;;  %v3743_v5 = vpop.f32.mrf.mxu2 }
 0x326   : > { %v3786_v6 = vadd.f32 %v3743_v5, %v3471_v33 }
 0x327   : > { %v4929_v45 = vadd.f32 %v7463_v21, %v4893_v40 }
 0x329   : > { %v4961_v59 = vmax.f32 %v4929_v45, 0.0 }
 0x32a   : > { %v4425_v31 = vpop.f32.mrf.mxu3  ;;  %v3433_v13 = vpop.f32.mrf.mxu1 }
 0x32b   : > { %v4993_v15 = vpack.c.bf16 %v4961_v59, %v4961_v59  ;;  %v4468_v39 = vadd.f32 %v4425_v31, %v3786_v6  ;;  %v4851_v48 = vpop.f32.mrf.mxu0  ;;  %v3473_v27 = vadd.f32 %v3433_v13, %v7122_v3 }
 0x32d   : > { %5025 = vst.msk [vmem:[%s7228_s8 + $0x60] sm:$0xf] %vm211_vm0, %v4993_v15  ;;  %v4894_v28 = vadd.f32 %v4851_v48, %v4468_v39  ;;  %v3746_v24 = vpop.f32.mrf.mxu2 }
 0x32e   : > { %v3787_v49 = vadd.f32 %v3746_v24, %v3472_v29 }
 0x32f   : > { %v4930_v12 = vadd.f32 %v7463_v21, %v4894_v28 }
 0x331   : > { %v4962_v60 = vmax.f32 %v4930_v12, 0.0 }
 0x332   : > { %v4428_v8 = vpop.f32.mrf.mxu3  ;;  %v3436_v19 = vpop.f32.mrf.mxu1 }
 0x333   : > { %v4994_v38 = vpack.c.bf16 %v4962_v60, %v4962_v60  ;;  %v4469_v47 = vadd.f32 %v4428_v8, %v3787_v49  ;;  %v4854_v46 = vpop.f32.mrf.mxu0  ;;  %v3474_v18 = vadd.f32 %v3436_v19, %v7137_v41 }
 0x335   : > { %5026 = vst.msk [vmem:[%s7228_s8 + $0x64] sm:$0xf] %vm211_vm0, %v4994_v38  ;;  %v4895_v11 = vadd.f32 %v4854_v46, %v4469_v47  ;;  %v3748_v22 = vpop.f32.mrf.mxu2 }
 0x336   : > { %v3788_v51 = vadd.f32 %v3748_v22, %v3473_v27 }
 0x337   : > { %v4931_v10 = vadd.f32 %v7463_v21, %v4895_v11 }
 0x339   : > { %v4963_v53 = vmax.f32 %v4931_v10, 0.0 }
 0x33a   : > { %v4430_v61 = vpop.f32.mrf.mxu3  ;;  %v3438_v30 = vpop.f32.mrf.mxu1 }
 0x33b   : > { %v4995_v16 = vpack.c.bf16 %v4963_v53, %v4963_v53  ;;  %v4470_v7 = vadd.f32 %v4430_v61, %v3788_v51  ;;  %v4856_v35 = vpop.f32.mrf.mxu0  ;;  %v3475_v26 = vadd.f32 %v3438_v30, %v7158_v37 }
 0x33d   : > { %5027 = vst.msk [vmem:[%s7228_s8 + $0x68] sm:$0xf] %vm211_vm0, %v4995_v16  ;;  %v4896_v20 = vadd.f32 %v4856_v35, %v4470_v7  ;;  %v3751_v54 = vpop.f32.mrf.mxu2 }
 0x33e   : > { %v3789_v3 = vadd.f32 %v3751_v54, %v3474_v18 }
 0x33f   : > { %v4932_v1 = vadd.f32 %v7463_v21, %v4896_v20 }
 0x341   : > { %v4964_v23 = vmax.f32 %v4932_v1, 0.0 }
 0x342   : > { %v4433_v2 = vpop.f32.mrf.mxu3  ;;  %v3441_v57 = vpop.f32.mrf.mxu1 }
 0x343   : > { %v4996_v9 = vpack.c.bf16 %v4964_v23, %v4964_v23  ;;  %v4471_v34 = vadd.f32 %v4433_v2, %v3789_v3  ;;  %v4859_v17 = vpop.f32.mrf.mxu0  ;;  %v3476_v58 = vadd.f32 %v3441_v57, %v7175_v25 }
 0x345   : > { %5028 = vst.msk [vmem:[%s7228_s8 + $0x6c] sm:$0xf] %vm211_vm0, %v4996_v9  ;;  %v4897_v36 = vadd.f32 %v4859_v17, %v4471_v34  ;;  %v3753_v0 = vpop.f32.mrf.mxu2 }
 0x346   : > { %v3790_v41 = vadd.f32 %v3753_v0, %v3475_v26 }
 0x347   : > { %v4933_v42 = vadd.f32 %v7463_v21, %v4897_v36 }
 0x349   : > { %v4965_v4 = vmax.f32 %v4933_v42, 0.0 }
 0x34a   : > { %v4435_v63 = vpop.f32.mrf.mxu3  ;;  %v3443_v40 = vpop.f32.mrf.mxu1 }
 0x34b   : > { %v4997_v43 = vpack.c.bf16 %v4965_v4, %v4965_v4  ;;  %v4472_v44 = vadd.f32 %v4435_v63, %v3790_v41  ;;  %v4861_v52 = vpop.f32.mrf.mxu0  ;;  %v3477_v59 = vadd.f32 %v3443_v40, %v7191_v56 }
 0x34d   : > { %5029 = vst.msk [vmem:[%s7228_s8 + $0x70] sm:$0xf] %vm211_vm0, %v4997_v43  ;;  %v4898_v14 = vadd.f32 %v4861_v52, %v4472_v44  ;;  %v3756_v32 = vpop.f32.mrf.mxu2 }
 0x34e   : > { %v3791_v37 = vadd.f32 %v3756_v32, %v3476_v58 }
 0x34f   : > { %v4934_v50 = vadd.f32 %v7463_v21, %v4898_v14 }
 0x351   : > { %v4966_v62 = vmax.f32 %v4934_v50, 0.0 }
 0x352   : > { %v4438_v55 = vpop.f32.mrf.mxu3 }
 0x353   : > { %v4998_v33 = vpack.c.bf16 %v4966_v62, %v4966_v62  ;;  %v4473_v5 = vadd.f32 %v4438_v55, %v3791_v37  ;;  %v4864_v45 = vpop.f32.mrf.mxu0 }
 0x355   : > { %5030 = vst.msk [vmem:[%s7228_s8 + $0x74] sm:$0xf] %vm211_vm0, %v4998_v33  ;;  %v4899_v6 = vadd.f32 %v4864_v45, %v4473_v5  ;;  %v3758_v31 = vpop.f32.mrf.mxu2 }
 0x356   : > { %v3792_v13 = vadd.f32 %v3758_v31, %v3477_v59 }
 0x357   : > { %v4935_v25 = vadd.f32 %v7463_v21, %v4899_v6 }
 0x359   : > { %v4967_v15 = vmax.f32 %v4935_v25, 0.0 }
 0x35a   : > { %v4440_v39 = vpop.f32.mrf.mxu3 }
 0x35b   : > { %v4999_v48 = vpack.c.bf16 %v4967_v15, %v4967_v15  ;;  %v4474_v28 = vadd.f32 %v4440_v39, %v3792_v13  ;;  %v4866_v29 = vpop.f32.mrf.mxu0 }
 0x35d   : > { %5031 = vst.msk [vmem:[%s7228_s8 + $0x78] sm:$0xf] %vm211_vm0, %v4999_v48  ;;  %v4900_v24 = vadd.f32 %v4866_v29, %v4474_v28 }
 0x35f   : > { %v4936_v12 = vadd.f32 %v7463_v21, %v4900_v24 }
 0x361   : > { %v4968_v49 = vmax.f32 %v4936_v12, 0.0 }
 0x363   : > { %v5000_v60 = vpack.c.bf16 %v4968_v49, %v4968_v49 }
 0x365   : > { %5032 = vst.msk [vmem:[%s7228_s8 + $0x7c] sm:$0xf] %vm211_vm0, %v5000_v60 }
 0x366 PF: > { %p14_p4 = scmp.ge.s32.totalorder %s6028_s24, 4   ;;  %s7561_s12 = smov %s5951_s13 }
 0x367   : > { %s7562_s13 = smov %s5955_s14  ;;  %s7563_s14 = smov %s6041_s29 }
 0x368   : > { %s7564_s15 = smov %s6028_s24  ;;  %16 = sbr.rel (!%p14_p4) target bundleno = 4 (0x4), region = 86 }
 0x36d   :  { %5054 = vsyncpa [#allocation4], 1 }
 0x36e   :  { %5056 = vsyncpa [#allocation4 + $0x1], 1 }
 0x36f   :  { %5057 = vsyncpa [#allocation6], 1 }

</bundles_post_ra>
